<compile_context>
chip_gen: v5e
topology: v5e:2x2
jax: 0.10.0
libtpu: 0.0.40
codegen_flags: <defaults>
</compile_context>

<pallas_src>
import math
import numpy as np

import jax
import jax.numpy as jnp
from jax import lax
from jax.experimental import pallas as pl
from jax.experimental.pallas import tpu as pltpu

_MASK_VALUE = -1e30          # finite large-negative causal mask value


def _vmem_limit_bytes():
    """Generation-aware scoped-VMEM cap: ~3/4 of physical VMEM, capped at 100 MiB.
    (128 MiB on v5e/v6e -> 96 MiB; 64 MiB on v7x -> 48 MiB.)"""
    cap = 64 << 20
    try:
        info = pltpu.get_tpu_info()
        cap = int(getattr(info, "vmem_capacity_bytes", cap)) or cap
    except Exception:
        pass
    return min(cap * 3 // 4, 100 << 20)


_VMEM_LIMIT = _vmem_limit_bytes()


def _pick_tile(dim, target, base):
    """Largest multiple of `base` that divides `dim` and is <= `target`; else `dim`."""
    if dim <= target:
        return dim
    t = (target // base) * base
    while t >= base:
        if dim % t == 0:
            return t
        t -= base
    return dim


# ----------------------------------------------------------------------------
# Kernel 1: tiled, pipelined linear  y = x @ W + b   (c_attn and c_proj)
# ----------------------------------------------------------------------------
def _linear_kernel_acc(x_ref, w_ref, b_ref, o_ref, acc_ref):
    k = pl.program_id(2)

    @pl.when(k == 0)
    def _():
        acc_ref[...] = jnp.zeros_like(acc_ref)

    acc_ref[...] += jnp.dot(x_ref[...], w_ref[...],
                            preferred_element_type=jnp.float32)

    @pl.when(k == pl.num_programs(2) - 1)
    def _():
        o_ref[...] = (acc_ref[...] + b_ref[...]).astype(o_ref.dtype)


def _linear_kernel_noacc(x_ref, w_ref, b_ref, o_ref):
    # Whole reduction in one tile: no f32 accumulator round-trip needed.
    o_ref[...] = (jnp.dot(x_ref[...], w_ref[...],
                          preferred_element_type=jnp.float32)
                  + b_ref[...]).astype(o_ref.dtype)


def pallas_linear(x2d, w, b, *, out_dtype=None, tm=512, tn=512, tk=1024):
    """y = x2d @ w + b with bf16 operands and f32 accumulation."""
    M, K = x2d.shape
    K2, N = w.shape
    assert K == K2 and b.shape == (N,)
    out_dtype = out_dtype or x2d.dtype
    tm = _pick_tile(M, tm, 16)     # sublane axis of x / out blocks (bf16-safe)
    tn = _pick_tile(N, tn, 128)    # lane axis of w / out blocks
    tk = _pick_tile(K, tk, 128)    # lane axis of x block, sublane axis of w block
    b2d = b.reshape(1, N)
    kt = K // tk

    if kt == 1:
        # Fast path: single reduction tile, write straight to the output.
        return pl.pallas_call(
            _linear_kernel_noacc,
            out_shape=jax.ShapeDtypeStruct((M, N), out_dtype),
            grid_spec=pltpu.PrefetchScalarGridSpec(
                num_scalar_prefetch=0,
                grid=(M // tm, N // tn),
                in_specs=[
                    pl.BlockSpec((tm, K), lambda i, j: (i, 0)),
                    pl.BlockSpec((K, tn), lambda i, j: (0, j)),
                    pl.BlockSpec((1, tn), lambda i, j: (0, j)),
                ],
                out_specs=pl.BlockSpec((tm, tn), lambda i, j: (i, j)),
            ),
            compiler_params=pltpu.CompilerParams(
                dimension_semantics=("parallel", "parallel"),
                vmem_limit_bytes=_VMEM_LIMIT,
            ),
        )(x2d, w, b2d)

    return pl.pallas_call(
        _linear_kernel_acc,
        out_shape=jax.ShapeDtypeStruct((M, N), out_dtype),
        grid_spec=pltpu.PrefetchScalarGridSpec(
            num_scalar_prefetch=0,
            grid=(M // tm, N // tn, kt),               # reduction (K) axis last
            in_specs=[
                pl.BlockSpec((tm, tk), lambda i, j, k: (i, k)),
                pl.BlockSpec((tk, tn), lambda i, j, k: (k, j)),
                pl.BlockSpec((1, tn), lambda i, j, k: (0, j)),
            ],
            out_specs=pl.BlockSpec((tm, tn), lambda i, j, k: (i, j)),
            scratch_shapes=[pltpu.VMEM((tm, tn), jnp.float32)],
        ),
        compiler_params=pltpu.CompilerParams(
            dimension_semantics=("parallel", "parallel", "arbitrary"),
            vmem_limit_bytes=_VMEM_LIMIT,
        ),
    )(x2d, w, b2d)


# ----------------------------------------------------------------------------
# Kernel 2: one-pass RoPE on the Q/K head slices of the packed qkv
# ----------------------------------------------------------------------------
def compute_rope_tables(T, head_dim):
    # Mirrors the PyTorch module: inv_freq / positions in bfloat16,
    # emb = cat(freqs, freqs), then cos/sin.  Cast to f32 for in-kernel FMA.
    inv_freq = 1.0 / (10000.0 ** (jnp.arange(0, head_dim, 2, dtype=jnp.bfloat16)
                                  / head_dim))
    t = jnp.arange(T, dtype=jnp.bfloat16)
    freqs = jnp.einsum("i,j->ij", t, inv_freq)            # (T, head_dim//2)
    emb = jnp.concatenate([freqs, freqs], axis=-1)         # (T, head_dim)
    cos = jnp.cos(emb).astype(jnp.float32)
    sin = jnp.sin(emb).astype(jnp.float32)
    # Fold the interleaved rotate_half parity/sign into two sin tables so the
    # kernel needs no iota/select/negate:
    #   rotate_half(x)[j] * sin[j] = x[j+1]*sin_a[j] + x[j-1]*sin_b[j]
    # with sin_a = -sin on even lanes (0 on odd), sin_b = sin on odd lanes.
    even = (jnp.arange(head_dim) % 2) == 0
    sin_a = jnp.where(even, -sin, 0.0)
    sin_b = jnp.where(even, 0.0, sin)
    return cos, sin, sin_a, sin_b


def pallas_rope_qk(qkv, cos, sin_a, sin_b, n_head, *, block_t=256):
    """Pre-rotate the Q and K head slices of the packed (B, T, 3C) bf16 qkv.

    Returns a (B, T, 2C) bf16 array (Q heads in [0, C), K heads in [C, 2C)),
    with Q additionally pre-scaled by 1/sqrt(head_dim)."""
    B, T, threeC = qkv.shape
    C = threeC // 3
    H = n_head
    D = C // H
    assert D % 128 == 0, "head-sliced RoPE/attention needs head_dim % 128 == 0"
    blk = _pick_tile(T, block_t, 16)
    nblk = T // blk
    q_scale = 1.0 / math.sqrt(D)

    def kernel(x_ref, cos_ref, sa_ref, sb_ref, o_ref):
        hs = pl.program_id(2)                    # head slot: [0,H)=Q, [H,2H)=K
        x = x_ref[...].astype(jnp.float32)
        nxt = pltpu.roll(x, D - 1, axis=1)       # nxt[:, j] = x[:, (j + 1) % D]
        prv = pltpu.roll(x, 1, axis=1)           # prv[:, j] = x[:, (j - 1) % D]
        rot = x * cos_ref[...] + nxt * sa_ref[...] + prv * sb_ref[...]
        scale = jnp.where(hs < H, q_scale, 1.0)  # fold 1/sqrt(D) into Q only
        o_ref[...] = (rot * scale).astype(o_ref.dtype)

    head_blk = (None, blk, D)
    tab_blk = (blk, D)
    return pl.pallas_call(
        kernel,
        out_shape=jax.ShapeDtypeStruct((B, T, 2 * C), jnp.bfloat16),
        grid_spec=pltpu.PrefetchScalarGridSpec(
            num_scalar_prefetch=0,
            grid=(B, nblk, 2 * H),
            in_specs=[
                pl.BlockSpec(head_blk, lambda b, ti, hs: (b, ti, hs)),
                pl.BlockSpec(tab_blk, lambda b, ti, hs: (ti, 0)),   # cos
                pl.BlockSpec(tab_blk, lambda b, ti, hs: (ti, 0)),   # sin_a
                pl.BlockSpec(tab_blk, lambda b, ti, hs: (ti, 0)),   # sin_b
            ],
            out_specs=pl.BlockSpec(head_blk, lambda b, ti, hs: (b, ti, hs)),
        ),
        compiler_params=pltpu.CompilerParams(
            dimension_semantics=("parallel", "parallel", "parallel"),
            vmem_limit_bytes=_VMEM_LIMIT,
        ),
    )(qkv, cos, sin_a, sin_b)


# ----------------------------------------------------------------------------
# Kernel 3: causal flash attention on a triangular (no dead steps) grid
# ----------------------------------------------------------------------------
def _online_softmax_step(q, k, v, m_ref, l_ref, acc_ref, *, masked):
    # q, k, v: (blk, D) bf16 (q pre-rotated & pre-scaled, k pre-rotated).
    s = lax.dot_general(q, k, (((1,), (1,)), ((), ())),
                        preferred_element_type=jnp.float32)        # (blk, blk)
    if masked:
        # Only the diagonal block needs masking; qi == ki so local indices
        # suffice (global offsets cancel).
        row = lax.broadcasted_iota(jnp.int32, s.shape, 0)
        col = lax.broadcasted_iota(jnp.int32, s.shape, 1)
        s = jnp.where(col <= row, s, _MASK_VALUE)
    m_prev = m_ref[...]
    m_new = jnp.maximum(m_prev, jnp.max(s, axis=-1, keepdims=True))
    alpha = jnp.exp(m_prev - m_new)
    p = jnp.exp(s - m_new)
    l_ref[...] = alpha * l_ref[...] + jnp.sum(p, axis=-1, keepdims=True)
    acc_ref[...] = alpha * acc_ref[...] + jnp.dot(
        p.astype(v.dtype), v, preferred_element_type=jnp.float32)
    m_ref[...] = m_new


def pallas_flash_attention(qk_rot, qkv, n_head, *, block_t=256,
                           approx_recip=True):
    """Causal flash attention.

    qk_rot: (B, T, 2C) bf16, RoPE'd Q (pre-scaled) and K head slices.
    qkv:    (B, T, 3C) bf16 packed c_attn output (V read from its last C cols).
    Returns (B, T, C) bf16.
    """
    B, T, twoC = qk_rot.shape
    C = twoC // 2
    H = n_head
    D = C // H
    assert D % 128 == 0
    blk = _pick_tile(T, block_t, 16)
    nblk = T // blk

    # Flattened lower-triangular (qi, ki) schedule: no empty causal grid steps.
    qi_list, ki_list = [], []
    for qi in range(nblk):
        for ki in range(qi + 1):
            qi_list.append(qi)
            ki_list.append(ki)
    qi_map = jnp.asarray(np.asarray(qi_list, dtype=np.int32))
    ki_map = jnp.asarray(np.asarray(ki_list, dtype=np.int32))
    n_tri = len(qi_list)

    def kernel(qi_ref, ki_ref, q_ref, k_ref, v_ref, o_ref, m_ref, l_ref, acc_ref):
        t = pl.program_id(2)
        qi = qi_ref[t]
        ki = ki_ref[t]

        # First kv block of a q block: reset online-softmax state.
        @pl.when(ki == 0)
        def _():
            m_ref[...] = jnp.full(m_ref.shape, -jnp.inf, dtype=m_ref.dtype)
            l_ref[...] = jnp.zeros(l_ref.shape, dtype=l_ref.dtype)
            acc_ref[...] = jnp.zeros(acc_ref.shape, dtype=acc_ref.dtype)

        # Off-diagonal blocks: no causal mask work at all.
        @pl.when(ki < qi)
        def _():
            _online_softmax_step(q_ref[...], k_ref[...], v_ref[...],
                                 m_ref, l_ref, acc_ref, masked=False)

        # Diagonal block: masked update, then normalize and store.
        @pl.when(ki == qi)
        def _():
            _online_softmax_step(q_ref[...], k_ref[...], v_ref[...],
                                 m_ref, l_ref, acc_ref, masked=True)
            if approx_recip:
                inv_l = pl.reciprocal(l_ref[...], approx=True)
            else:
                inv_l = 1.0 / l_ref[...]
            o_ref[...] = (acc_ref[...] * inv_l).astype(o_ref.dtype)

    head_blk = (None, blk, D)
    # NOTE: if a bundle/xprof dump on v5e shows exposed DMA waits, add
    # pipeline_mode=pl.Buffered(3) to the k/v BlockSpecs below.
    return pl.pallas_call(
        kernel,
        out_shape=jax.ShapeDtypeStruct((B, T, C), qkv.dtype),
        grid_spec=pltpu.PrefetchScalarGridSpec(
            num_scalar_prefetch=2,                 # qi_map, ki_map in SMEM
            grid=(B, H, n_tri),
            in_specs=[
                # q / k from the pre-rotated (B,T,2C) buffer; v from packed qkv.
                pl.BlockSpec(head_blk, lambda b, h, t, qm, km: (b, qm[t], h)),
                pl.BlockSpec(head_blk, lambda b, h, t, qm, km: (b, km[t], H + h)),
                pl.BlockSpec(head_blk, lambda b, h, t, qm, km: (b, km[t], 2 * H + h)),
            ],
            out_specs=pl.BlockSpec(head_blk, lambda b, h, t, qm, km: (b, qm[t], h)),
            scratch_shapes=[
                pltpu.VMEM((blk, 1), jnp.float32),     # running max m
                pltpu.VMEM((blk, 1), jnp.float32),     # running sum l
                pltpu.VMEM((blk, D), jnp.float32),     # output accumulator
            ],
        ),
        compiler_params=pltpu.CompilerParams(
            dimension_semantics=("parallel", "parallel", "arbitrary"),
            vmem_limit_bytes=_VMEM_LIMIT,
        ),
    )(qi_map, ki_map, qk_rot, qk_rot, qkv)


# ----------------------------------------------------------------------------
# Module wrapper + pure-JAX reference
# ----------------------------------------------------------------------------
class CausalSelfAttentionPallas:
    """Forward-pass equivalent of the PyTorch CausalSelfAttention module."""
    # TODO(synk): the use_cache (KV-cache concat) and attention_mask paths of the
    # reference module are not implemented; this covers the default forward(x).

    def __init__(self, n_embd, n_head, key, *, block_t=256):
        assert n_embd % n_head == 0
        self.n_embd = n_embd
        self.n_head = n_head
        self.head_dim = n_embd // n_head
        self.block_t = block_t
        k1, k2, k3, k4 = jax.random.split(key, 4)
        # Weights stored bf16 in HBM (halves GEMM DMA bytes); biases stay f32
        # and are added to the f32 accumulator inside the kernels.
        self.w_attn = (0.02 * jax.random.normal(
            k1, (n_embd, 3 * n_embd), jnp.float32)).astype(jnp.bfloat16)
        self.b_attn = 0.02 * jax.random.normal(k2, (3 * n_embd,), jnp.float32)
        self.w_proj = (0.02 * jax.random.normal(
            k3, (n_embd, n_embd), jnp.float32)).astype(jnp.bfloat16)
        self.b_proj = 0.02 * jax.random.normal(k4, (n_embd,), jnp.float32)

    def __call__(self, x):
        B, T, C = x.shape
        x_bf = x.astype(jnp.bfloat16)
        qkv = pallas_linear(x_bf.reshape(B * T, C), self.w_attn, self.b_attn,
                            out_dtype=jnp.bfloat16)
        qkv = qkv.reshape(B, T, 3 * C)           # stays packed; no split/transpose
        cos, _, sin_a, sin_b = compute_rope_tables(T, self.head_dim)
        qk_rot = pallas_rope_qk(qkv, cos, sin_a, sin_b, self.n_head,
                                block_t=self.block_t)          # (B, T, 2C) bf16
        y = pallas_flash_attention(qk_rot, qkv, self.n_head,
                                   block_t=self.block_t)        # (B, T, C) bf16
        y = pallas_linear(y.reshape(B * T, C), self.w_proj, self.b_proj,
                          out_dtype=jnp.float32)
        return y.reshape(B, T, C)

    # pure-JAX f32 reference of the exact PyTorch forward (same bf16 weights)
    def reference(self, x):
        B, T, C = x.shape
        H, D = self.n_head, self.head_dim
        w_attn = self.w_attn.astype(jnp.float32)
        w_proj = self.w_proj.astype(jnp.float32)
        qkv = x @ w_attn + self.b_attn
        q, k, v = jnp.split(qkv, 3, axis=2)
        q = q.reshape(B, T, H, D).transpose(0, 2, 1, 3)
        k = k.reshape(B, T, H, D).transpose(0, 2, 1, 3)
        v = v.reshape(B, T, H, D).transpose(0, 2, 1, 3)
        cos, sin, _, _ = compute_rope_tables(T, D)

        def rotate_half(t):
            t1, t2 = t[..., ::2], t[..., 1::2]
            return jnp.stack((-t2, t1), axis=-1).reshape(t.shape)

        q = q * cos + rotate_half(q) * sin
        k = k * cos + rotate_half(k) * sin
        s = jnp.einsum("bhqd,bhkd->bhqk", q, k) / math.sqrt(D)
        mask = jnp.tril(jnp.ones((T, T), dtype=bool))
        s = jnp.where(mask, s, -jnp.inf)
        p = jax.nn.softmax(s, axis=-1)
        y = jnp.einsum("bhqk,bhkd->bhqd", p, v)
        y = y.transpose(0, 2, 1, 3).reshape(B, T, C)
        return y @ w_proj + self.b_proj


if __name__ == "__main__":
    # Tile-aligned demo config: n_embd=256, n_head=2 -> head_dim=128, T=512.
    # With block_t=256 the attention grid has nblk=2 -> 3 triangular steps per
    # (batch, head), exercising init, the unmasked off-diagonal path and the
    # masked diagonal path; both linears hit the single-K-tile fast path.
    B, T, n_embd, n_head = 2, 512, 256, 2

    key = jax.random.PRNGKey(0)
    k_param, k_x = jax.random.split(key)
    module = CausalSelfAttentionPallas(n_embd, n_head, k_param, block_t=256)

    x = jax.random.normal(k_x, (B, T, n_embd), jnp.float32)

    y = jax.block_until_ready(module(x))
    y_ref = jax.block_until_ready(module.reference(x))

    assert y.shape == (B, T, n_embd)
    # bf16 weights + bf16 activation storage + bf16 MXU operands (f32 accum)
    # + approx reciprocal -> loosened tolerance vs the f32 reference.
    np.testing.assert_allclose(np.asarray(y), np.asarray(y_ref),
                               rtol=3e-2, atol=1e-2)

    print("KERNEL_OK")
</pallas_src>

<mosaic_0001>
module attributes {stable_mosaic.version = 11 : i64} {
  func.func @_linear_kernel_noacc(%arg0: i32, %arg1: i32, %arg2: memref<512x256xbf16, #tpu.memory_space<vmem>>, %arg3: memref<256x384xbf16, #tpu.memory_space<vmem>>, %arg4: memref<1x384xf32, #tpu.memory_space<vmem>>, %arg5: memref<512x384xbf16, #tpu.memory_space<vmem>>) attributes {dimension_semantics = [#tpu.dimension_semantics<parallel>, #tpu.dimension_semantics<parallel>], iteration_bounds = array<i64: 2, 2>, scalar_prefetch = 0 : i64, scratch_operands = 0 : i64, tpu.core_type = #tpu.core_type<tc>, window_params = [{transform_indices = @transform_0, window_bounds = array<i64: 512, 256>}, {transform_indices = @transform_1, window_bounds = array<i64: 256, 384>}, {transform_indices = @transform_2, window_bounds = array<i64: 1, 384>}, {transform_indices = @transform_3, window_bounds = array<i64: 512, 384>}]} {
    %c0 = arith.constant 0 : index
    %c0_0 = arith.constant 0 : index
    %0 = vector.load %arg2[%c0, %c0_0] : memref<512x256xbf16, #tpu.memory_space<vmem>>, vector<512x256xbf16>
    %c0_1 = arith.constant 0 : index
    %c0_2 = arith.constant 0 : index
    %1 = vector.load %arg3[%c0_1, %c0_2] : memref<256x384xbf16, #tpu.memory_space<vmem>>, vector<256x384xbf16>
    %cst = arith.constant dense<0.000000e+00> : vector<512x384xf32>
    %2 = tpu.matmul %0, %1, %cst {dimension_numbers = #tpu.dot_dimension_numbers<[1], [0], [0], [1], [0, 0, 1, 1], [], []>} : vector<512x256xbf16>, vector<256x384xbf16>, vector<512x384xf32> -> vector<512x384xf32>
    %c0_3 = arith.constant 0 : index
    %c0_4 = arith.constant 0 : index
    %3 = vector.load %arg4[%c0_3, %c0_4] : memref<1x384xf32, #tpu.memory_space<vmem>>, vector<1x384xf32>
    %4 = vector.broadcast %3 : vector<1x384xf32> to vector<512x384xf32>
    %5 = arith.addf %2, %4 : vector<512x384xf32>
    %6 = arith.truncf %5 : vector<512x384xf32> to vector<512x384xbf16>
    %c0_5 = arith.constant 0 : index
    %c0_6 = arith.constant 0 : index
    %7 = vector.load %arg5[%c0_5, %c0_6] : memref<512x384xbf16, #tpu.memory_space<vmem>>, vector<512x384xbf16>
    tpu.vector_store %arg5[%c0_5, %c0_6], %6 {strides = array<i32>} : memref<512x384xbf16, #tpu.memory_space<vmem>>, vector<512x384xbf16>,
    return
  }
  func.func @transform_0(%arg0: i32, %arg1: i32) -> (i32, i32) {
    %c0_i32 = arith.constant 0 : i32
    %c0_i32_0 = arith.constant 0 : i32
    return %arg0, %c0_i32 : i32, i32
  }
  func.func @transform_1(%arg0: i32, %arg1: i32) -> (i32, i32) {
    %c0_i32 = arith.constant 0 : i32
    %c0_i32_0 = arith.constant 0 : i32
    return %c0_i32, %arg1 : i32, i32
  }
  func.func @transform_2(%arg0: i32, %arg1: i32) -> (i32, i32) {
    %c0_i32 = arith.constant 0 : i32
    %c0_i32_0 = arith.constant 0 : i32
    return %c0_i32, %arg1 : i32, i32
  }
  func.func @transform_3(%arg0: i32, %arg1: i32) -> (i32, i32) {
    %c0_i32 = arith.constant 0 : i32
    return %arg0, %arg1 : i32, i32
  }
}

</mosaic_0001>

<bundles_post_ra>
// kernel: tpu_custom_call.1
= control target key start
LH: loop header
LB: loop body
LE: loop exit
PB: predicated region body
PF: predicated region fallthrough
CT: control target
= control target key end

     0   :  { %s4787_s0 = inlined_call_operand.hbm [shape: bf16[1024,256], index: 0, kind: input, shape index: {}]   ;;  %s4788_s1 = inlined_call_operand.hbm [shape: bf16[256,768], index: 1, kind: input, shape index: {}]   ;;  %s4789_s2 = inlined_call_operand.hbm [shape: f32[1,768], index: 2, kind: input, shape index: {}]   ;;  %s4790_s3 = inlined_call_operand.hbm [shape: bf16[1024,768], index: 3, kind: output, shape index: {}]  }
   0x1   :  { %4864 = sst [smem:[#allocation87_spill]] %s4787_s0 }
   0x2   :  { %4865 = sst [smem:[#allocation88_spill]] %s4788_s1 }
   0x3   :  { %4866 = sst [smem:[#allocation89_spill]] %s4790_s3 }
   0x4   :  { %8 = vsyncpa [#allocation3], 0 }
   0x5   :  { %10 = vsyncpa [#allocation3 + $0x1], 0 }
   0x6   :  { %11 = vsyncpa [#allocation6], 0 }
   0x7   :  { %13 = vsyncpa [#allocation6 + $0x1], 0 }
   0x8   :  { %14 = vsyncpa [#allocation4], 0 }
   0x9   :  { %16 = vsyncpa [#allocation4 + $0x1], 0  ;;  %s3435_s12 = smov 0   ;;  %s3437_s13 = smov 0  }
   0xa   :  { %s3439_s14 = smov 0   ;;  %s3441_s15 = smov 0  }
   0xb   :  { %s3443_s16 = smov 0   ;;  %s3445_s17 = smov 0  }
   0xc   :  { %s3447_s18 = smov 0   ;;  %s3449_s19 = smov 0  }
   0xd   :  { %s3451_s20 = smov 0   ;;  %s3453_s21 = smov 0  }
   0xe   :  { %s3455_s22 = smov 0   ;;  %s3457_s23 = smov 0  }
   0xf   :  { %s3459_s24 = smov 0   ;;  %s3461_s25 = smov 0  }
  0x10 LB: > { %4867 = sst [smem:[#allocation12_spill]] %s3353_s12  ;;  %s31_s26 = sadd.s32 1, %s3397_s23  ;;  %s3405_s25 = sphi %s3461_s25, %s22_s25   ;;  %s3401_s24 = sphi %s3459_s24, %s5029_s24   ;;  %s3397_s23 = sphi %s3457_s23, %s5038_s23   ;;  %s3393_s22 = sphi %s3455_s22, %s5027_s22   ;;  %s3389_s21 = sphi %s3453_s21, %s5037_s21   ;;  %s3385_s20 = sphi %s3451_s20, %s5026_s20   ;;  %s3381_s19 = sphi %s3449_s19, %s5036_s19   ;;  %s3377_s18 = sphi %s3447_s18, %s5035_s18   ;;  %s3373_s17 = sphi %s3445_s17, %s5034_s17   ;;  %s3369_s16 = sphi %s3443_s16, %s5033_s16   ;;  %s3365_s15 = sphi %s3441_s15, %s5032_s15   ;;  %s3361_s14 = sphi %s3439_s14, %s5023_s14   ;;  %s3357_s13 = sphi %s3437_s13, %s5031_s13   ;;  %s3353_s12 = sphi %s3435_s12, %s5030_s12  }
  0x11   : > { %4868 = sst [smem:[#allocation13_spill]] %s3361_s14  ;;  %p49_p0 = scmp.eq.s32.totalorder %s3405_s25, 0 }
  0x12   : > { %4869 = sst [smem:[#allocation14_spill]] %s3385_s20  ;;  %p74_p1 = scmp.ne.s32.totalorder %s3373_s17, %s3369_s16 }
  0x13   : > { %4870 = sst [smem:[#allocation15_spill]] %s3393_s22  ;;  %p80_p2 = scmp.ne.s32.totalorder %s3369_s16, %s3365_s15 }
  0x14   : > { %4871 = sst [smem:[#allocation16_spill]] %s3401_s24  ;;  %p76_p3 = por %p74_p1, %p49_p0 }
  0x15   : > { %p3043_p4 = scmp.lt.s32.totalorder %s3405_s25, 4  ;;  %s181_s28 = sand.u32 1, %s3405_s25  }
  0x16   : > { %s4791_s29 = sand.u32 1, %s3373_s17   ;;  %s2886_s4 = smul.u32 12, %s3397_s23 }
  0x17   : > { %s3015_s30 = smul.u32 384, %s4791_s29  ;;  %p3522_p5 = pnand %p3043_p4, %p76_p3 }
  0x18   : > { %s4873_s1 = sld [smem:[#allocation88_spill]]  ;;  %s3529_s29 = scalar_lea.sflag [#allocation6], %s181_s28 }
  0x19   : > { %s185_s9 = scalar_lea.vmem [#allocation5], %s3015_s30  ;;  %s3407_s6 = smov 384  }
  0x1a   : > { %s193_s10 = sshll.u32 %s185_s9, 4  ;;  %s3408_s7 = smov 192   ;;  %s194_s10 = int_to_ptr.vmem [resolvable:$true] %s193_s10 }
  0x1b   : > { %p2429_p6 = scmp.ge.s32.totalorder %s3405_s25, 1  ;;  %p220_p7 = scmp.lt.s32.totalorder %s3405_s25, 5 }
  0x1c   : > { %s2421_s28 = sadd.s32 4294967294, %s3405_s25   ;;  %p32_p9 = scmp.ge.s32.totalorder %s31_s26, 2 }
  0x1d   : > { %p3536_p8 = pnand %p2429_p6, %p220_p7  ;;  %s34_s9 = sadd.s32 1, %s3401_s24 }
  0x1e   : > { %s190_s8 = scalar_lea.hbm %s4873_s1, %s2886_s4  ;;  %s3409_s4 = smov 12  }
  0x1f   : > { %s191_s11 = sshll.u32 %s190_s8, 4  ;;  %s3541_s8 = sadd.s32 4294967295, %s3405_s25   ;;  %s192_s11 = int_to_ptr.hbm [resolvable:$true] %s191_s11 }
  0x20   : > { %3035 = dma.hbm_to_vmem [thread:$0]  (!%p3522_p5), %s192_s11, 6144, %s194_s10, %s3529_s29, %s3407_s6, %s3408_s7, %s3409_s4  }
  0x21   : > { %s41_s27 = sadd.s32 1, %s3385_s20  ;;  %s5040_s26 = smov (%p32_p9, %s31_s26), 0 }
  0x22   : > { %4875 = sst [smem:[#allocation17_spill]] %s5040_s26  ;;  %s5042_s9 = smov (!%p32_p9, %s34_s9), %s3401_s24 }
  0x23   : > { %p48_p10 = scmp.ne.s32.totalorder %s3385_s20, %s3381_s19  ;;  %p54_p11 = scmp.ne.s32.totalorder %s3381_s19, %s3377_s18 }
  0x24   : > { %p36_p12 = scmp.ge.s32.totalorder %s5042_s9, 2  ;;  %p55_p13 = scmp.eq.s32.totalorder %s3541_s8, 0 }
  0x25   : > { %p3560_p1 = por %p49_p0, %p48_p10  ;;  %s64_s11 = ssub.s32 %s3397_s23, %s5040_s26 }
  0x26   : > { %s5044_s9 = smov (%p36_p12, %s5042_s9), 0  ;;  %p3568_p3 = por %p55_p13, %p54_p11 }
  0x27   : > { %4877 = sst [smem:[#allocation18_spill]] %s5044_s9  ;;  %p65_p6 = scmp.eq.s32.totalorder %s64_s11, 0 }
  0x28   : > { %s38_s18 = ssub.s32 %s3401_s24, %s5044_s9  ;;  %p3577_p7 = por %p80_p2, %p55_p13 }
  0x29   : > { %p39_p0 = scmp.eq.s32.totalorder %s38_s18, 0  ;;  %s118_s4 = sor.u32 %s64_s11, %s38_s18 }
  0x2a   : > { %s4880_s1 = sadd.s32 1, %s3373_s17  ;;  %p119_p9 = scmp.eq.s32.totalorder %s118_s4, 0 }
  0x2b   : > { %s3584_s26 = scalar_select %p65_p6, %s3373_s17, %s4880_s1  }
  0x2c   : > { %s3587_s3 = scalar_select %p39_p0, %s3385_s20, %s41_s27  }
  0x2d   : > { %4881 = sst [smem:[#allocation19_spill]] %s3584_s26  ;;  %s121_s22 = sadd.s32 1, %s3361_s14 }
  0x2e   : > { %4882 = sst [smem:[#allocation20_spill]] %s3587_s3  ;;  %p131_p10 = scmp.ne.s32.totalorder %s3361_s14, %s3357_s13 }
  0x2f   : > { %p132_p11 = scmp.eq.s32.totalorder %s3541_s8, 3  ;;  %p137_p12 = scmp.ne.s32.totalorder %s3357_s13, %s3353_s12 }
  0x30   : > { %s3594_s9 = scalar_select %p119_p9, %s3361_s14, %s121_s22  }
  0x31   : > { %p3596_p2 = por %p132_p11, %p131_p10  ;;  %p138_p13 = scmp.eq.s32.totalorder %s2421_s28, 3 }
  0x32   : > { %4883 = sst [smem:[#allocation21_spill]] %s3594_s9  ;;  %s158_s11 = sand.u32 1, %s3385_s20  }
  0x33   : > { %s4884_s15 = scalar_select %p3596_p2, 1, 0 }
  0x34   : > { %s2424_s1 = sshll.u32 %s158_s11, 9  ;;  %p3603_p6 = por %p138_p13, %p137_p12 }
  0x35   : > { %4885 = sst [smem:[#allocation22_spill]] %s4884_s15  ;;  %s2885_s18 = sshll.u32 %s3401_s24, 9 }
  0x36   : > { %s4886_s27 = scalar_select %p3603_p6, 1, 0 }
  0x37   : > { %s162_s4 = scalar_lea.vmem [#allocation2], %s2424_s1  ;;  %s4888_s0 = sld [smem:[#allocation87_spill]] }
  0x38   : > { %4887 = sst [smem:[#allocation23_spill]] %s4886_s27  ;;  %s171_s3 = sshll.u32 %s162_s4, 4  ;;  %s172_s3 = int_to_ptr.vmem [resolvable:$true] %s171_s3 }
  0x39   : > { %p3030_p0 = pnand %p3043_p4, %p3560_p1  ;;  %s159_s28 = scalar_lea.sflag [#allocation3], %s158_s11 }
  0x3a   : > { %s3410_s20 = smov 128   ;;  %s3411_s12 = smov 8  }
  0x3b   : > { %s4889_s27 = sand.u32 1, %s3373_s17   ;;  %s208_s1 = smul.u32 3, %s3397_s23 }
  0x3c   : > { %s3016_s24 = smul.u32 3, %s4889_s27 }
  0x3d   : > { %s168_s9 = scalar_lea.hbm %s4888_s0, %s2885_s18  ;;  %s211_s26 = scalar_lea.hbm %s4789_s2, %s208_s1 }
  0x3e   : > { %s169_s14 = sshll.u32 %s168_s9, 4  ;;  %s207_s18 = scalar_lea.vmem [#allocation7], %s3016_s24  ;;  %s170_s14 = int_to_ptr.hbm [resolvable:$true] %s169_s14 }
  0x3f   : > { %3032 = dma.hbm_to_vmem [thread:$0]  (!%p3030_p0), %s170_s14, 8192, %s172_s3, %s159_s28, %s3410_s20, %s3410_s20, %s3411_s12  }
  0x40   : > { %s215_s22 = sshll.u32 %s207_s18, 4  ;;  %s213_s0 = sshll.u32 %s211_s26, 4  ;;  %s216_s22 = int_to_ptr.vmem [resolvable:$true] %s215_s22  ;;  %s214_s0 = int_to_ptr.hbm [resolvable:$true] %s213_s0 }
  0x41   : > { %3038 = dma.hbm_to_vmem [thread:$0]  (!%p3522_p5), %s214_s0, 48, %s216_s22, %s3529_s29  }
  0x42   : > { %224 = sbr.rel (%p3536_p8) target bundleno = 1018 (0x3fa), region = 32 }
  0x47   : > { %s226_s3 = sand.u32 1, %s3381_s19  }
  0x48   : > { %s2430_s12 = sshll.u32 %s226_s3, 9  ;;  %s227_s14 = scalar_lea.sflag [#allocation3], %s226_s3 }
  0x49   : > { %s3627_s20 = scalar_lea.vmem [#allocation2], %s2430_s12 }
  0x4a   : > { %3340 = dma.done.wait (%p3568_p3), %s227_s14, 8192  }
  0x4b   : > { %3342 = vsyncadd (%p3568_p3), %s227_s14, 4294959104  ;;  %s236_s0 = sand.u32 1, %s3541_s8   ;;  %s238_s24 = sand.u32 1, %s3369_s16  }
  0x4c   : > { %s3017_s29 = smul.u32 384, %s238_s24  ;;  %s237_s5 = scalar_lea.sflag [#allocation6], %s236_s0 }
  0x4e   : > { %s3637_s30 = scalar_lea.vmem [#allocation5], %s3017_s29 }
  0x4f   : > { %3344 = dma.done.wait (%p3577_p7), %s237_s5, 6192  }
  0x50   : > { %3346 = vsyncadd (%p3577_p7), %s237_s5, 4294961104  ;;  %v2773_v0 = vld [vmem:[%s3637_s30 + $0xa8] sm:$0xf]  ;;  %v2973_v1 = vld [vmem:[%s3637_s30 + $0xb0] sm:$0xf0]  ;;  %s3018_s8 = smul.u32 3, %s238_s24 }
  0x51   : > { %v2869_v2 = vld [vmem:[%s3637_s30 + $0x168] sm:$0xf]  ;;  %v2774_v3 = vor.u32 %v2973_v1, %v2773_v0  ;;  %v2997_v4 = vld [vmem:[%s3637_s30 + $0x170] sm:$0xf0]  ;;  %v2761_v5 = vld [vmem:[%s3637_s30 + $0x90] sm:$0xf] }
  0x52   : > { %v2970_v6 = vld [vmem:[%s3637_s30 + $0x98] sm:$0xf0]  ;;  %v2870_v7 = vor.u32 %v2997_v4, %v2869_v2  ;;  %v2857_v8 = vld [vmem:[%s3637_s30 + $0x150] sm:$0xf]  ;;  %v2749_v12 = vld [vmem:[%s3637_s30 + $0x78] sm:$0xf] }
  0x53   : > { %v2994_v9 = vld [vmem:[%s3637_s30 + $0x158] sm:$0xf0]  ;;  %1001 = vmatpush.bf16.msra.mxu0 %v2774_v3  ;;  %2999 = vmatpush.bf16.msra.mxu2 %v2774_v3  ;;  %v2762_v10 = vor.u32 %v2970_v6, %v2761_v5  ;;  %v2967_v13 = vld [vmem:[%s3637_s30 + $0x80] sm:$0xf0]  ;;  %v2845_v14 = vld [vmem:[%s3637_s30 + $0x138] sm:$0xf] }
  0x54   : > { %1170 = vmatpush.bf16.msra.mxu1 %v2870_v7  ;;  %3007 = vmatpush.bf16.msra.mxu3 %v2870_v7  ;;  %v2858_v11 = vor.u32 %v2994_v9, %v2857_v8  ;;  %v2991_v15 = vld [vmem:[%s3637_s30 + $0x140] sm:$0xf0]  ;;  %v2750_v16 = vor.u32 %v2967_v13, %v2749_v12  ;;  %v2737_v18 = vld [vmem:[%s3637_s30 + $0x60] sm:$0xf]  ;;  %v2964_v19 = vld [vmem:[%s3637_s30 + $0x68] sm:$0xf0] }
  0x55   : > { %v2846_v17 = vor.u32 %v2991_v15, %v2845_v14  ;;  %v2833_v20 = vld [vmem:[%s3637_s30 + $0x120] sm:$0xf]  ;;  %v2988_v21 = vld [vmem:[%s3637_s30 + $0x128] sm:$0xf0]  ;;  %v2738_v22 = vor.u32 %v2964_v19, %v2737_v18  ;;  %v2725_v24 = vld [vmem:[%s3637_s30 + $0x48] sm:$0xf] }
  0x56   : > { %v2834_v23 = vor.u32 %v2988_v21, %v2833_v20  ;;  %v2961_v25 = vld [vmem:[%s3637_s30 + $0x50] sm:$0xf0]  ;;  %v2821_v26 = vld [vmem:[%s3637_s30 + $0x108] sm:$0xf]  ;;  %v2713_v30 = vld [vmem:[%s3637_s30 + $0x30] sm:$0xf] }
  0x57   : > { %1002 = vmatpush.bf16.msra.mxu0 %v2762_v10  ;;  %3000 = vmatpush.bf16.msra.mxu2 %v2762_v10  ;;  %v2985_v27 = vld [vmem:[%s3637_s30 + $0x110] sm:$0xf0]  ;;  %v2726_v28 = vor.u32 %v2961_v25, %v2725_v24  ;;  %v2958_v31 = vld [vmem:[%s3637_s30 + $0x38] sm:$0xf0]  ;;  %v2809_v32 = vld [vmem:[%s3637_s30 + $0xf0] sm:$0xf] }
  0x58   : > { %1171 = vmatpush.bf16.msra.mxu1 %v2858_v11  ;;  %3008 = vmatpush.bf16.msra.mxu3 %v2858_v11  ;;  %v2822_v29 = vor.u32 %v2985_v27, %v2821_v26  ;;  %v2982_v33 = vld [vmem:[%s3637_s30 + $0xf8] sm:$0xf0]  ;;  %v2714_v34 = vor.u32 %v2958_v31, %v2713_v30  ;;  %v2701_v36 = vld [vmem:[%s3637_s30 + $0x18] sm:$0xf]  ;;  %v2955_v37 = vld [vmem:[%s3637_s30 + $0x20] sm:$0xf0] }
  0x59   : > { %v2810_v35 = vor.u32 %v2982_v33, %v2809_v32  ;;  %v2797_v38 = vld [vmem:[%s3637_s30 + $0xd8] sm:$0xf]  ;;  %v2979_v39 = vld [vmem:[%s3637_s30 + $0xe0] sm:$0xf0]  ;;  %v2702_v40 = vor.u32 %v2955_v37, %v2701_v36  ;;  %v2689_v41 = vld [vmem:[%s3637_s30] sm:$0xf] }
  0x5a   : > { %v2798_v42 = vor.u32 %v2979_v39, %v2797_v38  ;;  %v2952_v43 = vld [vmem:[%s3637_s30 + $0x8] sm:$0xf0]  ;;  %v2785_v44 = vld [vmem:[%s3637_s30 + $0xc0] sm:$0xf]  ;;  %v2888_v47 = vld [vmem:[%s3627_s20 + $0x4] sm:$0xf0] }
  0x5b   : > { %1003 = vmatpush.bf16.msra.mxu0 %v2750_v16  ;;  %3001 = vmatpush.bf16.msra.mxu2 %v2750_v16  ;;  %v2976_v45 = vld [vmem:[%s3637_s30 + $0xc8] sm:$0xf0]  ;;  %v2433_v46 = vld [vmem:[%s3627_s20] sm:$0xf]  ;;  %v2775_v50 = vld [vmem:[%s3637_s30 + $0xb4] sm:$0xf0]  ;;  %v2690_v53 = vor.u32 %v2952_v43, %v2689_v41 }
  0x5c   : > { %1172 = vmatpush.bf16.msra.mxu1 %v2846_v17  ;;  %3009 = vmatpush.bf16.msra.mxu3 %v2846_v17  ;;  %v2561_v48 = vld [vmem:[%s3627_s20 + $0x100] sm:$0xf]  ;;  %v2972_v49 = vld [vmem:[%s3637_s30 + $0xac] sm:$0xf]  ;;  %v2871_v52 = vld [vmem:[%s3637_s30 + $0x174] sm:$0xf0]  ;;  %v2786_v57 = vor.u32 %v2976_v45, %v2785_v44  ;;  %v3691_v2 = vor.u32 %v2888_v47, %v2433_v46 }
  0x5d   : > { %v2996_v51 = vld [vmem:[%s3637_s30 + $0x16c] sm:$0xf]  ;;  %v2920_v54 = vld [vmem:[%s3627_s20 + $0x104] sm:$0xf0]  ;;  %v2887_v55 = vld [vmem:[%s3627_s20 + $0x4] sm:$0xf]  ;;  %v2778_v61 = vor.u32 %v2972_v49, %v2775_v50 }
  0x5e   : > { %v2435_v56 = vld [vmem:[%s3627_s20 + $0x8] sm:$0xf0]  ;;  %v2919_v58 = vld [vmem:[%s3627_s20 + $0x104] sm:$0xf]  ;;  %v2781_v60 = vld [vmem:[%s3637_s30 + $0xb0] sm:$0xf]  ;;  %v2874_v62 = vor.u32 %v2996_v51, %v2871_v52  ;;  %v3693_v3 = vor.u32 %v2920_v54, %v2561_v48 }
  0x5f   : > { %1004 = vmatpush.bf16.msra.mxu0 %v2738_v22  ;;  %3002 = vmatpush.bf16.msra.mxu2 %v2738_v22  ;;  %v2563_v59 = vld [vmem:[%s3627_s20 + $0x108] sm:$0xf0]  ;;  %v2974_v63 = vld [vmem:[%s3637_s30 + $0xb8] sm:$0xf0]  ;;  %v2877_v0 = vld [vmem:[%s3637_s30 + $0x170] sm:$0xf]  ;;  %v3695_v4 = vor.u32 %v2887_v55, %v2435_v56 }
  0x60   : > { %1173 = vmatpush.bf16.msra.mxu1 %v2834_v23  ;;  %3010 = vmatpush.bf16.msra.mxu3 %v2834_v23  ;;  %v2998_v1 = vld [vmem:[%s3637_s30 + $0x178] sm:$0xf0]  ;;  %4890 = vst [vmem:[#allocation24_spill] sm:$0xff] %v3693_v3  ;;  %v3697_v5 = vor.u32 %v2919_v58, %v2563_v59  ;;  %v2782_v6 = vor.u32 %v2974_v63, %v2781_v60  ;;  %v2969_v8 = vld [vmem:[%s3637_s30 + $0x94] sm:$0xf]  ;;  %s250_s9 = scalar_lea.vmem [#allocation7], %s3018_s8 }
  0x61   : > { %v2878_v7 = vor.u32 %v2998_v1, %v2877_v0  ;;  %v2763_v9 = vld [vmem:[%s3637_s30 + $0x9c] sm:$0xf0]  ;;  %v2993_v10 = vld [vmem:[%s3637_s30 + $0x154] sm:$0xf]  ;;  %v2769_v13 = vld [vmem:[%s3637_s30 + $0x98] sm:$0xf] }
  0x62   : > { %4891 = vst [vmem:[#allocation25_spill] sm:$0xff] %v3697_v5  ;;  %v2766_v11 = vor.u32 %v2969_v8, %v2763_v9  ;;  %v2859_v12 = vld [vmem:[%s3637_s30 + $0x15c] sm:$0xf0]  ;;  %v2971_v14 = vld [vmem:[%s3637_s30 + $0xa0] sm:$0xf0]  ;;  %s281_s10 = sand.u32 1, %s3357_s13  }
  0x63   : > { %1005 = vmatpush.bf16.msra.mxu0 %v2726_v28  ;;  %3003 = vmatpush.bf16.msra.mxu2 %v2726_v28  ;;  %v2862_v15 = vor.u32 %v2993_v10, %v2859_v12  ;;  %v2770_v16 = vor.u32 %v2971_v14, %v2769_v13  ;;  %v2865_v17 = vld [vmem:[%s3637_s30 + $0x158] sm:$0xf]  ;;  %v2995_v18 = vld [vmem:[%s3637_s30 + $0x160] sm:$0xf0]  ;;  %v2441_v20 = vld [vmem:[%s3627_s20 + $0x10] sm:$0xf] }
  0x64   : > { %1174 = vmatpush.bf16.msra.mxu1 %v2822_v29  ;;  %3011 = vmatpush.bf16.msra.mxu3 %v2822_v29  ;;  %v2866_v19 = vor.u32 %v2995_v18, %v2865_v17  ;;  %v2890_v21 = vld [vmem:[%s3627_s20 + $0x14] sm:$0xf0]  ;;  %v2569_v22 = vld [vmem:[%s3627_s20 + $0x110] sm:$0xf]  ;;  %v2889_v24 = vld [vmem:[%s3627_s20 + $0x14] sm:$0xf] }
  0x65   : > { %v2922_v23 = vld [vmem:[%s3627_s20 + $0x114] sm:$0xf0]  ;;  %v2443_v25 = vld [vmem:[%s3627_s20 + $0x18] sm:$0xf0]  ;;  %v2921_v26 = vld [vmem:[%s3627_s20 + $0x114] sm:$0xf]  ;;  %v3719_v28 = vor.u32 %v2890_v21, %v2441_v20 }
  0x66   : > { %v2571_v27 = vld [vmem:[%s3627_s20 + $0x118] sm:$0xf0]  ;;  %v3721_v29 = vor.u32 %v2922_v23, %v2569_v22  ;;  %v3723_v30 = vor.u32 %v2889_v24, %v2443_v25  ;;  %v2449_v32 = vld [vmem:[%s3627_s20 + $0x20] sm:$0xf]  ;;  %v2892_v33 = vld [vmem:[%s3627_s20 + $0x24] sm:$0xf0] }
  0x67   : > { %1006 = vmatpush.bf16.msra.mxu0 %v2714_v34  ;;  %3004 = vmatpush.bf16.msra.mxu2 %v2714_v34  ;;  %v3725_v31 = vor.u32 %v2921_v26, %v2571_v27  ;;  %v2577_v34 = vld [vmem:[%s3627_s20 + $0x120] sm:$0xf]  ;;  %v2891_v36 = vld [vmem:[%s3627_s20 + $0x24] sm:$0xf]  ;;  %v2451_v37 = vld [vmem:[%s3627_s20 + $0x28] sm:$0xf0] }
  0x68   : > { %1175 = vmatpush.bf16.msra.mxu1 %v2810_v35  ;;  %3012 = vmatpush.bf16.msra.mxu3 %v2810_v35  ;;  %4892 = vst [vmem:[#allocation26_spill] sm:$0xff] %v3721_v29  ;;  %v2924_v35 = vld [vmem:[%s3627_s20 + $0x124] sm:$0xf0]  ;;  %v2923_v38 = vld [vmem:[%s3627_s20 + $0x124] sm:$0xf]  ;;  %s3019_s6 = smul.u32 768, %s281_s10 }
  0x69   : > { %4893 = vst [vmem:[#allocation27_spill] sm:$0xff] %v3725_v31  ;;  %v2579_v39 = vld [vmem:[%s3627_s20 + $0x128] sm:$0xf0]  ;;  %v3741_v41 = vor.u32 %v2924_v35, %v2577_v34  ;;  %v2966_v44 = vld [vmem:[%s3637_s30 + $0x7c] sm:$0xf]  ;;  %s5013_s15 = sld [smem:[#allocation15_spill]] }
  0x6a   : > { %v3745_v43 = vor.u32 %v2923_v38, %v2579_v39  ;;  %v2751_v45 = vld [vmem:[%s3637_s30 + $0x84] sm:$0xf0]  ;;  %v2990_v46 = vld [vmem:[%s3637_s30 + $0x13c] sm:$0xf]  ;;  %v2757_v49 = vld [vmem:[%s3637_s30 + $0x80] sm:$0xf] }
  0x6b   : > { %1007 = vmatpush.bf16.msra.mxu0 %v2702_v40  ;;  %3005 = vmatpush.bf16.msra.mxu2 %v2702_v40  ;;  %v3739_v40 = vor.u32 %v2892_v33, %v2449_v32  ;;  %4894 = vst [vmem:[#allocation28_spill] sm:$0xff] %v3741_v41  ;;  %v2754_v47 = vor.u32 %v2966_v44, %v2751_v45  ;;  %v2847_v48 = vld [vmem:[%s3637_s30 + $0x144] sm:$0xf0]  ;;  %v2968_v50 = vld [vmem:[%s3637_s30 + $0x88] sm:$0xf0]  ;;  %s4304_s7 = scalar_lea.vmem [#allocation8], %s3019_s6 }
  0x6c   : > { %1176 = vmatpush.bf16.msra.mxu1 %v2798_v42  ;;  %3013 = vmatpush.bf16.msra.mxu3 %v2798_v42  ;;  %v3743_v42 = vor.u32 %v2891_v36, %v2451_v37  ;;  %4895 = vst [vmem:[#allocation29_spill] sm:$0xff] %v3745_v43  ;;  %v2850_v51 = vor.u32 %v2990_v46, %v2847_v48  ;;  %v2992_v54 = vld [vmem:[%s3637_s30 + $0x148] sm:$0xf0]  ;;  %v2457_v56 = vld [vmem:[%s3627_s20 + $0x30] sm:$0xf]  ;;  %s2280_s11 = smul.u32 3, %s3389_s21 }
  0x6d   : > { %v2758_v52 = vor.u32 %v2968_v50, %v2757_v49  ;;  %v2585_v58 = vld [vmem:[%s3627_s20 + $0x130] sm:$0xf]  ;;  %v2926_v59 = vld [vmem:[%s3627_s20 + $0x134] sm:$0xf0]  ;;  %v2893_v60 = vld [vmem:[%s3627_s20 + $0x34] sm:$0xf] }
  0x6e   : > { %v2587_v63 = vld [vmem:[%s3627_s20 + $0x138] sm:$0xf0]  ;;  %v3769_v1 = vor.u32 %v2926_v59, %v2585_v58  ;;  %v2465_v8 = vld [vmem:[%s3627_s20 + $0x40] sm:$0xf]  ;;  %v2896_v9 = vld [vmem:[%s3627_s20 + $0x44] sm:$0xf0] }
  0x6f   : > { %1008 = vmatpush.bf16.msra.mxu0 %v2690_v53  ;;  %3006 = vmatpush.bf16.msra.mxu2 %v2690_v53  ;;  %v2853_v53 = vld [vmem:[%s3637_s30 + $0x140] sm:$0xf]  ;;  %v2895_v12 = vld [vmem:[%s3627_s20 + $0x44] sm:$0xf]  ;;  %v2467_v13 = vld [vmem:[%s3627_s20 + $0x48] sm:$0xf0] }
  0x70   : > { %1177 = vmatpush.bf16.msra.mxu1 %v2786_v57  ;;  %3014 = vmatpush.bf16.msra.mxu3 %v2786_v57  ;;  %v2854_v55 = vor.u32 %v2992_v54, %v2853_v53  ;;  %v2894_v57 = vld [vmem:[%s3627_s20 + $0x34] sm:$0xf0]  ;;  %4896 = vst [vmem:[#allocation30_spill] sm:$0xff] %v3769_v1  ;;  %v2593_v10 = vld [vmem:[%s3627_s20 + $0x140] sm:$0xf]  ;;  %v3791_v18 = vor.u32 %v2895_v12, %v2467_v13  ;;  %s3020_s27 = smul.u32 384, %s5013_s15 }
  0x71   : > { %v3767_v0 = vor.u32 %v2894_v57, %v2457_v56  ;;  %v2927_v14 = vld [vmem:[%s3627_s20 + $0x144] sm:$0xf]  ;;  %v2739_v21 = vld [vmem:[%s3637_s30 + $0x6c] sm:$0xf0]  ;;  %v2745_v25 = vld [vmem:[%s3637_s30 + $0x68] sm:$0xf] }
  0x72   : > { %1009 = vmatmul.bf16.vlgmr.msra.gmra.mxu0 %v3691_v2  ;;  %1089 = vmatmul.bf16.vlgmr.msra.gmra.mxu2 %v3693_v3  ;;  %v2963_v20 = vld [vmem:[%s3637_s30 + $0x64] sm:$0xf]  ;;  %v2835_v24 = vld [vmem:[%s3637_s30 + $0x12c] sm:$0xf0]  ;;  %v2965_v26 = vld [vmem:[%s3637_s30 + $0x70] sm:$0xf0]  ;;  %s2284_s28 = sadd.s32 %s3020_s27, %s2280_s11 }
  0x73   : > { %1339 = vmatpush.bf16.msrb.mxu2 %v2778_v61  ;;  %1178 = vmatmul.bf16.vlgmr.msra.gmra.mxu1 %v3695_v4  ;;  %v2459_v61 = vld [vmem:[%s3627_s20 + $0x38] sm:$0xf0]  ;;  %v2987_v22 = vld [vmem:[%s3637_s30 + $0x124] sm:$0xf]  ;;  %v2742_v23 = vor.u32 %v2963_v20, %v2739_v21  ;;  %v2746_v32 = vor.u32 %v2965_v26, %v2745_v25  ;;  %v2841_v33 = vld [vmem:[%s3637_s30 + $0x128] sm:$0xf] }
  0x74   : > { %1508 = vmatpush.bf16.msrb.mxu3 %v2874_v62  ;;  %1677 = vmatpush.bf16.msrb.mxu0 %v2782_v6  ;;  %v2925_v62 = vld [vmem:[%s3627_s20 + $0x134] sm:$0xf]  ;;  %v3771_v6 = vor.u32 %v2893_v60, %v2459_v61  ;;  %v2838_v27 = vor.u32 %v2987_v22, %v2835_v24  ;;  %v2473_v36 = vld [vmem:[%s3627_s20 + $0x50] sm:$0xf]  ;;  %v2898_v37 = vld [vmem:[%s3627_s20 + $0x54] sm:$0xf0] }
  0x75   : > { %1258 = vmatmul.bf16.vlgmr.msra.gmra.mxu3 %v3697_v5  ;;  %1846 = vmatpush.bf16.msrb.mxu1 %v2878_v7  ;;  %v3773_v7 = vor.u32 %v2925_v62, %v2587_v63  ;;  %v2989_v34 = vld [vmem:[%s3637_s30 + $0x130] sm:$0xf0]  ;;  %v2601_v38 = vld [vmem:[%s3627_s20 + $0x150] sm:$0xf]  ;;  %v2930_v39 = vld [vmem:[%s3627_s20 + $0x154] sm:$0xf0]  ;;  %v3815_v48 = vor.u32 %v2898_v37, %v2473_v36 }
  0x76   : > { %v2842_v35 = vor.u32 %v2989_v34, %v2841_v33  ;;  %v2897_v44 = vld [vmem:[%s3627_s20 + $0x54] sm:$0xf]  ;;  %v2475_v45 = vld [vmem:[%s3627_s20 + $0x58] sm:$0xf0]  ;;  %v3817_v49 = vor.u32 %v2930_v39, %v2601_v38  ;;  %v2900_v53 = vld [vmem:[%s3627_s20 + $0x64] sm:$0xf0] }
  0x77   : > { %1340 = vmatpush.bf16.msrb.mxu2 %v2766_v11  ;;  %4897 = vst [vmem:[#allocation31_spill] sm:$0xff] %v3773_v7  ;;  %v2928_v11 = vld [vmem:[%s3627_s20 + $0x144] sm:$0xf0]  ;;  %v2929_v46 = vld [vmem:[%s3627_s20 + $0x154] sm:$0xf]  ;;  %v3819_v50 = vor.u32 %v2897_v44, %v2475_v45  ;;  %s2881_s21 = sshll.u32 %s2284_s28, 2 }
  0x78   : > { %1509 = vmatpush.bf16.msrb.mxu3 %v2862_v15  ;;  %1678 = vmatpush.bf16.msrb.mxu0 %v2770_v16  ;;  %v2595_v15 = vld [vmem:[%s3627_s20 + $0x148] sm:$0xf0]  ;;  %v3787_v16 = vor.u32 %v2896_v9, %v2465_v8  ;;  %v3789_v17 = vor.u32 %v2928_v11, %v2593_v10  ;;  %4900 = vst [vmem:[#allocation34_spill] sm:$0xff] %v3817_v49  ;;  %v2609_v54 = vld [vmem:[%s3627_s20 + $0x160] sm:$0xf]  ;;  %s5016_s26 = sld [smem:[#allocation89_spill]] }
  0x79   : > { %1847 = vmatpush.bf16.msrb.mxu1 %v2866_v19  ;;  %v3793_v19 = vor.u32 %v2927_v14, %v2595_v15  ;;  %v2899_v56 = vld [vmem:[%s3627_s20 + $0x64] sm:$0xf]  ;;  %v2483_v57 = vld [vmem:[%s3627_s20 + $0x68] sm:$0xf0]  ;;  %v2727_v9 = vld [vmem:[%s3637_s30 + $0x54] sm:$0xf0] }
  0x7a   : > { %4898 = vst [vmem:[#allocation32_spill] sm:$0xff] %v3789_v17  ;;  %v2931_v58 = vld [vmem:[%s3627_s20 + $0x164] sm:$0xf]  ;;  %v2611_v59 = vld [vmem:[%s3627_s20 + $0x168] sm:$0xf0]  ;;  %v3839_v62 = vor.u32 %v2899_v56, %v2483_v57  ;;  %s2287_s3 = sshll.u32 %s4304_s7, 4  ;;  %s2288_s3 = int_to_ptr.vmem [resolvable:$true] %s2287_s3 }
  0x7b   : > { %1341 = vmatpush.bf16.msrb.mxu2 %v2754_v47  ;;  %4899 = vst [vmem:[#allocation33_spill] sm:$0xff] %v3793_v19  ;;  %v2603_v47 = vld [vmem:[%s3627_s20 + $0x158] sm:$0xf0]  ;;  %v3841_v63 = vor.u32 %v2931_v58, %v2611_v59  ;;  %v2960_v8 = vld [vmem:[%s3637_s30 + $0x4c] sm:$0xf]  ;;  %s2272_s14 = scalar_lea.sflag [#allocation4], %s281_s10 }
  0x7c   : > { %1510 = vmatpush.bf16.msrb.mxu3 %v2850_v51  ;;  %1679 = vmatpush.bf16.msrb.mxu0 %v2758_v52  ;;  %v3821_v51 = vor.u32 %v2929_v46, %v2603_v47  ;;  %v2481_v52 = vld [vmem:[%s3627_s20 + $0x60] sm:$0xf]  ;;  %v2984_v10 = vld [vmem:[%s3637_s30 + $0x10c] sm:$0xf]  ;;  %v2730_v11 = vor.u32 %v2960_v8, %v2727_v9  ;;  %v2823_v12 = vld [vmem:[%s3637_s30 + $0x114] sm:$0xf0] }
  0x7d   : > { %1848 = vmatpush.bf16.msrb.mxu1 %v2854_v55  ;;  %v2932_v55 = vld [vmem:[%s3627_s20 + $0x164] sm:$0xf0]  ;;  %v3835_v60 = vor.u32 %v2900_v53, %v2481_v52  ;;  %4903 = vst [vmem:[#allocation37_spill] sm:$0xff] %v3841_v63  ;;  %v2826_v13 = vor.u32 %v2984_v10, %v2823_v12  ;;  %v2489_v14 = vld [vmem:[%s3627_s20 + $0x70] sm:$0xf] }
  0x7e   : > { %4901 = vst [vmem:[#allocation35_spill] sm:$0xff] %v3821_v51  ;;  %v3837_v61 = vor.u32 %v2932_v55, %v2609_v54  ;;  %v2902_v15 = vld [vmem:[%s3627_s20 + $0x74] sm:$0xf0]  ;;  %v2617_v20 = vld [vmem:[%s3627_s20 + $0x170] sm:$0xf]  ;;  %s2286_s18 = scalar_lea.hbm %s5016_s26, %s2881_s21  ;;  %s3275_s5 = scalar_lea.hbm %s5016_s26, 3072 }
  0x7f   : > { %1342 = vmatpush.bf16.msrb.mxu2 %v2742_v23  ;;  %v2733_v21 = vld [vmem:[%s3637_s30 + $0x50] sm:$0xf]  ;;  %v2962_v22 = vld [vmem:[%s3637_s30 + $0x58] sm:$0xf0]  ;;  %v2934_v24 = vld [vmem:[%s3627_s20 + $0x174] sm:$0xf0]  ;;  %v3863_v36 = vor.u32 %v2902_v15, %v2489_v14 }
  0x80   : > { %1511 = vmatpush.bf16.msrb.mxu3 %v2838_v27  ;;  %1680 = vmatpush.bf16.msrb.mxu0 %v2746_v32  ;;  %4902 = vst [vmem:[#allocation36_spill] sm:$0xff] %v3837_v61  ;;  %v2829_v23 = vld [vmem:[%s3637_s30 + $0x110] sm:$0xf]  ;;  %v2901_v25 = vld [vmem:[%s3627_s20 + $0x74] sm:$0xf]  ;;  %v2734_v26 = vor.u32 %v2962_v22, %v2733_v21  ;;  %v3865_v37 = vor.u32 %v2934_v24, %v2617_v20  ;;  %s2289_s12 = sshll.u32 %s2286_s18, 4  ;;  %s2290_s12 = int_to_ptr.hbm [resolvable:$true] %s2289_s12 }
  0x81   : > { %1849 = vmatpush.bf16.msrb.mxu1 %v2842_v35  ;;  %v2986_v27 = vld [vmem:[%s3637_s30 + $0x118] sm:$0xf0]  ;;  %v2933_v33 = vld [vmem:[%s3627_s20 + $0x174] sm:$0xf]  ;;  %v3877_v44 = vld [vmem:[%s250_s9] sm:$0x7] }
  0x82   : > { %1014 = vmatmul.bf16.gmra.mxu0 %v3719_v28  ;;  %1094 = vmatmul.bf16.gmra.mxu2 %v3721_v29  ;;  %v2491_v32 = vld [vmem:[%s3627_s20 + $0x78] sm:$0xf0]  ;;  %v2830_v35 = vor.u32 %v2986_v27, %v2829_v23  ;;  %4904 = vst [vmem:[#allocation38_spill] sm:$0xff] %v3865_v37  ;;  %v3880_v45 = vperm.slane %v3877_v44, 0  ;;  %v2497_v46 = vld [vmem:[%s3627_s20 + $0x80] sm:$0xf] }
  0x83   : > { %1183 = vmatmul.bf16.gmra.mxu1 %v3723_v30  ;;  %1343 = vmatpush.bf16.msrb.mxu2 %v2730_v11  ;;  %v2619_v34 = vld [vmem:[%s3627_s20 + $0x178] sm:$0xf0]  ;;  %v3867_v38 = vor.u32 %v2901_v25, %v2491_v32  ;;  %v2904_v47 = vld [vmem:[%s3627_s20 + $0x84] sm:$0xf0]  ;;  %v2625_v52 = vld [vmem:[%s3627_s20 + $0x180] sm:$0xf] }
  0x84   : > { %1512 = vmatpush.bf16.msrb.mxu3 %v2826_v13  ;;  %1681 = vmatpush.bf16.msrb.mxu0 %v2734_v26  ;;  %v3869_v39 = vor.u32 %v2933_v33, %v2619_v34  ;;  %v2936_v53 = vld [vmem:[%s3627_s20 + $0x184] sm:$0xf0]  ;;  %v2903_v54 = vld [vmem:[%s3627_s20 + $0x84] sm:$0xf]  ;;  %v2499_v55 = vld [vmem:[%s3627_s20 + $0x88] sm:$0xf0]  ;;  %v3890_v58 = vor.u32 %v2904_v47, %v2497_v46 }
  0x85   : > { %1263 = vmatmul.bf16.gmra.mxu3 %v3725_v31  ;;  %1850 = vmatpush.bf16.msrb.mxu1 %v2830_v35  ;;  %v2935_v56 = vld [vmem:[%s3627_s20 + $0x184] sm:$0xf]  ;;  %v2627_v57 = vld [vmem:[%s3627_s20 + $0x188] sm:$0xf0]  ;;  %v3892_v59 = vor.u32 %v2936_v53, %v2625_v52  ;;  %v3894_v9 = vor.u32 %v2903_v54, %v2499_v55  ;;  %v2957_v14 = vld [vmem:[%s3637_s30 + $0x34] sm:$0xf] }
  0x86   : > { %4905 = vst [vmem:[#allocation39_spill] sm:$0xff] %v3869_v39  ;;  %v3896_v10 = vor.u32 %v2935_v56, %v2627_v57  ;;  %v2715_v15 = vld [vmem:[%s3637_s30 + $0x3c] sm:$0xf0]  ;;  %v2981_v20 = vld [vmem:[%s3637_s30 + $0xf4] sm:$0xf] }
  0x87   : > { %4906 = vst [vmem:[#allocation40_spill] sm:$0xff] %v3892_v59  ;;  %v2718_v21 = vor.u32 %v2957_v14, %v2715_v15  ;;  %v2811_v22 = vld [vmem:[%s3637_s30 + $0xfc] sm:$0xf0]  ;;  %v2505_v35 = vld [vmem:[%s3627_s20 + $0x90] sm:$0xf] }
  0x88   : > { %4907 = vst [vmem:[#allocation41_spill] sm:$0xff] %v3896_v10  ;;  %v2814_v24 = vor.u32 %v2981_v20, %v2811_v22  ;;  %v2906_v46 = vld [vmem:[%s3627_s20 + $0x94] sm:$0xf0]  ;;  %v2633_v47 = vld [vmem:[%s3627_s20 + $0x190] sm:$0xf] }
  0x89   : > { %1344 = vmatpush.bf16.msrb.mxu2 %v2718_v21  ;;  %v2721_v53 = vld [vmem:[%s3637_s30 + $0x38] sm:$0xf]  ;;  %v2959_v54 = vld [vmem:[%s3637_s30 + $0x40] sm:$0xf0]  ;;  %v2905_v57 = vld [vmem:[%s3627_s20 + $0x94] sm:$0xf] }
  0x8a   : > { %1513 = vmatpush.bf16.msrb.mxu3 %v2814_v24  ;;  %v2817_v55 = vld [vmem:[%s3637_s30 + $0xf8] sm:$0xf]  ;;  %v2937_v14 = vld [vmem:[%s3627_s20 + $0x194] sm:$0xf]  ;;  %v2635_v15 = vld [vmem:[%s3627_s20 + $0x198] sm:$0xf0]  ;;  %v3928_v24 = vor.u32 %v2906_v46, %v2505_v35 }
  0x8b   : > { %v2938_v56 = vld [vmem:[%s3627_s20 + $0x194] sm:$0xf0] }
  0x92   : > { %1019 = vmatmul.bf16.gmra.mxu0 %v3739_v40  ;;  %1099 = vmatmul.bf16.gmra.mxu2 %v3741_v41 }
  0x93   : > { %1188 = vmatmul.bf16.gmra.mxu1 %v3743_v42 }
  0x95   : > { %1268 = vmatmul.bf16.gmra.mxu3 %v3745_v43 }
  0xa2   : > { %1024 = vmatmul.bf16.gmra.mxu0 %v3767_v0  ;;  %1104 = vmatmul.bf16.gmra.mxu2 %v3769_v1 }
  0xa3   : > { %1193 = vmatmul.bf16.gmra.mxu1 %v3771_v6 }
  0xa5   : > { %1273 = vmatmul.bf16.gmra.mxu3 %v3773_v7 }
  0xb2   : > { %1029 = vmatmul.bf16.gmra.mxu0 %v3787_v16  ;;  %1109 = vmatmul.bf16.gmra.mxu2 %v3789_v17  ;;  %v2945_v17 = vld [vmem:[%s3627_s20 + $0x1d4] sm:$0xf] }
  0xb3   : > { %1198 = vmatmul.bf16.gmra.mxu1 %v3791_v18 }
  0xb5   : > { %1278 = vmatmul.bf16.gmra.mxu3 %v3793_v19  ;;  %v2977_v19 = vld [vmem:[%s3637_s30 + $0xd0] sm:$0xf0] }
  0xc2   : > { %1034 = vmatmul.bf16.gmra.mxu0 %v3815_v48  ;;  %1114 = vmatmul.bf16.gmra.mxu2 %v3817_v49 }
  0xc3   : > { %1203 = vmatmul.bf16.gmra.mxu1 %v3819_v50 }
  0xc5   : > { %1283 = vmatmul.bf16.gmra.mxu3 %v3821_v51 }
  0xd2   : > { %1039 = vmatmul.bf16.gmra.mxu0 %v3835_v60  ;;  %1119 = vmatmul.bf16.gmra.mxu2 %v3837_v61 }
  0xd3   : > { %1208 = vmatmul.bf16.gmra.mxu1 %v3839_v62 }
  0xd5   : > { %1288 = vmatmul.bf16.gmra.mxu3 %v3841_v63 }
  0xe2   : > { %1044 = vmatmul.bf16.gmra.mxu0 %v3863_v36  ;;  %1124 = vmatmul.bf16.gmra.mxu2 %v3865_v37 }
  0xe3   : > { %1213 = vmatmul.bf16.gmra.mxu1 %v3867_v38 }
  0xe5   : > { %1293 = vmatmul.bf16.gmra.mxu3 %v3869_v39 }
  0xef   : > { %v1010_v8 = vpop.f32.mrf.mxu0 }
  0xf0   : > { %v1011_v11 = vadd.f32 %v1010_v8, %v3880_v45  ;;  %v1179_v12 = vpop.f32.mrf.mxu1  ;;  %v2722_v8 = vor.u32 %v2959_v54, %v2721_v53 }
  0xf2   : > { %v3899_v13 = vadd.f32 %v1179_v12, %v1011_v11  ;;  %1049 = vmatmul.bf16.gmra.mxu0 %v3890_v58  ;;  %1129 = vmatmul.bf16.gmra.mxu2 %v3892_v59  ;;  %v2983_v11 = vld [vmem:[%s3637_s30 + $0x100] sm:$0xf0]  ;;  %v2507_v12 = vld [vmem:[%s3627_s20 + $0x98] sm:$0xf0]  ;;  %v2941_v59 = vld [vmem:[%s3627_s20 + $0x1b4] sm:$0xf] }
  0xf3   : > { %1218 = vmatmul.bf16.gmra.mxu1 %v3894_v9  ;;  %v2818_v20 = vor.u32 %v2983_v11, %v2817_v55  ;;  %1682 = vmatpush.bf16.msrb.mxu0 %v2722_v8 }
  0xf5   : > { %1298 = vmatmul.bf16.gmra.mxu3 %v3896_v10  ;;  %v1090_v23 = vpop.f32.mrf.mxu2  ;;  %1851 = vmatpush.bf16.msrb.mxu1 %v2818_v20  ;;  %v2641_v20 = vld [vmem:[%s3627_s20 + $0x1a0] sm:$0xf]  ;;  %v2980_v10 = vld [vmem:[%s3637_s30 + $0xe8] sm:$0xf0] }
  0xf6   : > { %v1091_v25 = vadd.f32 %v1090_v23, %v3880_v45 }
  0xf7   : > { %v1012_v27 = vpop.f32.mrf.mxu0 }
  0xf8   : > { %v1259_v26 = vpop.f32.mrf.mxu3  ;;  %v1013_v33 = vadd.f32 %v1012_v27, %v3880_v45  ;;  %v1181_v34 = vpop.f32.mrf.mxu1  ;;  %v3932_v27 = vor.u32 %v2905_v57, %v2507_v12 }
  0xf9   : > { %v3910_v32 = vadd.f32 %v1259_v26, %v1091_v25  ;;  %v3930_v25 = vor.u32 %v2938_v56, %v2633_v47 }
  0xfa   : > { %v3916_v52 = vadd.f32 %v1181_v34, %v1013_v33  ;;  %v3934_v33 = vor.u32 %v2937_v14, %v2635_v15  ;;  %v2513_v14 = vld [vmem:[%s3627_s20 + $0xa0] sm:$0xf]  ;;  %v2908_v15 = vld [vmem:[%s3627_s20 + $0xa4] sm:$0xf0] }
  0xfb   : > { %4908 = vst [vmem:[#allocation42_spill] sm:$0xff] %v3910_v32 }
  0xfc   : > { %4909 = vst [vmem:[#allocation43_spill] sm:$0xff] %v3930_v25 }
  0xfd   : > { %v1092_v21 = vpop.f32.mrf.mxu2  ;;  %4910 = vst [vmem:[#allocation44_spill] sm:$0xff] %v3934_v33 }
  0xfe   : > { %v1093_v22 = vadd.f32 %v1092_v21, %v3880_v45  ;;  %v2940_v21 = vld [vmem:[%s3627_s20 + $0x1a4] sm:$0xf0] }
  0xff   : > { %v1015_v26 = vpop.f32.mrf.mxu0 }
 0x100   : > { %v1261_v23 = vpop.f32.mrf.mxu3  ;;  %v1016_v53 = vadd.f32 %v1015_v26, %v3880_v45  ;;  %v1184_v54 = vpop.f32.mrf.mxu1  ;;  %v2939_v26 = vld [vmem:[%s3627_s20 + $0x1a4] sm:$0xf] }
 0x101   : > { %v3936_v34 = vadd.f32 %v1261_v23, %v1093_v22  ;;  %v2907_v22 = vld [vmem:[%s3627_s20 + $0xa4] sm:$0xf]  ;;  %v2515_v23 = vld [vmem:[%s3627_s20 + $0xa8] sm:$0xf0] }
 0x102   : > { %v3939_v55 = vadd.f32 %v1184_v54, %v1016_v53  ;;  %1054 = vmatmul.bf16.gmra.mxu0 %v3928_v24  ;;  %1134 = vmatmul.bf16.gmra.mxu2 %v3930_v25  ;;  %v2643_v53 = vld [vmem:[%s3627_s20 + $0x1a8] sm:$0xf0] }
 0x103   : > { %4911 = vst [vmem:[#allocation45_spill] sm:$0xff] %v3936_v34  ;;  %1223 = vmatmul.bf16.gmra.mxu1 %v3932_v27 }
 0x105   : > { %1303 = vmatmul.bf16.gmra.mxu3 %v3934_v33  ;;  %v1095_v35 = vpop.f32.mrf.mxu2 }
 0x106   : > { %v1096_v46 = vadd.f32 %v1095_v35, %v3880_v45 }
 0x107   : > { %v1017_v56 = vpop.f32.mrf.mxu0 }
 0x108   : > { %v1264_v47 = vpop.f32.mrf.mxu3  ;;  %v1018_v8 = vadd.f32 %v1017_v56, %v3880_v45  ;;  %v1186_v11 = vpop.f32.mrf.mxu1  ;;  %v3962_v56 = vor.u32 %v2940_v21, %v2641_v20  ;;  %v2978_v20 = vld [vmem:[%s3637_s30 + $0xdc] sm:$0xf] }
 0x109   : > { %v3946_v57 = vadd.f32 %v1264_v47, %v1096_v46  ;;  %v3960_v47 = vor.u32 %v2908_v15, %v2513_v14  ;;  %v2954_v14 = vld [vmem:[%s3637_s30 + $0x1c] sm:$0xf]  ;;  %v2703_v15 = vld [vmem:[%s3637_s30 + $0x24] sm:$0xf0] }
 0x10a   : > { %v3949_v12 = vadd.f32 %v1186_v11, %v1018_v8  ;;  %4913 = vst [vmem:[#allocation47_spill] sm:$0xff] %v3962_v56  ;;  %v3964_v11 = vor.u32 %v2907_v22, %v2515_v23  ;;  %v2706_v21 = vor.u32 %v2954_v14, %v2703_v15  ;;  %v2799_v22 = vld [vmem:[%s3637_s30 + $0xe4] sm:$0xf0]  ;;  %v2910_v14 = vld [vmem:[%s3627_s20 + $0xb4] sm:$0xf0] }
 0x10b   : > { %4912 = vst [vmem:[#allocation46_spill] sm:$0xff] %v3946_v57  ;;  %v3966_v57 = vor.u32 %v2939_v26, %v2643_v53  ;;  %v2649_v15 = vld [vmem:[%s3627_s20 + $0x1b0] sm:$0xf] }
 0x10c   : > { %1345 = vmatpush.bf16.msrb.mxu2 %v2706_v21  ;;  %v2942_v21 = vld [vmem:[%s3627_s20 + $0x1b4] sm:$0xf0] }
 0x10d   : > { %v1097_v54 = vpop.f32.mrf.mxu2  ;;  %4914 = vst [vmem:[#allocation48_spill] sm:$0xff] %v3966_v57 }
 0x10e   : > { %v1098_v35 = vadd.f32 %v1097_v54, %v3880_v45 }
 0x10f   : > { %v1020_v8 = vpop.f32.mrf.mxu0 }
 0x110   : > { %v1266_v46 = vpop.f32.mrf.mxu3  ;;  %v1021_v25 = vadd.f32 %v1020_v8, %v3880_v45  ;;  %v1189_v34 = vpop.f32.mrf.mxu1  ;;  %v2521_v8 = vld [vmem:[%s3627_s20 + $0xb0] sm:$0xf] }
 0x111   : > { %v3968_v33 = vadd.f32 %v1266_v46, %v1098_v35  ;;  %v4000_v37 = vor.u32 %v2910_v14, %v2521_v8 }
 0x112   : > { %v3971_v32 = vadd.f32 %v1189_v34, %v1021_v25  ;;  %1059 = vmatmul.bf16.gmra.mxu0 %v3960_v47  ;;  %1139 = vmatmul.bf16.gmra.mxu2 %v3962_v56  ;;  %v2802_v34 = vor.u32 %v2978_v20, %v2799_v22  ;;  %v2709_v22 = vld [vmem:[%s3637_s30 + $0x20] sm:$0xf]  ;;  %v2909_v56 = vld [vmem:[%s3627_s20 + $0xb4] sm:$0xf] }
 0x113   : > { %4915 = vst [vmem:[#allocation49_spill] sm:$0xff] %v3968_v33  ;;  %1228 = vmatmul.bf16.gmra.mxu1 %v3964_v11 }
 0x114   : > { %1514 = vmatpush.bf16.msrb.mxu3 %v2802_v34  ;;  %v2523_v34 = vld [vmem:[%s3627_s20 + $0xb8] sm:$0xf0] }
 0x115   : > { %1308 = vmatmul.bf16.gmra.mxu3 %v3966_v57  ;;  %v1100_v25 = vpop.f32.mrf.mxu2  ;;  %v2805_v57 = vld [vmem:[%s3637_s30 + $0xe0] sm:$0xf]  ;;  %v4004_v63 = vor.u32 %v2909_v56, %v2523_v34  ;;  %v2912_v34 = vld [vmem:[%s3627_s20 + $0xc4] sm:$0xf0] }
 0x116   : > { %v1101_v23 = vadd.f32 %v1100_v25, %v3880_v45  ;;  %v2956_v25 = vld [vmem:[%s3637_s30 + $0x28] sm:$0xf0] }
 0x117   : > { %v1022_v53 = vpop.f32.mrf.mxu0  ;;  %v2710_v33 = vor.u32 %v2956_v25, %v2709_v22 }
 0x118   : > { %v1269_v26 = vpop.f32.mrf.mxu3  ;;  %v1023_v35 = vadd.f32 %v1022_v53, %v3880_v45  ;;  %v1191_v46 = vpop.f32.mrf.mxu1 }
 0x119   : > { %v3982_v54 = vadd.f32 %v1269_v26, %v1101_v23  ;;  %v2651_v23 = vld [vmem:[%s3627_s20 + $0x1b8] sm:$0xf0]  ;;  %v2806_v26 = vor.u32 %v2980_v10, %v2805_v57  ;;  %1683 = vmatpush.bf16.msrb.mxu0 %v2710_v33 }
 0x11a   : > { %v3988_v20 = vadd.f32 %v1191_v46, %v1023_v35  ;;  %v4002_v35 = vor.u32 %v2942_v21, %v2649_v15  ;;  %v4006_v61 = vor.u32 %v2941_v59, %v2651_v23  ;;  %v2529_v21 = vld [vmem:[%s3627_s20 + $0xc0] sm:$0xf] }
 0x11b   : > { %4916 = vst [vmem:[#allocation50_spill] sm:$0xff] %v3982_v54  ;;  %1852 = vmatpush.bf16.msrb.mxu1 %v2806_v26  ;;  %v2657_v23 = vld [vmem:[%s3627_s20 + $0x1c0] sm:$0xf]  ;;  %v2944_v26 = vld [vmem:[%s3627_s20 + $0x1c4] sm:$0xf0] }
 0x11c   : > { %4917 = vst [vmem:[#allocation51_spill] sm:$0xff] %v4002_v35 }
 0x11d   : > { %v1102_v54 = vpop.f32.mrf.mxu2  ;;  %4918 = vst [vmem:[#allocation52_spill] sm:$0xff] %v4006_v61 }
 0x11e   : > { %v1103_v53 = vadd.f32 %v1102_v54, %v3880_v45 }
 0x11f   : > { %v1025_v46 = vpop.f32.mrf.mxu0 }
 0x120   : > { %v1271_v39 = vpop.f32.mrf.mxu3  ;;  %v1026_v10 = vadd.f32 %v1025_v46, %v3880_v45  ;;  %v1194_v33 = vpop.f32.mrf.mxu1  ;;  %v2531_v46 = vld [vmem:[%s3627_s20 + $0xc8] sm:$0xf0] }
 0x121   : > { %v4008_v22 = vadd.f32 %v1271_v39, %v1103_v53  ;;  %v2911_v53 = vld [vmem:[%s3627_s20 + $0xc4] sm:$0xf] }
 0x122   : > { %v4011_v57 = vadd.f32 %v1194_v33, %v1026_v10  ;;  %1064 = vmatmul.bf16.gmra.mxu0 %v4000_v37  ;;  %1144 = vmatmul.bf16.gmra.mxu2 %v4002_v35  ;;  %v2943_v10 = vld [vmem:[%s3627_s20 + $0x1c4] sm:$0xf]  ;;  %v2659_v33 = vld [vmem:[%s3627_s20 + $0x1c8] sm:$0xf0] }
 0x123   : > { %4919 = vst [vmem:[#allocation53_spill] sm:$0xff] %v4008_v22  ;;  %1233 = vmatmul.bf16.gmra.mxu1 %v4004_v63 }
 0x125   : > { %1313 = vmatmul.bf16.gmra.mxu3 %v4006_v61  ;;  %v1105_v39 = vpop.f32.mrf.mxu2 }
 0x126   : > { %v1106_v59 = vadd.f32 %v1105_v39, %v3880_v45 }
 0x127   : > { %v1027_v54 = vpop.f32.mrf.mxu0 }
 0x128   : > { %v1274_v56 = vpop.f32.mrf.mxu3  ;;  %v1028_v14 = vadd.f32 %v1027_v54, %v3880_v45  ;;  %v1196_v15 = vpop.f32.mrf.mxu1  ;;  %v4034_v54 = vor.u32 %v2944_v26, %v2657_v23  ;;  %v2787_v26 = vld [vmem:[%s3637_s30 + $0xcc] sm:$0xf0] }
 0x129   : > { %v4018_v8 = vadd.f32 %v1274_v56, %v1106_v59  ;;  %v4032_v56 = vor.u32 %v2912_v34, %v2529_v21  ;;  %v2691_v21 = vld [vmem:[%s3637_s30 + $0xc] sm:$0xf0]  ;;  %v2975_v34 = vld [vmem:[%s3637_s30 + $0xc4] sm:$0xf] }
 0x12a   : > { %v4021_v25 = vadd.f32 %v1196_v15, %v1028_v14  ;;  %4921 = vst [vmem:[#allocation55_spill] sm:$0xff] %v4034_v54  ;;  %v4036_v15 = vor.u32 %v2911_v53, %v2531_v46 }
 0x12b   : > { %4920 = vst [vmem:[#allocation54_spill] sm:$0xff] %v4018_v8  ;;  %v4038_v8 = vor.u32 %v2943_v10, %v2659_v33 }
 0x12d   : > { %v1107_v61 = vpop.f32.mrf.mxu2  ;;  %4922 = vst [vmem:[#allocation56_spill] sm:$0xff] %v4038_v8 }
 0x12e   : > { %v1108_v39 = vadd.f32 %v1107_v61, %v3880_v45  ;;  %v2951_v61 = vld [vmem:[%s3637_s30 + $0x4] sm:$0xf] }
 0x12f   : > { %v1030_v14 = vpop.f32.mrf.mxu0  ;;  %v2694_v23 = vor.u32 %v2951_v61, %v2691_v21  ;;  %v2914_v61 = vld [vmem:[%s3627_s20 + $0xd4] sm:$0xf0]  ;;  %v2665_v21 = vld [vmem:[%s3627_s20 + $0x1d0] sm:$0xf] }
 0x130   : > { %v1276_v59 = vpop.f32.mrf.mxu3  ;;  %v1031_v22 = vadd.f32 %v1030_v14, %v3880_v45  ;;  %v1199_v51 = vpop.f32.mrf.mxu1  ;;  %v2537_v14 = vld [vmem:[%s3627_s20 + $0xd0] sm:$0xf] }
 0x131   : > { %v4040_v35 = vadd.f32 %v1276_v59, %v1108_v39  ;;  %1346 = vmatpush.bf16.msrb.mxu2 %v2694_v23  ;;  %v2946_v23 = vld [vmem:[%s3627_s20 + $0x1d4] sm:$0xf0]  ;;  %v4072_v1 = vor.u32 %v2914_v61, %v2537_v14 }
 0x132   : > { %v4043_v49 = vadd.f32 %v1199_v51, %v1031_v22  ;;  %1069 = vmatmul.bf16.gmra.mxu0 %v4032_v56  ;;  %1149 = vmatmul.bf16.gmra.mxu2 %v4034_v54  ;;  %v2790_v22 = vor.u32 %v2975_v34, %v2787_v26  ;;  %v2697_v26 = vld [vmem:[%s3637_s30 + $0x8] sm:$0xf]  ;;  %v2913_v54 = vld [vmem:[%s3627_s20 + $0xd4] sm:$0xf] }
 0x133   : > { %4923 = vst [vmem:[#allocation57_spill] sm:$0xff] %v4040_v35  ;;  %1238 = vmatmul.bf16.gmra.mxu1 %v4036_v15 }
 0x134   : > { %1515 = vmatpush.bf16.msrb.mxu3 %v2790_v22  ;;  %v2539_v22 = vld [vmem:[%s3627_s20 + $0xd8] sm:$0xf0] }
 0x135   : > { %1318 = vmatmul.bf16.gmra.mxu3 %v4038_v8  ;;  %v1110_v51 = vpop.f32.mrf.mxu2  ;;  %v2793_v8 = vld [vmem:[%s3637_s30 + $0xc8] sm:$0xf]  ;;  %v4076_v43 = vor.u32 %v2913_v54, %v2539_v22 }
 0x136   : > { %v1111_v53 = vadd.f32 %v1110_v51, %v3880_v45  ;;  %v2953_v51 = vld [vmem:[%s3637_s30 + $0x10] sm:$0xf0]  ;;  %v2916_v22 = vld [vmem:[%s3627_s20 + $0xe4] sm:$0xf0] }
 0x137   : > { %v1032_v10 = vpop.f32.mrf.mxu0  ;;  %v2698_v35 = vor.u32 %v2953_v51, %v2697_v26 }
 0x138   : > { %v1279_v46 = vpop.f32.mrf.mxu3  ;;  %v1033_v39 = vadd.f32 %v1032_v10, %v3880_v45  ;;  %v1201_v59 = vpop.f32.mrf.mxu1 }
 0x139   : > { %v4054_v33 = vadd.f32 %v1279_v46, %v1111_v53  ;;  %v2667_v53 = vld [vmem:[%s3627_s20 + $0x1d8] sm:$0xf0]  ;;  %v2794_v46 = vor.u32 %v2977_v19, %v2793_v8  ;;  %1684 = vmatpush.bf16.msrb.mxu0 %v2698_v35 }
 0x13a   : > { %v4060_v34 = vadd.f32 %v1201_v59, %v1033_v39  ;;  %v4074_v39 = vor.u32 %v2946_v23, %v2665_v21  ;;  %v4078_v41 = vor.u32 %v2945_v17, %v2667_v53  ;;  %v2545_v23 = vld [vmem:[%s3627_s20 + $0xe0] sm:$0xf] }
 0x13b   : > { %4924 = vst [vmem:[#allocation58_spill] sm:$0xff] %v4054_v33  ;;  %1853 = vmatpush.bf16.msrb.mxu1 %v2794_v46  ;;  %v2673_v53 = vld [vmem:[%s3627_s20 + $0x1e0] sm:$0xf]  ;;  %v2948_v46 = vld [vmem:[%s3627_s20 + $0x1e4] sm:$0xf0] }
 0x13c   : > { %4925 = vst [vmem:[#allocation59_spill] sm:$0xff] %v4074_v39 }
 0x13d   : > { %v1112_v33 = vpop.f32.mrf.mxu2  ;;  %4926 = vst [vmem:[#allocation60_spill] sm:$0xff] %v4078_v41 }
 0x13e   : > { %v1113_v10 = vadd.f32 %v1112_v33, %v3880_v45 }
 0x13f   : > { %v1035_v59 = vpop.f32.mrf.mxu0 }
 0x140   : > { %v1281_v7 = vpop.f32.mrf.mxu3  ;;  %v1036_v19 = vadd.f32 %v1035_v59, %v3880_v45  ;;  %v1204_v35 = vpop.f32.mrf.mxu1  ;;  %v2547_v59 = vld [vmem:[%s3627_s20 + $0xe8] sm:$0xf0] }
 0x141   : > { %v4080_v26 = vadd.f32 %v1281_v7, %v1113_v10  ;;  %v2915_v10 = vld [vmem:[%s3627_s20 + $0xe4] sm:$0xf] }
 0x142   : > { %v4083_v8 = vadd.f32 %v1204_v35, %v1036_v19  ;;  %1074 = vmatmul.bf16.gmra.mxu0 %v4072_v1  ;;  %1154 = vmatmul.bf16.gmra.mxu2 %v4074_v39  ;;  %v2947_v19 = vld [vmem:[%s3627_s20 + $0x1e4] sm:$0xf]  ;;  %v2675_v35 = vld [vmem:[%s3627_s20 + $0x1e8] sm:$0xf0] }
 0x143   : > { %4927 = vst [vmem:[#allocation61_spill] sm:$0xff] %v4080_v26  ;;  %1243 = vmatmul.bf16.gmra.mxu1 %v4076_v43  ;;  %v4104_v26 = vor.u32 %v2916_v22, %v2545_v23 }
 0x145   : > { %1323 = vmatmul.bf16.gmra.mxu3 %v4078_v41  ;;  %v1115_v7 = vpop.f32.mrf.mxu2 }
 0x146   : > { %v1116_v17 = vadd.f32 %v1115_v7, %v3880_v45 }
 0x147   : > { %v1037_v33 = vpop.f32.mrf.mxu0 }
 0x148   : > { %v1284_v54 = vpop.f32.mrf.mxu3  ;;  %v1038_v61 = vadd.f32 %v1037_v33, %v3880_v45  ;;  %v1206_v21 = vpop.f32.mrf.mxu1  ;;  %v4108_v33 = vor.u32 %v2915_v10, %v2547_v59  ;;  %v2553_v10 = vld [vmem:[%s3627_s20 + $0xf0] sm:$0xf]  ;;  %v2918_v59 = vld [vmem:[%s3627_s20 + $0xf4] sm:$0xf0] }
 0x149   : > { %v4090_v14 = vadd.f32 %v1284_v54, %v1116_v17  ;;  %v4106_v17 = vor.u32 %v2948_v46, %v2673_v53  ;;  %v4136_v3 = vor.u32 %v2918_v59, %v2553_v10 }
 0x14a   : > { %v4093_v51 = vadd.f32 %v1206_v21, %v1038_v61  ;;  %v4110_v61 = vor.u32 %v2947_v19, %v2675_v35  ;;  %v2681_v19 = vld [vmem:[%s3627_s20 + $0x1f0] sm:$0xf]  ;;  %v2950_v35 = vld [vmem:[%s3627_s20 + $0x1f4] sm:$0xf0] }
 0x14b   : > { %4928 = vst [vmem:[#allocation62_spill] sm:$0xff] %v4090_v14 }
 0x14c   : > { %4929 = vst [vmem:[#allocation63_spill] sm:$0xff] %v4106_v17 }
 0x14d   : > { %v1117_v41 = vpop.f32.mrf.mxu2  ;;  %4930 = vst [vmem:[#allocation64_spill] sm:$0xff] %v4110_v61 }
 0x14e   : > { %v1118_v7 = vadd.f32 %v1117_v41, %v3880_v45 }
 0x14f   : > { %v1040_v54 = vpop.f32.mrf.mxu0 }
 0x150   : > { %v1286_v39 = vpop.f32.mrf.mxu3  ;;  %v1041_v14 = vadd.f32 %v1040_v54, %v3880_v45  ;;  %v1209_v31 = vpop.f32.mrf.mxu1  ;;  %v2555_v54 = vld [vmem:[%s3627_s20 + $0xf8] sm:$0xf0] }
 0x151   : > { %v4112_v21 = vadd.f32 %v1286_v39, %v1118_v7  ;;  %v2917_v7 = vld [vmem:[%s3627_s20 + $0xf4] sm:$0xf] }
 0x152   : > { %v4115_v29 = vadd.f32 %v1209_v31, %v1041_v14  ;;  %1079 = vmatmul.bf16.gmra.mxu0 %v4104_v26  ;;  %1159 = vmatmul.bf16.gmra.mxu2 %v4106_v17  ;;  %v2683_v17 = vld [vmem:[%s3627_s20 + $0x1f8] sm:$0xf0] }
 0x153   : > { %4931 = vst [vmem:[#allocation65_spill] sm:$0xff] %v4112_v21  ;;  %1248 = vmatmul.bf16.gmra.mxu1 %v4108_v33 }
 0x154   : > { %4932 = vst [vmem:[#allocation66_spill] sm:$0xff] %v4115_v29 }
 0x155   : > { %1328 = vmatmul.bf16.gmra.mxu3 %v4110_v61  ;;  %v1120_v41 = vpop.f32.mrf.mxu2  ;;  %v2949_v61 = vld [vmem:[%s3627_s20 + $0x1f4] sm:$0xf]  ;;  %s3269_s20 = sshra.s32 %s2290_s12, 4  ;;  %s3270_s20 = int_to_ptr.hbm [resolvable:$true] %s3269_s20 }
 0x156   : > { %v1121_v39 = vadd.f32 %v1120_v41, %v3880_v45  ;;  %s3271_s0 = scalar_lea.hbm %s3270_s20, 768  ;;  %p3276_p1 = scmp.lt.s32.totalorder %s3270_s20, %s5016_s26 }
 0x157   : > { %v1042_v22 = vpop.f32.mrf.mxu0  ;;  %p3272_p4 = scmp.ne.s32.totalorder %s3270_s20, %s3271_s0  ;;  %p3277_p3 = scmp.lt.s32.totalorder %s3275_s5, %s3271_s0 }
 0x158   : > { %v1289_v23 = vpop.f32.mrf.mxu3  ;;  %v1043_v14 = vadd.f32 %v1042_v22, %v3880_v45  ;;  %v1211_v53 = vpop.f32.mrf.mxu1  ;;  %v4140_v22 = vor.u32 %v2917_v7, %v2555_v54 }
 0x159   : > { %v4122_v31 = vadd.f32 %v1289_v23, %v1121_v39  ;;  %v4138_v39 = vor.u32 %v2950_v35, %v2681_v19  ;;  %p3273_p5 = pnand %p3272_p4, %p3596_p2  ;;  %p3278_p7 = por %p3277_p3, %p3276_p1 }
 0x15a   : > { %v4125_v46 = vadd.f32 %v1211_v53, %v1043_v14  ;;  %v4142_v14 = vor.u32 %v2949_v61, %v2683_v17 }
 0x15b   : > { %4933 = vst [vmem:[#allocation67_spill] sm:$0xff] %v4122_v31  ;;  %p3274_p8 = pneg %p3273_p5 }
 0x15c   : > { %4934 = vst [vmem:[#allocation68_spill] sm:$0xff] %v4125_v46 }
 0x15d   : > { %v1122_v21 = vpop.f32.mrf.mxu2  ;;  %4935 = vst [vmem:[#allocation69_spill] sm:$0xff] %v4142_v14  ;;  %p3279_p9 = pnand %p3278_p7, %p3274_p8 }
 0x15e   : > { %v1123_v41 = vadd.f32 %v1122_v21, %v3880_v45 }
 0x15f   : > { %v1045_v23 = vpop.f32.mrf.mxu0 }
 0x160   : > { %v1291_v5 = vpop.f32.mrf.mxu3  ;;  %v1046_v31 = vadd.f32 %v1045_v23, %v3880_v45  ;;  %v1214_v46 = vpop.f32.mrf.mxu1 }
 0x161   : > { %v4144_v53 = vadd.f32 %v1291_v5, %v1123_v41 }
 0x162   : > { %v4147_v29 = vadd.f32 %v1214_v46, %v1046_v31  ;;  %1084 = vmatmul.bf16.gmra.mxu0 %v4136_v3  ;;  %1164 = vmatmul.bf16.gmra.mxu2 %v4138_v39 }
 0x163   : > { %1253 = vmatmul.bf16.gmra.mxu1 %v4140_v22 }
 0x165   : > { %1333 = vmatmul.bf16.gmra.mxu3 %v4142_v14  ;;  %v1125_v21 = vpop.f32.mrf.mxu2 }
 0x166   : > { %v1126_v10 = vadd.f32 %v1125_v21, %v3880_v45 }
 0x167   : > { %v1047_v61 = vpop.f32.mrf.mxu0 }
 0x168   : > { %v1294_v17 = vpop.f32.mrf.mxu3  ;;  %v1048_v59 = vadd.f32 %v1047_v61, %v3880_v45  ;;  %v1216_v19 = vpop.f32.mrf.mxu1 }
 0x169   : > { %v4154_v5 = vadd.f32 %v1294_v17, %v1126_v10 }
 0x16a   : > { %v4157_v31 = vadd.f32 %v1216_v19, %v1048_v59 }
 0x16b   : > { %4936 = vst [vmem:[#allocation70_spill] sm:$0xff] %v4154_v5 }
 0x16d   : > { %v1127_v46 = vpop.f32.mrf.mxu2 }
 0x16e   : > { %v1128_v35 = vadd.f32 %v1127_v46, %v3880_v45 }
 0x16f   : > { %v1050_v54 = vpop.f32.mrf.mxu0 }
 0x170   : > { %v1296_v7 = vpop.f32.mrf.mxu3  ;;  %v1051_v23 = vadd.f32 %v1050_v54, %v3880_v45  ;;  %v1219_v14 = vpop.f32.mrf.mxu1 }
 0x171   : > { %v4160_v41 = vadd.f32 %v1296_v7, %v1128_v35 }
 0x172   : > { %v4163_v21 = vadd.f32 %v1219_v14, %v1051_v23  ;;  %1347 = vmatmul.bf16.vlgmr.msrb.gmra.mxu2 %v3691_v2  ;;  %1685 = vmatmul.bf16.vlgmr.msrb.gmra.mxu0 %v3691_v2 }
 0x173   : > { %4937 = vst [vmem:[#allocation71_spill] sm:$0xff] %v4160_v41  ;;  %1854 = vmatmul.bf16.vlgmr.msrb.gmra.mxu1 %v3695_v4 }
 0x175   : > { %1516 = vmatmul.bf16.vlgmr.msrb.gmra.mxu3 %v3695_v4  ;;  %v1130_v10 = vpop.f32.mrf.mxu2 }
 0x176   : > { %v1131_v17 = vadd.f32 %v1130_v10, %v3880_v45 }
 0x177   : > { %v1052_v59 = vpop.f32.mrf.mxu0 }
 0x178   : > { %v1299_v61 = vpop.f32.mrf.mxu3  ;;  %v1053_v46 = vadd.f32 %v1052_v59, %v3880_v45  ;;  %v1221_v35 = vpop.f32.mrf.mxu1 }
 0x179   : > { %v4170_v19 = vadd.f32 %v1299_v61, %v1131_v17 }
 0x17a   : > { %v4173_v14 = vadd.f32 %v1221_v35, %v1053_v46 }
 0x17b   : > { %4938 = vst [vmem:[#allocation72_spill] sm:$0xff] %v4170_v19 }
 0x17d   : > { %v1132_v7 = vpop.f32.mrf.mxu2 }
 0x17e   : > { %v1133_v54 = vadd.f32 %v1132_v7, %v3880_v45 }
 0x17f   : > { %v1055_v23 = vpop.f32.mrf.mxu0 }
 0x180   : > { %v1301_v2 = vpop.f32.mrf.mxu3  ;;  %v1056_v4 = vadd.f32 %v1055_v23, %v3880_v45  ;;  %v1224_v5 = vpop.f32.mrf.mxu1 }
 0x181   : > { %v4176_v41 = vadd.f32 %v1301_v2, %v1133_v54 }
 0x182   : > { %v4179_v10 = vadd.f32 %v1224_v5, %v1056_v4  ;;  %1352 = vmatmul.bf16.gmra.mxu2 %v3719_v28  ;;  %1690 = vmatmul.bf16.gmra.mxu0 %v3719_v28 }
 0x183   : > { %4939 = vst [vmem:[#allocation73_spill] sm:$0xff] %v4176_v41  ;;  %1859 = vmatmul.bf16.gmra.mxu1 %v3723_v30 }
 0x185   : > { %1521 = vmatmul.bf16.gmra.mxu3 %v3723_v30  ;;  %v1135_v17 = vpop.f32.mrf.mxu2 }
 0x186   : > { %v1136_v61 = vadd.f32 %v1135_v17, %v3880_v45 }
 0x187   : > { %v1057_v46 = vpop.f32.mrf.mxu0 }
 0x188   : > { %v1304_v59 = vpop.f32.mrf.mxu3  ;;  %v1058_v7 = vadd.f32 %v1057_v46, %v3880_v45  ;;  %v1226_v54 = vpop.f32.mrf.mxu1 }
 0x189   : > { %v4186_v35 = vadd.f32 %v1304_v59, %v1136_v61 }
 0x18a   : > { %v4189_v5 = vadd.f32 %v1226_v54, %v1058_v7 }
 0x18b   : > { %4940 = vst [vmem:[#allocation74_spill] sm:$0xff] %v4186_v35 }
 0x18d   : > { %v1137_v2 = vpop.f32.mrf.mxu2 }
 0x18e   : > { %v1138_v23 = vadd.f32 %v1137_v2, %v3880_v45 }
 0x18f   : > { %v1060_v4 = vpop.f32.mrf.mxu0 }
 0x190   : > { %v1306_v28 = vpop.f32.mrf.mxu3  ;;  %v1061_v30 = vadd.f32 %v1060_v4, %v3880_v45  ;;  %v1229_v19 = vpop.f32.mrf.mxu1 }
 0x191   : > { %v4192_v41 = vadd.f32 %v1306_v28, %v1138_v23 }
 0x192   : > { %v4195_v17 = vadd.f32 %v1229_v19, %v1061_v30  ;;  %1357 = vmatmul.bf16.gmra.mxu2 %v3739_v40  ;;  %1695 = vmatmul.bf16.gmra.mxu0 %v3739_v40 }
 0x193   : > { %4941 = vst [vmem:[#allocation75_spill] sm:$0xff] %v4192_v41  ;;  %1864 = vmatmul.bf16.gmra.mxu1 %v3743_v42 }
 0x195   : > { %1526 = vmatmul.bf16.gmra.mxu3 %v3743_v42  ;;  %v1140_v61 = vpop.f32.mrf.mxu2 }
 0x196   : > { %v1141_v59 = vadd.f32 %v1140_v61, %v3880_v45 }
 0x197   : > { %v1062_v7 = vpop.f32.mrf.mxu0 }
 0x198   : > { %v1309_v46 = vpop.f32.mrf.mxu3  ;;  %v1063_v2 = vadd.f32 %v1062_v7, %v3880_v45  ;;  %v1231_v23 = vpop.f32.mrf.mxu1 }
 0x199   : > { %v4202_v54 = vadd.f32 %v1309_v46, %v1141_v59 }
 0x19a   : > { %v4205_v19 = vadd.f32 %v1231_v23, %v1063_v2 }
 0x19b   : > { %4942 = vst [vmem:[#allocation76_spill] sm:$0xff] %v4202_v54 }
 0x19d   : > { %v1142_v28 = vpop.f32.mrf.mxu2 }
 0x19e   : > { %v1143_v4 = vadd.f32 %v1142_v28, %v3880_v45 }
 0x19f   : > { %v1065_v30 = vpop.f32.mrf.mxu0 }
 0x1a0   : > { %v1311_v40 = vpop.f32.mrf.mxu3  ;;  %v1066_v42 = vadd.f32 %v1065_v30, %v3880_v45  ;;  %v1234_v35 = vpop.f32.mrf.mxu1 }
 0x1a1   : > { %v4208_v41 = vadd.f32 %v1311_v40, %v1143_v4 }
 0x1a2   : > { %v4211_v61 = vadd.f32 %v1234_v35, %v1066_v42  ;;  %1362 = vmatmul.bf16.gmra.mxu2 %v3767_v0  ;;  %1700 = vmatmul.bf16.gmra.mxu0 %v3767_v0 }
 0x1a3   : > { %4943 = vst [vmem:[#allocation77_spill] sm:$0xff] %v4208_v41  ;;  %1869 = vmatmul.bf16.gmra.mxu1 %v3771_v6 }
 0x1a5   : > { %1531 = vmatmul.bf16.gmra.mxu3 %v3771_v6  ;;  %v1145_v59 = vpop.f32.mrf.mxu2 }
 0x1a6   : > { %v1146_v46 = vadd.f32 %v1145_v59, %v3880_v45 }
 0x1a7   : > { %v1067_v2 = vpop.f32.mrf.mxu0 }
 0x1a8   : > { %v1314_v7 = vpop.f32.mrf.mxu3  ;;  %v1068_v28 = vadd.f32 %v1067_v2, %v3880_v45  ;;  %v1236_v4 = vpop.f32.mrf.mxu1 }
 0x1a9   : > { %v4218_v23 = vadd.f32 %v1314_v7, %v1146_v46 }
 0x1aa   : > { %v4221_v35 = vadd.f32 %v1236_v4, %v1068_v28 }
 0x1ab   : > { %4944 = vst [vmem:[#allocation78_spill] sm:$0xff] %v4218_v23 }
 0x1ad   : > { %v1147_v40 = vpop.f32.mrf.mxu2 }
 0x1ae   : > { %v1148_v30 = vadd.f32 %v1147_v40, %v3880_v45 }
 0x1af   : > { %v1070_v42 = vpop.f32.mrf.mxu0 }
 0x1b0   : > { %v1316_v0 = vpop.f32.mrf.mxu3  ;;  %v1071_v6 = vadd.f32 %v1070_v42, %v3880_v45  ;;  %v1239_v54 = vpop.f32.mrf.mxu1 }
 0x1b1   : > { %v4224_v41 = vadd.f32 %v1316_v0, %v1148_v30 }
 0x1b2   : > { %v4227_v59 = vadd.f32 %v1239_v54, %v1071_v6  ;;  %1367 = vmatmul.bf16.gmra.mxu2 %v3787_v16  ;;  %1705 = vmatmul.bf16.gmra.mxu0 %v3787_v16 }
 0x1b3   : > { %4945 = vst [vmem:[#allocation79_spill] sm:$0xff] %v4224_v41  ;;  %1874 = vmatmul.bf16.gmra.mxu1 %v3791_v18 }
 0x1b5   : > { %1536 = vmatmul.bf16.gmra.mxu3 %v3791_v18  ;;  %v1150_v46 = vpop.f32.mrf.mxu2 }
 0x1b6   : > { %v1151_v7 = vadd.f32 %v1150_v46, %v3880_v45 }
 0x1b7   : > { %v1072_v28 = vpop.f32.mrf.mxu0 }
 0x1b8   : > { %v1319_v2 = vpop.f32.mrf.mxu3  ;;  %v1073_v40 = vadd.f32 %v1072_v28, %v3880_v45  ;;  %v1241_v30 = vpop.f32.mrf.mxu1 }
 0x1b9   : > { %v4234_v4 = vadd.f32 %v1319_v2, %v1151_v7 }
 0x1ba   : > { %v4237_v54 = vadd.f32 %v1241_v30, %v1073_v40 }
 0x1bb   : > { %4946 = vst [vmem:[#allocation80_spill] sm:$0xff] %v4234_v4 }
 0x1bd   : > { %v1152_v0 = vpop.f32.mrf.mxu2 }
 0x1be   : > { %v1153_v42 = vadd.f32 %v1152_v0, %v3880_v45 }
 0x1bf   : > { %v1075_v6 = vpop.f32.mrf.mxu0 }
 0x1c0   : > { %v1321_v16 = vpop.f32.mrf.mxu3  ;;  %v1076_v18 = vadd.f32 %v1075_v6, %v3880_v45  ;;  %v1244_v23 = vpop.f32.mrf.mxu1 }
 0x1c1   : > { %v4240_v41 = vadd.f32 %v1321_v16, %v1153_v42 }
 0x1c2   : > { %v4243_v46 = vadd.f32 %v1244_v23, %v1076_v18  ;;  %1372 = vmatmul.bf16.gmra.mxu2 %v3815_v48  ;;  %1710 = vmatmul.bf16.gmra.mxu0 %v3815_v48 }
 0x1c3   : > { %4947 = vst [vmem:[#allocation81_spill] sm:$0xff] %v4240_v41  ;;  %1879 = vmatmul.bf16.gmra.mxu1 %v3819_v50 }
 0x1c5   : > { %1541 = vmatmul.bf16.gmra.mxu3 %v3819_v50  ;;  %v1155_v7 = vpop.f32.mrf.mxu2 }
 0x1c6   : > { %v1156_v2 = vadd.f32 %v1155_v7, %v3880_v45 }
 0x1c7   : > { %v1077_v40 = vpop.f32.mrf.mxu0 }
 0x1c8   : > { %v1324_v28 = vpop.f32.mrf.mxu3  ;;  %v1078_v0 = vadd.f32 %v1077_v40, %v3880_v45  ;;  %v1246_v42 = vpop.f32.mrf.mxu1 }
 0x1c9   : > { %v4250_v30 = vadd.f32 %v1324_v28, %v1156_v2 }
 0x1ca   : > { %v4253_v23 = vadd.f32 %v1246_v42, %v1078_v0 }
 0x1cb   : > { %4948 = vst [vmem:[#allocation82_spill] sm:$0xff] %v4250_v30 }
 0x1cd   : > { %v1157_v16 = vpop.f32.mrf.mxu2 }
 0x1ce   : > { %v1158_v6 = vadd.f32 %v1157_v16, %v3880_v45 }
 0x1cf   : > { %v1080_v18 = vpop.f32.mrf.mxu0 }
 0x1d0   : > { %v1326_v48 = vpop.f32.mrf.mxu3  ;;  %v1081_v50 = vadd.f32 %v1080_v18, %v3880_v45  ;;  %v1249_v4 = vpop.f32.mrf.mxu1 }
 0x1d1   : > { %v4256_v41 = vadd.f32 %v1326_v48, %v1158_v6 }
 0x1d2   : > { %v4259_v7 = vadd.f32 %v1249_v4, %v1081_v50  ;;  %1377 = vmatmul.bf16.gmra.mxu2 %v3835_v60  ;;  %1715 = vmatmul.bf16.gmra.mxu0 %v3835_v60 }
 0x1d3   : > { %4949 = vst [vmem:[#allocation83_spill] sm:$0xff] %v4256_v41  ;;  %1884 = vmatmul.bf16.gmra.mxu1 %v3839_v62 }
 0x1d5   : > { %1546 = vmatmul.bf16.gmra.mxu3 %v3839_v62  ;;  %v1160_v2 = vpop.f32.mrf.mxu2 }
 0x1d6   : > { %v1161_v28 = vadd.f32 %v1160_v2, %v3880_v45 }
 0x1d7   : > { %v1082_v0 = vpop.f32.mrf.mxu0 }
 0x1d8   : > { %v1329_v40 = vpop.f32.mrf.mxu3  ;;  %v1083_v16 = vadd.f32 %v1082_v0, %v3880_v45  ;;  %v1251_v6 = vpop.f32.mrf.mxu1 }
 0x1d9   : > { %v4266_v42 = vadd.f32 %v1329_v40, %v1161_v28 }
 0x1da   : > { %v4269_v4 = vadd.f32 %v1251_v6, %v1083_v16 }
 0x1dd   : > { %v1162_v48 = vpop.f32.mrf.mxu2 }
 0x1de   : > { %v1163_v18 = vadd.f32 %v1162_v48, %v3880_v45 }
 0x1df   : > { %v1085_v50 = vpop.f32.mrf.mxu0 }
 0x1e0   : > { %v1331_v60 = vpop.f32.mrf.mxu3  ;;  %v1086_v62 = vadd.f32 %v1085_v50, %v3880_v45  ;;  %v1254_v2 = vpop.f32.mrf.mxu1  ;;  %v4288_v50 = vperm.slane %v3877_v44, 2 }
 0x1e1   : > { %v4272_v41 = vadd.f32 %v1331_v60, %v1163_v18 }
 0x1e2   : > { %v4275_v30 = vadd.f32 %v1254_v2, %v1086_v62  ;;  %1382 = vmatmul.bf16.gmra.mxu2 %v3863_v36  ;;  %1720 = vmatmul.bf16.gmra.mxu0 %v3863_v36 }
 0x1e3   : > { %4950 = vst [vmem:[#allocation84_spill] sm:$0xff] %v4272_v41  ;;  %1889 = vmatmul.bf16.gmra.mxu1 %v3867_v38 }
 0x1e5   : > { %1551 = vmatmul.bf16.gmra.mxu3 %v3867_v38  ;;  %v1165_v28 = vpop.f32.mrf.mxu2 }
 0x1e6   : > { %v1166_v40 = vadd.f32 %v1165_v28, %v3880_v45 }
 0x1e7   : > { %v1087_v16 = vpop.f32.mrf.mxu0 }
 0x1e8   : > { %v1334_v0 = vpop.f32.mrf.mxu3  ;;  %v1088_v48 = vadd.f32 %v1087_v16, %v3880_v45  ;;  %v1256_v18 = vpop.f32.mrf.mxu1 }
 0x1e9   : > { %v4282_v6 = vadd.f32 %v1334_v0, %v1166_v40 }
 0x1ea   : > { %v4285_v60 = vadd.f32 %v1256_v18, %v1088_v48  ;;  %v4300_v48 = vperm.slane %v3877_v44, 1 }
 0x1eb   : > { %4951 = vst [vmem:[#allocation85_spill] sm:$0xff] %v4282_v6 }
 0x1ed   : > { %v1167_v36 = vpop.f32.mrf.mxu2 }
 0x1ee   : > { %v1168_v62 = vadd.f32 %v1167_v36, %v3880_v45 }
 0x1ef   : > { %v1686_v2 = vpop.f32.mrf.mxu0 }
 0x1f0   : > { %v1336_v38 = vpop.f32.mrf.mxu3  ;;  %v1687_v40 = vadd.f32 %v1686_v2, %v4288_v50  ;;  %v1855_v0 = vpop.f32.mrf.mxu1 }
 0x1f1   : > { %v4294_v28 = vadd.f32 %v1336_v38, %v1168_v62 }
 0x1f2   : > { %v1856_v16 = vadd.f32 %v1855_v0, %v1687_v40  ;;  %1387 = vmatmul.bf16.gmra.mxu2 %v3890_v58  ;;  %1725 = vmatmul.bf16.gmra.mxu0 %v3890_v58 }
 0x1f3   : > { %4952 = vst [vmem:[#allocation86_spill] sm:$0xff] %v4294_v28  ;;  %1894 = vmatmul.bf16.gmra.mxu1 %v3894_v9 }
 0x1f4   : > { %v2016_v45 = vpack.c.bf16 %v1856_v16, %v1856_v16 }
 0x1f5   : > { %1556 = vmatmul.bf16.gmra.mxu3 %v3894_v9  ;;  %v1348_v18 = vpop.f32.mrf.mxu2 }
 0x1f6   : > { %2144 = vst [vmem:[%s4304_s7 + $0x8] sm:$0xf] %v2016_v45  ;;  %v1349_v36 = vadd.f32 %v1348_v18, %v4300_v48 }
 0x1f7   : > { %v1688_v38 = vpop.f32.mrf.mxu0 }
 0x1f8   : > { %v1517_v62 = vpop.f32.mrf.mxu3  ;;  %v1689_v44 = vadd.f32 %v1688_v38, %v4288_v50  ;;  %v1857_v2 = vpop.f32.mrf.mxu1 }
 0x1f9   : > { %v1518_v58 = vadd.f32 %v1517_v62, %v1349_v36 }
 0x1fa   : > { %v1858_v0 = vadd.f32 %v1857_v2, %v1689_v44 }
 0x1fb   : > { %v2015_v40 = vpack.c.bf16 %v1518_v58, %v3899_v13 }
 0x1fc   : > { %v2018_v9 = vpack.c.bf16 %v1858_v0, %v1858_v0 }
 0x1fd   : > { %2143 = vst [vmem:[%s4304_s7] sm:$0xff] %v2015_v40  ;;  %v1350_v16 = vpop.f32.mrf.mxu2 }
 0x1fe   : > { %2146 = vst [vmem:[%s4304_s7 + $0x14] sm:$0xf] %v2018_v9  ;;  %v1351_v28 = vadd.f32 %v1350_v16, %v4300_v48 }
 0x1ff   : > { %v1691_v6 = vpop.f32.mrf.mxu0 }
 0x200   : > { %v1519_v45 = vpop.f32.mrf.mxu3  ;;  %v1692_v41 = vadd.f32 %v1691_v6, %v4288_v50  ;;  %v1860_v36 = vpop.f32.mrf.mxu1 }
 0x201   : > { %v1520_v18 = vadd.f32 %v1519_v45, %v1351_v28 }
 0x202   : > { %v1861_v38 = vadd.f32 %v1860_v36, %v1692_v41  ;;  %1392 = vmatmul.bf16.gmra.mxu2 %v3928_v24  ;;  %1730 = vmatmul.bf16.gmra.mxu0 %v3928_v24 }
 0x203   : > { %v2017_v62 = vpack.c.bf16 %v1520_v18, %v3916_v52  ;;  %1899 = vmatmul.bf16.gmra.mxu1 %v3932_v27 }
 0x204   : > { %v2020_v13 = vpack.c.bf16 %v1861_v38, %v1861_v38 }
 0x205   : > { %1561 = vmatmul.bf16.gmra.mxu3 %v3932_v27  ;;  %2145 = vst [vmem:[%s4304_s7 + $0xc] sm:$0xff] %v2017_v62  ;;  %v1353_v58 = vpop.f32.mrf.mxu2 }
 0x206   : > { %2148 = vst [vmem:[%s4304_s7 + $0x20] sm:$0xf] %v2020_v13  ;;  %v1354_v6 = vadd.f32 %v1353_v58, %v4300_v48 }
 0x207   : > { %v1693_v44 = vpop.f32.mrf.mxu0 }
 0x208   : > { %v1522_v28 = vpop.f32.mrf.mxu3  ;;  %v1694_v41 = vadd.f32 %v1693_v44, %v4288_v50  ;;  %v1862_v2 = vpop.f32.mrf.mxu1 }
 0x209   : > { %v1523_v52 = vadd.f32 %v1522_v28, %v1354_v6 }
 0x20a   : > { %v1863_v24 = vadd.f32 %v1862_v2, %v1694_v41 }
 0x20b   : > { %v2019_v40 = vpack.c.bf16 %v1523_v52, %v3939_v55 }
 0x20c   : > { %v2022_v0 = vpack.c.bf16 %v1863_v24, %v1863_v24 }
 0x20d   : > { %2147 = vst [vmem:[%s4304_s7 + $0x18] sm:$0xff] %v2019_v40  ;;  %v1355_v27 = vpop.f32.mrf.mxu2 }
 0x20e   : > { %2150 = vst [vmem:[%s4304_s7 + $0x2c] sm:$0xf] %v2022_v0  ;;  %v1356_v9 = vadd.f32 %v1355_v27, %v4300_v48 }
 0x20f   : > { %v1696_v45 = vpop.f32.mrf.mxu0 }
 0x210   : > { %v1524_v16 = vpop.f32.mrf.mxu3  ;;  %v1697_v36 = vadd.f32 %v1696_v45, %v4288_v50  ;;  %v1865_v62 = vpop.f32.mrf.mxu1 }
 0x211   : > { %v1525_v18 = vadd.f32 %v1524_v16, %v1356_v9 }
 0x212   : > { %v1866_v13 = vadd.f32 %v1865_v62, %v1697_v36  ;;  %1397 = vmatmul.bf16.gmra.mxu2 %v3960_v47  ;;  %1735 = vmatmul.bf16.gmra.mxu0 %v3960_v47 }
 0x213   : > { %v2021_v38 = vpack.c.bf16 %v1525_v18, %v3949_v12  ;;  %1904 = vmatmul.bf16.gmra.mxu1 %v3964_v11 }
 0x214   : > { %v2024_v55 = vpack.c.bf16 %v1866_v13, %v1866_v13 }
 0x215   : > { %1566 = vmatmul.bf16.gmra.mxu3 %v3964_v11  ;;  %2149 = vst [vmem:[%s4304_s7 + $0x24] sm:$0xff] %v2021_v38  ;;  %v1358_v58 = vpop.f32.mrf.mxu2 }
 0x216   : > { %2152 = vst [vmem:[%s4304_s7 + $0x38] sm:$0xf] %v2024_v55  ;;  %v1359_v6 = vadd.f32 %v1358_v58, %v4300_v48 }
 0x217   : > { %v1698_v44 = vpop.f32.mrf.mxu0 }
 0x218   : > { %v1527_v28 = vpop.f32.mrf.mxu3  ;;  %v1699_v52 = vadd.f32 %v1698_v44, %v4288_v50  ;;  %v1867_v41 = vpop.f32.mrf.mxu1 }
 0x219   : > { %v1528_v12 = vadd.f32 %v1527_v28, %v1359_v6 }
 0x21a   : > { %v1868_v47 = vadd.f32 %v1867_v41, %v1699_v52 }
 0x21b   : > { %v2023_v2 = vpack.c.bf16 %v1528_v12, %v3971_v32 }
 0x21c   : > { %v2026_v40 = vpack.c.bf16 %v1868_v47, %v1868_v47 }
 0x21d   : > { %2151 = vst [vmem:[%s4304_s7 + $0x30] sm:$0xff] %v2023_v2  ;;  %v1360_v11 = vpop.f32.mrf.mxu2 }
 0x21e   : > { %2154 = vst [vmem:[%s4304_s7 + $0x44] sm:$0xf] %v2026_v40  ;;  %v1361_v24 = vadd.f32 %v1360_v11, %v4300_v48 }
 0x21f   : > { %v1701_v27 = vpop.f32.mrf.mxu0 }
 0x220   : > { %v1529_v0 = vpop.f32.mrf.mxu3  ;;  %v1702_v16 = vadd.f32 %v1701_v27, %v4288_v50  ;;  %v1870_v45 = vpop.f32.mrf.mxu1 }
 0x221   : > { %v1530_v9 = vadd.f32 %v1529_v0, %v1361_v24 }
 0x222   : > { %v1871_v36 = vadd.f32 %v1870_v45, %v1702_v16  ;;  %1402 = vmatmul.bf16.gmra.mxu2 %v4000_v37  ;;  %1740 = vmatmul.bf16.gmra.mxu0 %v4000_v37 }
 0x223   : > { %v2025_v18 = vpack.c.bf16 %v1530_v9, %v3988_v20  ;;  %1909 = vmatmul.bf16.gmra.mxu1 %v4004_v63 }
 0x224   : > { %v2028_v32 = vpack.c.bf16 %v1871_v36, %v1871_v36 }
 0x225   : > { %1571 = vmatmul.bf16.gmra.mxu3 %v4004_v63  ;;  %2153 = vst [vmem:[%s4304_s7 + $0x3c] sm:$0xff] %v2025_v18  ;;  %v1363_v62 = vpop.f32.mrf.mxu2 }
 0x226   : > { %2156 = vst [vmem:[%s4304_s7 + $0x50] sm:$0xf] %v2028_v32  ;;  %v1364_v38 = vadd.f32 %v1363_v62, %v4300_v48 }
 0x227   : > { %v1703_v55 = vpop.f32.mrf.mxu0 }
 0x228   : > { %v1532_v13 = vpop.f32.mrf.mxu3  ;;  %v1704_v58 = vadd.f32 %v1703_v55, %v4288_v50  ;;  %v1872_v6 = vpop.f32.mrf.mxu1 }
 0x229   : > { %v1533_v20 = vadd.f32 %v1532_v13, %v1364_v38 }
 0x22a   : > { %v1873_v37 = vadd.f32 %v1872_v6, %v1704_v58 }
 0x22b   : > { %v2027_v28 = vpack.c.bf16 %v1533_v20, %v4011_v57 }
 0x22c   : > { %v2030_v44 = vpack.c.bf16 %v1873_v37, %v1873_v37 }
 0x22d   : > { %2155 = vst [vmem:[%s4304_s7 + $0x48] sm:$0xff] %v2027_v28  ;;  %v1365_v63 = vpop.f32.mrf.mxu2 }
 0x22e   : > { %2158 = vst [vmem:[%s4304_s7 + $0x5c] sm:$0xf] %v2030_v44  ;;  %v1366_v12 = vadd.f32 %v1365_v63, %v4300_v48 }
 0x22f   : > { %v1706_v41 = vpop.f32.mrf.mxu0 }
 0x230   : > { %v1534_v52 = vpop.f32.mrf.mxu3  ;;  %v1707_v47 = vadd.f32 %v1706_v41, %v4288_v50  ;;  %v1875_v40 = vpop.f32.mrf.mxu1 }
 0x231   : > { %v1535_v2 = vadd.f32 %v1534_v52, %v1366_v12 }
 0x232   : > { %v1876_v24 = vadd.f32 %v1875_v40, %v1707_v47  ;;  %1407 = vmatmul.bf16.gmra.mxu2 %v4032_v56  ;;  %1745 = vmatmul.bf16.gmra.mxu0 %v4032_v56 }
 0x233   : > { %v2029_v11 = vpack.c.bf16 %v1535_v2, %v4021_v25  ;;  %1914 = vmatmul.bf16.gmra.mxu1 %v4036_v15 }
 0x234   : > { %v2032_v57 = vpack.c.bf16 %v1876_v24, %v1876_v24 }
 0x235   : > { %1576 = vmatmul.bf16.gmra.mxu3 %v4036_v15  ;;  %2157 = vst [vmem:[%s4304_s7 + $0x54] sm:$0xff] %v2029_v11  ;;  %v1368_v0 = vpop.f32.mrf.mxu2 }
 0x236   : > { %2160 = vst [vmem:[%s4304_s7 + $0x68] sm:$0xf] %v2032_v57  ;;  %v1369_v27 = vadd.f32 %v1368_v0, %v4300_v48 }
 0x237   : > { %v1708_v16 = vpop.f32.mrf.mxu0 }
 0x238   : > { %v1537_v9 = vpop.f32.mrf.mxu3  ;;  %v1709_v45 = vadd.f32 %v1708_v16, %v4288_v50  ;;  %v1877_v18 = vpop.f32.mrf.mxu1 }
 0x239   : > { %v1538_v25 = vadd.f32 %v1537_v9, %v1369_v27 }
 0x23a   : > { %v1878_v56 = vadd.f32 %v1877_v18, %v1709_v45 }
 0x23b   : > { %v2031_v36 = vpack.c.bf16 %v1538_v25, %v4043_v49 }
 0x23c   : > { %v2034_v32 = vpack.c.bf16 %v1878_v56, %v1878_v56 }
 0x23d   : > { %2159 = vst [vmem:[%s4304_s7 + $0x60] sm:$0xff] %v2031_v36  ;;  %v1370_v15 = vpop.f32.mrf.mxu2 }
 0x23e   : > { %2162 = vst [vmem:[%s4304_s7 + $0x74] sm:$0xf] %v2034_v32  ;;  %v1371_v62 = vadd.f32 %v1370_v15, %v4300_v48  ;;  %v4953_v15 = vld [vmem:[#allocation66_spill] sm:$0xff] }
 0x23f   : > { %v1711_v13 = vpop.f32.mrf.mxu0 }
 0x240   : > { %v1539_v38 = vpop.f32.mrf.mxu3  ;;  %v1712_v20 = vadd.f32 %v1711_v13, %v4288_v50  ;;  %v1880_v58 = vpop.f32.mrf.mxu1 }
 0x241   : > { %v1540_v55 = vadd.f32 %v1539_v38, %v1371_v62 }
 0x242   : > { %v1881_v28 = vadd.f32 %v1880_v58, %v1712_v20  ;;  %1412 = vmatmul.bf16.gmra.mxu2 %v4072_v1  ;;  %1750 = vmatmul.bf16.gmra.mxu0 %v4072_v1 }
 0x243   : > { %v2033_v6 = vpack.c.bf16 %v1540_v55, %v4060_v34  ;;  %1919 = vmatmul.bf16.gmra.mxu1 %v4076_v43 }
 0x244   : > { %v2036_v49 = vpack.c.bf16 %v1881_v28, %v1881_v28 }
 0x245   : > { %1581 = vmatmul.bf16.gmra.mxu3 %v4076_v43  ;;  %2161 = vst [vmem:[%s4304_s7 + $0x6c] sm:$0xff] %v2033_v6  ;;  %v1373_v37 = vpop.f32.mrf.mxu2 }
 0x246   : > { %2164 = vst [vmem:[%s4304_s7 + $0x80] sm:$0xf] %v2036_v49  ;;  %v1374_v44 = vadd.f32 %v1373_v37, %v4300_v48  ;;  %v4954_v49 = vld [vmem:[#allocation68_spill] sm:$0xff] }
 0x247   : > { %v1713_v12 = vpop.f32.mrf.mxu0 }
 0x248   : > { %v1542_v63 = vpop.f32.mrf.mxu3  ;;  %v1714_v52 = vadd.f32 %v1713_v12, %v4288_v50  ;;  %v1882_v41 = vpop.f32.mrf.mxu1 }
 0x249   : > { %v1543_v34 = vadd.f32 %v1542_v63, %v1374_v44 }
 0x24a   : > { %v1883_v1 = vadd.f32 %v1882_v41, %v1714_v52 }
 0x24b   : > { %v2035_v2 = vpack.c.bf16 %v1543_v34, %v4083_v8 }
 0x24c   : > { %v2038_v47 = vpack.c.bf16 %v1883_v1, %v1883_v1 }
 0x24d   : > { %2163 = vst [vmem:[%s4304_s7 + $0x78] sm:$0xff] %v2035_v2  ;;  %v1375_v43 = vpop.f32.mrf.mxu2 }
 0x24e   : > { %2166 = vst [vmem:[%s4304_s7 + $0x8c] sm:$0xf] %v2038_v47  ;;  %v1376_v40 = vadd.f32 %v1375_v43, %v4300_v48 }
 0x24f   : > { %v1716_v24 = vpop.f32.mrf.mxu0 }
 0x250   : > { %v1544_v11 = vpop.f32.mrf.mxu3  ;;  %v1717_v0 = vadd.f32 %v1716_v24, %v4288_v50  ;;  %v1885_v27 = vpop.f32.mrf.mxu1 }
 0x251   : > { %v1545_v57 = vadd.f32 %v1544_v11, %v1376_v40 }
 0x252   : > { %v1886_v16 = vadd.f32 %v1885_v27, %v1717_v0  ;;  %1417 = vmatmul.bf16.gmra.mxu2 %v4104_v26  ;;  %1755 = vmatmul.bf16.gmra.mxu0 %v4104_v26 }
 0x253   : > { %v2037_v9 = vpack.c.bf16 %v1545_v57, %v4093_v51  ;;  %1924 = vmatmul.bf16.gmra.mxu1 %v4108_v33 }
 0x254   : > { %v2040_v8 = vpack.c.bf16 %v1886_v16, %v1886_v16 }
 0x255   : > { %1586 = vmatmul.bf16.gmra.mxu3 %v4108_v33  ;;  %2165 = vst [vmem:[%s4304_s7 + $0x84] sm:$0xff] %v2037_v9  ;;  %v1378_v25 = vpop.f32.mrf.mxu2 }
 0x256   : > { %2168 = vst [vmem:[%s4304_s7 + $0x98] sm:$0xf] %v2040_v8  ;;  %v1379_v45 = vadd.f32 %v1378_v25, %v4300_v48  ;;  %v4955_v25 = vld [vmem:[#allocation24_spill] sm:$0xff] }
 0x257   : > { %v1718_v36 = vpop.f32.mrf.mxu0 }
 0x258   : > { %v1547_v18 = vpop.f32.mrf.mxu3  ;;  %v1719_v56 = vadd.f32 %v1718_v36, %v4288_v50  ;;  %v1887_v32 = vpop.f32.mrf.mxu1 }
 0x259   : > { %v1548_v51 = vadd.f32 %v1547_v18, %v1379_v45 }
 0x25a   : > { %v1888_v26 = vadd.f32 %v1887_v32, %v1719_v56 }
 0x25b   : > { %v2039_v62 = vpack.c.bf16 %v1548_v51, %v4953_v15 }
 0x25c   : > { %v2042_v38 = vpack.c.bf16 %v1888_v26, %v1888_v26 }
 0x25d   : > { %2167 = vst [vmem:[%s4304_s7 + $0x90] sm:$0xff] %v2039_v62  ;;  %v1380_v33 = vpop.f32.mrf.mxu2 }
 0x25e   : > { %2170 = vst [vmem:[%s4304_s7 + $0xa4] sm:$0xf] %v2042_v38  ;;  %v1381_v13 = vadd.f32 %v1380_v33, %v4300_v48 }
 0x25f   : > { %v1721_v20 = vpop.f32.mrf.mxu0 }
 0x260   : > { %v1549_v55 = vpop.f32.mrf.mxu3  ;;  %v1722_v6 = vadd.f32 %v1721_v20, %v4288_v50  ;;  %v1890_v28 = vpop.f32.mrf.mxu1 }
 0x261   : > { %v1550_v58 = vadd.f32 %v1549_v55, %v1381_v13 }
 0x262   : > { %v1891_v44 = vadd.f32 %v1890_v28, %v1722_v6  ;;  %1422 = vmatmul.bf16.gmra.mxu2 %v4136_v3  ;;  %1760 = vmatmul.bf16.gmra.mxu0 %v4136_v3 }
 0x263   : > { %v2041_v37 = vpack.c.bf16 %v1550_v58, %v4954_v49  ;;  %1929 = vmatmul.bf16.gmra.mxu1 %v4140_v22 }
 0x264   : > { %v2044_v63 = vpack.c.bf16 %v1891_v44, %v1891_v44  ;;  %v4957_v44 = vld [vmem:[#allocation26_spill] sm:$0xff] }
 0x265   : > { %1591 = vmatmul.bf16.gmra.mxu3 %v4140_v22  ;;  %2169 = vst [vmem:[%s4304_s7 + $0x9c] sm:$0xff] %v2041_v37  ;;  %v1383_v12 = vpop.f32.mrf.mxu2 }
 0x266   : > { %2172 = vst [vmem:[%s4304_s7 + $0xb0] sm:$0xf] %v2044_v63  ;;  %v1384_v34 = vadd.f32 %v1383_v12, %v4300_v48 }
 0x267   : > { %v1723_v41 = vpop.f32.mrf.mxu0 }
 0x268   : > { %v1552_v52 = vpop.f32.mrf.mxu3  ;;  %v1724_v1 = vadd.f32 %v1723_v41, %v4288_v50  ;;  %v1892_v47 = vpop.f32.mrf.mxu1 }
 0x269   : > { %v1553_v2 = vadd.f32 %v1552_v52, %v1384_v34 }
 0x26a   : > { %v1893_v3 = vadd.f32 %v1892_v47, %v1724_v1 }
 0x26b   : > { %v2043_v43 = vpack.c.bf16 %v1553_v2, %v4147_v29  ;;  %v4956_v29 = vld [vmem:[#allocation25_spill] sm:$0xff] }
 0x26c   : > { %v2046_v40 = vpack.c.bf16 %v1893_v3, %v1893_v3 }
 0x26d   : > { %2171 = vst [vmem:[%s4304_s7 + $0xa8] sm:$0xff] %v2043_v43  ;;  %v1385_v22 = vpop.f32.mrf.mxu2 }
 0x26e   : > { %2174 = vst [vmem:[%s4304_s7 + $0xbc] sm:$0xf] %v2046_v40  ;;  %v1386_v11 = vadd.f32 %v1385_v22, %v4300_v48 }
 0x26f   : > { %v1726_v57 = vpop.f32.mrf.mxu0 }
 0x270   : > { %v1554_v24 = vpop.f32.mrf.mxu3  ;;  %v1727_v27 = vadd.f32 %v1726_v57, %v4288_v50  ;;  %v1895_v9 = vpop.f32.mrf.mxu1 }
 0x271   : > { %v1555_v0 = vadd.f32 %v1554_v24, %v1386_v11 }
 0x272   : > { %v1896_v8 = vadd.f32 %v1895_v9, %v1727_v27  ;;  %1427 = vmatmul.bf16.gmra.mxu2 %v4955_v25  ;;  %1765 = vmatmul.bf16.gmra.mxu0 %v4955_v25 }
 0x273   : > { %v2045_v16 = vpack.c.bf16 %v1555_v0, %v4157_v31  ;;  %1934 = vmatmul.bf16.gmra.mxu1 %v4956_v29 }
 0x274   : > { %v2048_v45 = vpack.c.bf16 %v1896_v8, %v1896_v8  ;;  %v4959_v8 = vld [vmem:[#allocation28_spill] sm:$0xff] }
 0x275   : > { %1596 = vmatmul.bf16.gmra.mxu3 %v4956_v29  ;;  %2173 = vst [vmem:[%s4304_s7 + $0xb4] sm:$0xff] %v2045_v16  ;;  %v1388_v18 = vpop.f32.mrf.mxu2 }
 0x276   : > { %2176 = vst [vmem:[%s4304_s7 + $0xc8] sm:$0xf] %v2048_v45  ;;  %v1389_v36 = vadd.f32 %v1388_v18, %v4300_v48 }
 0x277   : > { %v1728_v56 = vpop.f32.mrf.mxu0 }
 0x278   : > { %v1557_v51 = vpop.f32.mrf.mxu3  ;;  %v1729_v32 = vadd.f32 %v1728_v56, %v4288_v50  ;;  %v1897_v15 = vpop.f32.mrf.mxu1 }
 0x279   : > { %v1558_v31 = vadd.f32 %v1557_v51, %v1389_v36 }
 0x27a   : > { %v1898_v26 = vadd.f32 %v1897_v15, %v1729_v32 }
 0x27b   : > { %v2047_v62 = vpack.c.bf16 %v1558_v31, %v4163_v21  ;;  %v4958_v21 = vld [vmem:[#allocation27_spill] sm:$0xff] }
 0x27c   : > { %v2050_v38 = vpack.c.bf16 %v1898_v26, %v1898_v26 }
 0x27d   : > { %2175 = vst [vmem:[%s4304_s7 + $0xc0] sm:$0xff] %v2047_v62  ;;  %v1390_v33 = vpop.f32.mrf.mxu2 }
 0x27e   : > { %2178 = vst [vmem:[%s4304_s7 + $0xd4] sm:$0xf] %v2050_v38  ;;  %v1391_v13 = vadd.f32 %v1390_v33, %v4300_v48 }
 0x27f   : > { %v1731_v20 = vpop.f32.mrf.mxu0 }
 0x280   : > { %v1559_v55 = vpop.f32.mrf.mxu3  ;;  %v1732_v6 = vadd.f32 %v1731_v20, %v4288_v50  ;;  %v1900_v28 = vpop.f32.mrf.mxu1 }
 0x281   : > { %v1560_v58 = vadd.f32 %v1559_v55, %v1391_v13 }
 0x282   : > { %v1901_v37 = vadd.f32 %v1900_v28, %v1732_v6  ;;  %1432 = vmatmul.bf16.gmra.mxu2 %v4957_v44  ;;  %1770 = vmatmul.bf16.gmra.mxu0 %v4957_v44  ;;  %v4961_v28 = vld [vmem:[#allocation30_spill] sm:$0xff] }
 0x283   : > { %v2049_v49 = vpack.c.bf16 %v1560_v58, %v4173_v14  ;;  %1939 = vmatmul.bf16.gmra.mxu1 %v4958_v21 }
 0x284   : > { %v2052_v63 = vpack.c.bf16 %v1901_v37, %v1901_v37 }
 0x285   : > { %1601 = vmatmul.bf16.gmra.mxu3 %v4958_v21  ;;  %2177 = vst [vmem:[%s4304_s7 + $0xcc] sm:$0xff] %v2049_v49  ;;  %v1393_v12 = vpop.f32.mrf.mxu2 }
 0x286   : > { %2180 = vst [vmem:[%s4304_s7 + $0xe0] sm:$0xf] %v2052_v63  ;;  %v1394_v34 = vadd.f32 %v1393_v12, %v4300_v48 }
 0x287   : > { %v1733_v41 = vpop.f32.mrf.mxu0 }
 0x288   : > { %v1562_v52 = vpop.f32.mrf.mxu3  ;;  %v1734_v2 = vadd.f32 %v1733_v41, %v4288_v50  ;;  %v1902_v1 = vpop.f32.mrf.mxu1 }
 0x289   : > { %v1563_v14 = vadd.f32 %v1562_v52, %v1394_v34 }
 0x28a   : > { %v1903_v43 = vadd.f32 %v1902_v1, %v1734_v2 }
 0x28b   : > { %v2051_v47 = vpack.c.bf16 %v1563_v14, %v4179_v10  ;;  %v4960_v10 = vld [vmem:[#allocation29_spill] sm:$0xff] }
 0x28c   : > { %v2054_v3 = vpack.c.bf16 %v1903_v43, %v1903_v43 }
 0x28d   : > { %2179 = vst [vmem:[%s4304_s7 + $0xd8] sm:$0xff] %v2051_v47  ;;  %v1395_v40 = vpop.f32.mrf.mxu2 }
 0x28e   : > { %2182 = vst [vmem:[%s4304_s7 + $0xec] sm:$0xf] %v2054_v3  ;;  %v1396_v22 = vadd.f32 %v1395_v40, %v4300_v48 }
 0x28f   : > { %v1736_v24 = vpop.f32.mrf.mxu0 }
 0x290   : > { %v1564_v11 = vpop.f32.mrf.mxu3  ;;  %v1737_v0 = vadd.f32 %v1736_v24, %v4288_v50  ;;  %v1905_v27 = vpop.f32.mrf.mxu1 }
 0x291   : > { %v1565_v57 = vadd.f32 %v1564_v11, %v1396_v22 }
 0x292   : > { %v1906_v16 = vadd.f32 %v1905_v27, %v1737_v0  ;;  %1437 = vmatmul.bf16.gmra.mxu2 %v4959_v8  ;;  %1775 = vmatmul.bf16.gmra.mxu0 %v4959_v8 }
 0x293   : > { %v2053_v9 = vpack.c.bf16 %v1565_v57, %v4189_v5  ;;  %1944 = vmatmul.bf16.gmra.mxu1 %v4960_v10  ;;  %v4963_v57 = vld [vmem:[#allocation32_spill] sm:$0xff] }
 0x294   : > { %v2056_v25 = vpack.c.bf16 %v1906_v16, %v1906_v16 }
 0x295   : > { %1606 = vmatmul.bf16.gmra.mxu3 %v4960_v10  ;;  %2181 = vst [vmem:[%s4304_s7 + $0xe4] sm:$0xff] %v2053_v9  ;;  %v1398_v29 = vpop.f32.mrf.mxu2 }
 0x296   : > { %2184 = vst [vmem:[%s4304_s7 + $0xf8] sm:$0xf] %v2056_v25  ;;  %v1399_v45 = vadd.f32 %v1398_v29, %v4300_v48 }
 0x297   : > { %v1738_v36 = vpop.f32.mrf.mxu0 }
 0x298   : > { %v1567_v18 = vpop.f32.mrf.mxu3  ;;  %v1739_v51 = vadd.f32 %v1738_v36, %v4288_v50  ;;  %v1907_v56 = vpop.f32.mrf.mxu1 }
 0x299   : > { %v1568_v5 = vadd.f32 %v1567_v18, %v1399_v45 }
 0x29a   : > { %v1908_v32 = vadd.f32 %v1907_v56, %v1739_v51 }
 0x29b   : > { %v2055_v31 = vpack.c.bf16 %v1568_v5, %v4195_v17  ;;  %v4962_v17 = vld [vmem:[#allocation31_spill] sm:$0xff] }
 0x29c   : > { %v2058_v15 = vpack.c.bf16 %v1908_v32, %v1908_v32 }
 0x29d   : > { %2183 = vst [vmem:[%s4304_s7 + $0xf0] sm:$0xff] %v2055_v31  ;;  %v1400_v62 = vpop.f32.mrf.mxu2 }
 0x29e   : > { %2186 = vst [vmem:[%s4304_s7 + $0x104] sm:$0xf] %v2058_v15  ;;  %v1401_v26 = vadd.f32 %v1400_v62, %v4300_v48 }
 0x29f   : > { %v1741_v33 = vpop.f32.mrf.mxu0 }
 0x2a0   : > { %v1569_v38 = vpop.f32.mrf.mxu3  ;;  %v1742_v55 = vadd.f32 %v1741_v33, %v4288_v50  ;;  %v1910_v20 = vpop.f32.mrf.mxu1 }
 0x2a1   : > { %v1570_v13 = vadd.f32 %v1569_v38, %v1401_v26  ;;  %v4965_v38 = vld [vmem:[#allocation34_spill] sm:$0xff] }
 0x2a2   : > { %v1911_v6 = vadd.f32 %v1910_v20, %v1742_v55  ;;  %1442 = vmatmul.bf16.gmra.mxu2 %v4961_v28  ;;  %1780 = vmatmul.bf16.gmra.mxu0 %v4961_v28 }
 0x2a3   : > { %v2057_v58 = vpack.c.bf16 %v1570_v13, %v4205_v19  ;;  %1949 = vmatmul.bf16.gmra.mxu1 %v4962_v17 }
 0x2a4   : > { %v2060_v49 = vpack.c.bf16 %v1911_v6, %v1911_v6 }
 0x2a5   : > { %1611 = vmatmul.bf16.gmra.mxu3 %v4962_v17  ;;  %2185 = vst [vmem:[%s4304_s7 + $0xfc] sm:$0xff] %v2057_v58  ;;  %v1403_v37 = vpop.f32.mrf.mxu2 }
 0x2a6   : > { %2188 = vst [vmem:[%s4304_s7 + $0x110] sm:$0xf] %v2060_v49  ;;  %v1404_v44 = vadd.f32 %v1403_v37, %v4300_v48 }
 0x2a7   : > { %v1743_v63 = vpop.f32.mrf.mxu0 }
 0x2a8   : > { %v1572_v21 = vpop.f32.mrf.mxu3  ;;  %v1744_v12 = vadd.f32 %v1743_v63, %v4288_v50  ;;  %v1912_v34 = vpop.f32.mrf.mxu1 }
 0x2a9   : > { %v1573_v19 = vadd.f32 %v1572_v21, %v1404_v44 }
 0x2aa   : > { %v1913_v41 = vadd.f32 %v1912_v34, %v1744_v12 }
 0x2ab   : > { %v2059_v52 = vpack.c.bf16 %v1573_v19, %v4211_v61  ;;  %v4964_v61 = vld [vmem:[#allocation33_spill] sm:$0xff] }
 0x2ac   : > { %v2062_v14 = vpack.c.bf16 %v1913_v41, %v1913_v41 }
 0x2ad   : > { %2187 = vst [vmem:[%s4304_s7 + $0x108] sm:$0xff] %v2059_v52  ;;  %v1405_v2 = vpop.f32.mrf.mxu2 }
 0x2ae   : > { %2190 = vst [vmem:[%s4304_s7 + $0x11c] sm:$0xf] %v2062_v14  ;;  %v1406_v1 = vadd.f32 %v1405_v2, %v4300_v48  ;;  %v4967_v2 = vld [vmem:[#allocation36_spill] sm:$0xff] }
 0x2af   : > { %v1746_v43 = vpop.f32.mrf.mxu0 }
 0x2b0   : > { %v1574_v47 = vpop.f32.mrf.mxu3  ;;  %v1747_v40 = vadd.f32 %v1746_v43, %v4288_v50  ;;  %v1915_v22 = vpop.f32.mrf.mxu1 }
 0x2b1   : > { %v1575_v3 = vadd.f32 %v1574_v47, %v1406_v1 }
 0x2b2   : > { %v1916_v24 = vadd.f32 %v1915_v22, %v1747_v40  ;;  %1447 = vmatmul.bf16.gmra.mxu2 %v4963_v57  ;;  %1785 = vmatmul.bf16.gmra.mxu0 %v4963_v57 }
 0x2b3   : > { %v2061_v11 = vpack.c.bf16 %v1575_v3, %v4221_v35  ;;  %1954 = vmatmul.bf16.gmra.mxu1 %v4964_v61 }
 0x2b4   : > { %v2064_v0 = vpack.c.bf16 %v1916_v24, %v1916_v24 }
 0x2b5   : > { %1616 = vmatmul.bf16.gmra.mxu3 %v4964_v61  ;;  %2189 = vst [vmem:[%s4304_s7 + $0x114] sm:$0xff] %v2061_v11  ;;  %v1408_v27 = vpop.f32.mrf.mxu2 }
 0x2b6   : > { %2192 = vst [vmem:[%s4304_s7 + $0x128] sm:$0xf] %v2064_v0  ;;  %v1409_v9 = vadd.f32 %v1408_v27, %v4300_v48 }
 0x2b7   : > { %v1748_v8 = vpop.f32.mrf.mxu0 }
 0x2b8   : > { %v1577_v16 = vpop.f32.mrf.mxu3  ;;  %v1749_v10 = vadd.f32 %v1748_v8, %v4288_v50  ;;  %v1917_v25 = vpop.f32.mrf.mxu1 }
 0x2b9   : > { %v1578_v35 = vadd.f32 %v1577_v16, %v1409_v9 }
 0x2ba   : > { %v1918_v45 = vadd.f32 %v1917_v25, %v1749_v10 }
 0x2bb   : > { %v2063_v29 = vpack.c.bf16 %v1578_v35, %v4227_v59  ;;  %v4966_v59 = vld [vmem:[#allocation35_spill] sm:$0xff] }
 0x2bc   : > { %v2066_v18 = vpack.c.bf16 %v1918_v45, %v1918_v45  ;;  %v4969_v45 = vld [vmem:[#allocation38_spill] sm:$0xff] }
 0x2bd   : > { %2191 = vst [vmem:[%s4304_s7 + $0x120] sm:$0xff] %v2063_v29  ;;  %v1410_v36 = vpop.f32.mrf.mxu2 }
 0x2be   : > { %2194 = vst [vmem:[%s4304_s7 + $0x134] sm:$0xf] %v2066_v18  ;;  %v1411_v5 = vadd.f32 %v1410_v36, %v4300_v48 }
 0x2bf   : > { %v1751_v56 = vpop.f32.mrf.mxu0 }
 0x2c0   : > { %v1579_v51 = vpop.f32.mrf.mxu3  ;;  %v1752_v32 = vadd.f32 %v1751_v56, %v4288_v50  ;;  %v1920_v15 = vpop.f32.mrf.mxu1 }
 0x2c1   : > { %v1580_v31 = vadd.f32 %v1579_v51, %v1411_v5 }
 0x2c2   : > { %v1921_v26 = vadd.f32 %v1920_v15, %v1752_v32  ;;  %1452 = vmatmul.bf16.gmra.mxu2 %v4965_v38  ;;  %1790 = vmatmul.bf16.gmra.mxu0 %v4965_v38 }
 0x2c3   : > { %v2065_v62 = vpack.c.bf16 %v1580_v31, %v4237_v54  ;;  %1959 = vmatmul.bf16.gmra.mxu1 %v4966_v59 }
 0x2c4   : > { %v2068_v33 = vpack.c.bf16 %v1921_v26, %v1921_v26 }
 0x2c5   : > { %1621 = vmatmul.bf16.gmra.mxu3 %v4966_v59  ;;  %2193 = vst [vmem:[%s4304_s7 + $0x12c] sm:$0xff] %v2065_v62  ;;  %v1413_v13 = vpop.f32.mrf.mxu2 }
 0x2c6   : > { %2196 = vst [vmem:[%s4304_s7 + $0x140] sm:$0xf] %v2068_v33  ;;  %v1414_v55 = vadd.f32 %v1413_v13, %v4300_v48 }
 0x2c7   : > { %v1753_v58 = vpop.f32.mrf.mxu0 }
 0x2c8   : > { %v1582_v20 = vpop.f32.mrf.mxu3  ;;  %v1754_v6 = vadd.f32 %v1753_v58, %v4288_v50  ;;  %v1922_v28 = vpop.f32.mrf.mxu1 }
 0x2c9   : > { %v1583_v54 = vadd.f32 %v1582_v20, %v1414_v55 }
 0x2ca   : > { %v1923_v49 = vadd.f32 %v1922_v28, %v1754_v6  ;;  %v4971_v28 = vld [vmem:[#allocation40_spill] sm:$0xff] }
 0x2cb   : > { %v2067_v17 = vpack.c.bf16 %v1583_v54, %v4243_v46  ;;  %v4968_v46 = vld [vmem:[#allocation37_spill] sm:$0xff] }
 0x2cc   : > { %v2070_v37 = vpack.c.bf16 %v1923_v49, %v1923_v49 }
 0x2cd   : > { %2195 = vst [vmem:[%s4304_s7 + $0x138] sm:$0xff] %v2067_v17  ;;  %v1415_v44 = vpop.f32.mrf.mxu2 }
 0x2ce   : > { %2198 = vst [vmem:[%s4304_s7 + $0x14c] sm:$0xf] %v2070_v37  ;;  %v1416_v21 = vadd.f32 %v1415_v44, %v4300_v48 }
 0x2cf   : > { %v1756_v19 = vpop.f32.mrf.mxu0 }
 0x2d0   : > { %v1584_v63 = vpop.f32.mrf.mxu3  ;;  %v1757_v34 = vadd.f32 %v1756_v19, %v4288_v50  ;;  %v1925_v52 = vpop.f32.mrf.mxu1 }
 0x2d1   : > { %v1585_v12 = vadd.f32 %v1584_v63, %v1416_v21 }
 0x2d2   : > { %v1926_v14 = vadd.f32 %v1925_v52, %v1757_v34  ;;  %1457 = vmatmul.bf16.gmra.mxu2 %v4967_v2  ;;  %1795 = vmatmul.bf16.gmra.mxu0 %v4967_v2 }
 0x2d3   : > { %v2069_v41 = vpack.c.bf16 %v1585_v12, %v4253_v23  ;;  %1964 = vmatmul.bf16.gmra.mxu1 %v4968_v46  ;;  %v4973_v12 = vld [vmem:[#allocation42_spill] sm:$0xff] }
 0x2d4   : > { %v2072_v1 = vpack.c.bf16 %v1926_v14, %v1926_v14 }
 0x2d5   : > { %1626 = vmatmul.bf16.gmra.mxu3 %v4968_v46  ;;  %2197 = vst [vmem:[%s4304_s7 + $0x144] sm:$0xff] %v2069_v41  ;;  %v1418_v47 = vpop.f32.mrf.mxu2 }
 0x2d6   : > { %2200 = vst [vmem:[%s4304_s7 + $0x158] sm:$0xf] %v2072_v1  ;;  %v1419_v43 = vadd.f32 %v1418_v47, %v4300_v48 }
 0x2d7   : > { %v1758_v40 = vpop.f32.mrf.mxu0 }
 0x2d8   : > { %v1587_v3 = vpop.f32.mrf.mxu3  ;;  %v1759_v22 = vadd.f32 %v1758_v40, %v4288_v50  ;;  %v1927_v11 = vpop.f32.mrf.mxu1  ;;  %v4974_v40 = vld [vmem:[#allocation45_spill] sm:$0xff] }
 0x2d9   : > { %v1588_v23 = vadd.f32 %v1587_v3, %v1419_v43 }
 0x2da   : > { %v1928_v57 = vadd.f32 %v1927_v11, %v1759_v22  ;;  %v4975_v11 = vld [vmem:[#allocation43_spill] sm:$0xff] }
 0x2db   : > { %v2071_v24 = vpack.c.bf16 %v1588_v23, %v4259_v7  ;;  %v4970_v7 = vld [vmem:[#allocation39_spill] sm:$0xff] }
 0x2dc   : > { %v2074_v61 = vpack.c.bf16 %v1928_v57, %v1928_v57 }
 0x2dd   : > { %2199 = vst [vmem:[%s4304_s7 + $0x150] sm:$0xff] %v2071_v24  ;;  %v1420_v0 = vpop.f32.mrf.mxu2  ;;  %v4976_v24 = vld [vmem:[#allocation44_spill] sm:$0xff] }
 0x2de   : > { %2202 = vst [vmem:[%s4304_s7 + $0x164] sm:$0xf] %v2074_v61  ;;  %v1421_v27 = vadd.f32 %v1420_v0, %v4300_v48 }
 0x2df   : > { %v1761_v16 = vpop.f32.mrf.mxu0 }
 0x2e0   : > { %v1589_v9 = vpop.f32.mrf.mxu3  ;;  %v1762_v35 = vadd.f32 %v1761_v16, %v4288_v50  ;;  %v1930_v10 = vpop.f32.mrf.mxu1 }
 0x2e1   : > { %v1590_v8 = vadd.f32 %v1589_v9, %v1421_v27 }
 0x2e2   : > { %v1931_v29 = vadd.f32 %v1930_v10, %v1762_v35  ;;  %1462 = vmatmul.bf16.gmra.mxu2 %v4969_v45  ;;  %1800 = vmatmul.bf16.gmra.mxu0 %v4969_v45  ;;  %v4977_v10 = vld [vmem:[#allocation46_spill] sm:$0xff] }
 0x2e3   : > { %v2073_v25 = vpack.c.bf16 %v1590_v8, %v4269_v4  ;;  %1969 = vmatmul.bf16.gmra.mxu1 %v4970_v7 }
 0x2e4   : > { %v2076_v18 = vpack.c.bf16 %v1931_v29, %v1931_v29 }
 0x2e5   : > { %1631 = vmatmul.bf16.gmra.mxu3 %v4970_v7  ;;  %2201 = vst [vmem:[%s4304_s7 + $0x15c] sm:$0xff] %v2073_v25  ;;  %v1423_v36 = vpop.f32.mrf.mxu2 }
 0x2e6   : > { %2204 = vst [vmem:[%s4304_s7 + $0x170] sm:$0xf] %v2076_v18  ;;  %v1424_v5 = vadd.f32 %v1423_v36, %v4300_v48 }
 0x2e7   : > { %v1763_v56 = vpop.f32.mrf.mxu0 }
 0x2e8   : > { %v1592_v51 = vpop.f32.mrf.mxu3  ;;  %v1764_v31 = vadd.f32 %v1763_v56, %v4288_v50  ;;  %v1932_v32 = vpop.f32.mrf.mxu1 }
 0x2e9   : > { %v1593_v4 = vadd.f32 %v1592_v51, %v1424_v5 }
 0x2ea   : > { %v1933_v62 = vadd.f32 %v1932_v32, %v1764_v31  ;;  %v4978_v31 = vld [vmem:[#allocation49_spill] sm:$0xff] }
 0x2eb   : > { %v2075_v15 = vpack.c.bf16 %v1593_v4, %v4275_v30  ;;  %v4972_v30 = vld [vmem:[#allocation41_spill] sm:$0xff] }
 0x2ec   : > { %v2078_v26 = vpack.c.bf16 %v1933_v62, %v1933_v62  ;;  %v4979_v62 = vld [vmem:[#allocation47_spill] sm:$0xff] }
 0x2ed   : > { %2203 = vst [vmem:[%s4304_s7 + $0x168] sm:$0xff] %v2075_v15  ;;  %v1425_v38 = vpop.f32.mrf.mxu2 }
 0x2ee   : > { %2206 = vst [vmem:[%s4304_s7 + $0x17c] sm:$0xf] %v2078_v26  ;;  %v1426_v59 = vadd.f32 %v1425_v38, %v4300_v48  ;;  %v4980_v26 = vld [vmem:[#allocation48_spill] sm:$0xff] }
 0x2ef   : > { %v1766_v13 = vpop.f32.mrf.mxu0 }
 0x2f0   : > { %v1594_v33 = vpop.f32.mrf.mxu3  ;;  %v1767_v20 = vadd.f32 %v1766_v13, %v4288_v50  ;;  %v1935_v58 = vpop.f32.mrf.mxu1 }
 0x2f1   : > { %v1595_v55 = vadd.f32 %v1594_v33, %v1426_v59 }
 0x2f2   : > { %v1936_v6 = vadd.f32 %v1935_v58, %v1767_v20  ;;  %1467 = vmatmul.bf16.gmra.mxu2 %v4971_v28  ;;  %1805 = vmatmul.bf16.gmra.mxu0 %v4971_v28 }
 0x2f3   : > { %v2077_v54 = vpack.c.bf16 %v1595_v55, %v4285_v60  ;;  %1974 = vmatmul.bf16.gmra.mxu1 %v4972_v30 }
 0x2f4   : > { %v2080_v17 = vpack.c.bf16 %v1936_v6, %v1936_v6  ;;  %v4981_v6 = vld [vmem:[#allocation50_spill] sm:$0xff] }
 0x2f5   : > { %1636 = vmatmul.bf16.gmra.mxu3 %v4972_v30  ;;  %2205 = vst [vmem:[%s4304_s7 + $0x174] sm:$0xff] %v2077_v54  ;;  %v1428_v49 = vpop.f32.mrf.mxu2 }
 0x2f6   : > { %2208 = vst [vmem:[%s4304_s7 + $0x188] sm:$0xf] %v2080_v17  ;;  %v1429_v37 = vadd.f32 %v1428_v49, %v4300_v48 }
 0x2f7   : > { %v1768_v21 = vpop.f32.mrf.mxu0 }
 0x2f8   : > { %v1597_v44 = vpop.f32.mrf.mxu3  ;;  %v1769_v63 = vadd.f32 %v1768_v21, %v4288_v50  ;;  %v1937_v19 = vpop.f32.mrf.mxu1 }
 0x2f9   : > { %v1598_v60 = vadd.f32 %v1597_v44, %v1429_v37 }
 0x2fa   : > { %v1938_v52 = vadd.f32 %v1937_v19, %v1769_v63 }
 0x2fb   : > { %v2079_v34 = vpack.c.bf16 %v1598_v60, %v4973_v12  ;;  %v4982_v12 = vld [vmem:[#allocation53_spill] sm:$0xff] }
 0x2fc   : > { %v2082_v41 = vpack.c.bf16 %v1938_v52, %v1938_v52 }
 0x2fd   : > { %2207 = vst [vmem:[%s4304_s7 + $0x180] sm:$0xff] %v2079_v34  ;;  %v1430_v14 = vpop.f32.mrf.mxu2 }
 0x2fe   : > { %2210 = vst [vmem:[%s4304_s7 + $0x194] sm:$0xf] %v2082_v41  ;;  %v1431_v2 = vadd.f32 %v1430_v14, %v4300_v48  ;;  %v4983_v41 = vld [vmem:[#allocation51_spill] sm:$0xff]  ;;  %v4984_v14 = vld [vmem:[#allocation52_spill] sm:$0xff] }
 0x2ff   : > { %v1771_v1 = vpop.f32.mrf.mxu0 }
 0x300   : > { %v1599_v46 = vpop.f32.mrf.mxu3  ;;  %v1772_v43 = vadd.f32 %v1771_v1, %v4288_v50  ;;  %v1940_v3 = vpop.f32.mrf.mxu1 }
 0x301   : > { %v1600_v47 = vadd.f32 %v1599_v46, %v1431_v2 }
 0x302   : > { %v1941_v22 = vadd.f32 %v1940_v3, %v1772_v43  ;;  %1472 = vmatmul.bf16.gmra.mxu2 %v4975_v11  ;;  %1810 = vmatmul.bf16.gmra.mxu0 %v4975_v11 }
 0x303   : > { %v2081_v23 = vpack.c.bf16 %v1600_v47, %v4974_v40  ;;  %1979 = vmatmul.bf16.gmra.mxu1 %v4976_v24 }
 0x304   : > { %v2084_v57 = vpack.c.bf16 %v1941_v22, %v1941_v22  ;;  %v4985_v22 = vld [vmem:[#allocation54_spill] sm:$0xff] }
 0x305   : > { %1641 = vmatmul.bf16.gmra.mxu3 %v4976_v24  ;;  %2209 = vst [vmem:[%s4304_s7 + $0x18c] sm:$0xff] %v2081_v23  ;;  %v1433_v61 = vpop.f32.mrf.mxu2 }
 0x306   : > { %2212 = vst [vmem:[%s4304_s7 + $0x1a0] sm:$0xf] %v2084_v57  ;;  %v1434_v0 = vadd.f32 %v1433_v61, %v4300_v48 }
 0x307   : > { %v1773_v9 = vpop.f32.mrf.mxu0 }
 0x308   : > { %v1602_v27 = vpop.f32.mrf.mxu3  ;;  %v1774_v8 = vadd.f32 %v1773_v9, %v4288_v50  ;;  %v1942_v35 = vpop.f32.mrf.mxu1 }
 0x309   : > { %v1603_v16 = vadd.f32 %v1602_v27, %v1434_v0 }
 0x30a   : > { %v1943_v29 = vadd.f32 %v1942_v35, %v1774_v8 }
 0x30b   : > { %v2083_v25 = vpack.c.bf16 %v1603_v16, %v4977_v10  ;;  %v4986_v10 = vld [vmem:[#allocation57_spill] sm:$0xff] }
 0x30c   : > { %v2086_v45 = vpack.c.bf16 %v1943_v29, %v1943_v29 }
 0x30d   : > { %2211 = vst [vmem:[%s4304_s7 + $0x198] sm:$0xff] %v2083_v25  ;;  %v1435_v7 = vpop.f32.mrf.mxu2 }
 0x30e   : > { %2214 = vst [vmem:[%s4304_s7 + $0x1ac] sm:$0xf] %v2086_v45  ;;  %v1436_v18 = vadd.f32 %v1435_v7, %v4300_v48  ;;  %v4987_v45 = vld [vmem:[#allocation55_spill] sm:$0xff]  ;;  %v4988_v7 = vld [vmem:[#allocation56_spill] sm:$0xff] }
 0x30f   : > { %v1776_v5 = vpop.f32.mrf.mxu0 }
 0x310   : > { %v1604_v36 = vpop.f32.mrf.mxu3  ;;  %v1777_v56 = vadd.f32 %v1776_v5, %v4288_v50  ;;  %v1945_v4 = vpop.f32.mrf.mxu1 }
 0x311   : > { %v1605_v51 = vadd.f32 %v1604_v36, %v1436_v18 }
 0x312   : > { %v1946_v15 = vadd.f32 %v1945_v4, %v1777_v56  ;;  %1477 = vmatmul.bf16.gmra.mxu2 %v4979_v62  ;;  %1815 = vmatmul.bf16.gmra.mxu0 %v4979_v62 }
 0x313   : > { %v2085_v32 = vpack.c.bf16 %v1605_v51, %v4978_v31  ;;  %1984 = vmatmul.bf16.gmra.mxu1 %v4980_v26 }
 0x314   : > { %v2088_v38 = vpack.c.bf16 %v1946_v15, %v1946_v15  ;;  %v4989_v15 = vld [vmem:[#allocation58_spill] sm:$0xff] }
 0x315   : > { %1646 = vmatmul.bf16.gmra.mxu3 %v4980_v26  ;;  %2213 = vst [vmem:[%s4304_s7 + $0x1a4] sm:$0xff] %v2085_v32  ;;  %v1438_v59 = vpop.f32.mrf.mxu2 }
 0x316   : > { %2216 = vst [vmem:[%s4304_s7 + $0x1b8] sm:$0xf] %v2088_v38  ;;  %v1439_v33 = vadd.f32 %v1438_v59, %v4300_v48 }
 0x317   : > { %v1778_v55 = vpop.f32.mrf.mxu0 }
 0x318   : > { %v1607_v13 = vpop.f32.mrf.mxu3  ;;  %v1779_v58 = vadd.f32 %v1778_v55, %v4288_v50  ;;  %v1947_v54 = vpop.f32.mrf.mxu1 }
 0x319   : > { %v1608_v20 = vadd.f32 %v1607_v13, %v1439_v33 }
 0x31a   : > { %v1948_v30 = vadd.f32 %v1947_v54, %v1779_v58 }
 0x31b   : > { %v2087_v28 = vpack.c.bf16 %v1608_v20, %v4981_v6  ;;  %v4990_v6 = vld [vmem:[#allocation61_spill] sm:$0xff] }
 0x31c   : > { %v2090_v17 = vpack.c.bf16 %v1948_v30, %v1948_v30 }
 0x31d   : > { %2215 = vst [vmem:[%s4304_s7 + $0x1b0] sm:$0xff] %v2087_v28  ;;  %v1440_v49 = vpop.f32.mrf.mxu2 }
 0x31e   : > { %2218 = vst [vmem:[%s4304_s7 + $0x1c4] sm:$0xf] %v2090_v17  ;;  %v1441_v37 = vadd.f32 %v1440_v49, %v4300_v48  ;;  %v4991_v17 = vld [vmem:[#allocation59_spill] sm:$0xff]  ;;  %v4992_v49 = vld [vmem:[#allocation60_spill] sm:$0xff] }
 0x31f   : > { %v1781_v21 = vpop.f32.mrf.mxu0 }
 0x320   : > { %v1609_v44 = vpop.f32.mrf.mxu3  ;;  %v1782_v63 = vadd.f32 %v1781_v21, %v4288_v50  ;;  %v1950_v19 = vpop.f32.mrf.mxu1 }
 0x321   : > { %v1610_v60 = vadd.f32 %v1609_v44, %v1441_v37 }
 0x322   : > { %v1951_v52 = vadd.f32 %v1950_v19, %v1782_v63  ;;  %1482 = vmatmul.bf16.gmra.mxu2 %v4983_v41  ;;  %1820 = vmatmul.bf16.gmra.mxu0 %v4983_v41 }
 0x323   : > { %v2089_v34 = vpack.c.bf16 %v1610_v60, %v4982_v12  ;;  %1989 = vmatmul.bf16.gmra.mxu1 %v4984_v14 }
 0x324   : > { %v2092_v2 = vpack.c.bf16 %v1951_v52, %v1951_v52  ;;  %v4993_v52 = vld [vmem:[#allocation62_spill] sm:$0xff] }
 0x325   : > { %1651 = vmatmul.bf16.gmra.mxu3 %v4984_v14  ;;  %2217 = vst [vmem:[%s4304_s7 + $0x1bc] sm:$0xff] %v2089_v34  ;;  %v1443_v46 = vpop.f32.mrf.mxu2 }
 0x326   : > { %2220 = vst [vmem:[%s4304_s7 + $0x1d0] sm:$0xf] %v2092_v2  ;;  %v1444_v1 = vadd.f32 %v1443_v46, %v4300_v48 }
 0x327   : > { %v1783_v43 = vpop.f32.mrf.mxu0 }
 0x328   : > { %v1612_v47 = vpop.f32.mrf.mxu3  ;;  %v1784_v40 = vadd.f32 %v1783_v43, %v4288_v50  ;;  %v1952_v23 = vpop.f32.mrf.mxu1 }
 0x329   : > { %v1613_v3 = vadd.f32 %v1612_v47, %v1444_v1 }
 0x32a   : > { %v1953_v24 = vadd.f32 %v1952_v23, %v1784_v40 }
 0x32b   : > { %v2091_v11 = vpack.c.bf16 %v1613_v3, %v4985_v22  ;;  %v4994_v22 = vld [vmem:[#allocation65_spill] sm:$0xff] }
 0x32c   : > { %v2094_v57 = vpack.c.bf16 %v1953_v24, %v1953_v24 }
 0x32d   : > { %2219 = vst [vmem:[%s4304_s7 + $0x1c8] sm:$0xff] %v2091_v11  ;;  %v1445_v61 = vpop.f32.mrf.mxu2 }
 0x32e   : > { %2222 = vst [vmem:[%s4304_s7 + $0x1dc] sm:$0xf] %v2094_v57  ;;  %v1446_v0 = vadd.f32 %v1445_v61, %v4300_v48  ;;  %v4995_v57 = vld [vmem:[#allocation63_spill] sm:$0xff]  ;;  %v4996_v61 = vld [vmem:[#allocation64_spill] sm:$0xff] }
 0x32f   : > { %v1786_v9 = vpop.f32.mrf.mxu0 }
 0x330   : > { %v1614_v27 = vpop.f32.mrf.mxu3  ;;  %v1787_v8 = vadd.f32 %v1786_v9, %v4288_v50  ;;  %v1955_v35 = vpop.f32.mrf.mxu1 }
 0x331   : > { %v1615_v16 = vadd.f32 %v1614_v27, %v1446_v0 }
 0x332   : > { %v1956_v29 = vadd.f32 %v1955_v35, %v1787_v8  ;;  %1487 = vmatmul.bf16.gmra.mxu2 %v4987_v45  ;;  %1825 = vmatmul.bf16.gmra.mxu0 %v4987_v45 }
 0x333   : > { %v2093_v25 = vpack.c.bf16 %v1615_v16, %v4986_v10  ;;  %1994 = vmatmul.bf16.gmra.mxu1 %v4988_v7 }
 0x334   : > { %v2096_v18 = vpack.c.bf16 %v1956_v29, %v1956_v29  ;;  %v4997_v29 = vld [vmem:[#allocation67_spill] sm:$0xff] }
 0x335   : > { %1656 = vmatmul.bf16.gmra.mxu3 %v4988_v7  ;;  %2221 = vst [vmem:[%s4304_s7 + $0x1d4] sm:$0xff] %v2093_v25  ;;  %v1448_v36 = vpop.f32.mrf.mxu2 }
 0x336   : > { %2224 = vst [vmem:[%s4304_s7 + $0x1e8] sm:$0xf] %v2096_v18  ;;  %v1449_v5 = vadd.f32 %v1448_v36, %v4300_v48 }
 0x337   : > { %v1788_v56 = vpop.f32.mrf.mxu0 }
 0x338   : > { %v1617_v51 = vpop.f32.mrf.mxu3  ;;  %v1789_v31 = vadd.f32 %v1788_v56, %v4288_v50  ;;  %v1957_v32 = vpop.f32.mrf.mxu1 }
 0x339   : > { %v1618_v4 = vadd.f32 %v1617_v51, %v1449_v5 }
 0x33a   : > { %v1958_v26 = vadd.f32 %v1957_v32, %v1789_v31 }
 0x33b   : > { %v2095_v62 = vpack.c.bf16 %v1618_v4, %v4989_v15 }
 0x33c   : > { %v2098_v38 = vpack.c.bf16 %v1958_v26, %v1958_v26  ;;  %v4998_v26 = vld [vmem:[#allocation69_spill] sm:$0xff] }
 0x33d   : > { %2223 = vst [vmem:[%s4304_s7 + $0x1e0] sm:$0xff] %v2095_v62  ;;  %v1450_v59 = vpop.f32.mrf.mxu2 }
 0x33e   : > { %2226 = vst [vmem:[%s4304_s7 + $0x1f4] sm:$0xf] %v2098_v38  ;;  %v1451_v33 = vadd.f32 %v1450_v59, %v4300_v48 }
 0x33f   : > { %v1791_v55 = vpop.f32.mrf.mxu0 }
 0x340   : > { %v1619_v13 = vpop.f32.mrf.mxu3  ;;  %v1792_v58 = vadd.f32 %v1791_v55, %v4288_v50  ;;  %v1960_v54 = vpop.f32.mrf.mxu1 }
 0x341   : > { %v1620_v20 = vadd.f32 %v1619_v13, %v1451_v33 }
 0x342   : > { %v1961_v30 = vadd.f32 %v1960_v54, %v1792_v58  ;;  %1492 = vmatmul.bf16.gmra.mxu2 %v4991_v17  ;;  %1830 = vmatmul.bf16.gmra.mxu0 %v4991_v17  ;;  %v4999_v54 = vld [vmem:[#allocation70_spill] sm:$0xff] }
 0x343   : > { %v2097_v28 = vpack.c.bf16 %v1620_v20, %v4990_v6  ;;  %1999 = vmatmul.bf16.gmra.mxu1 %v4992_v49 }
 0x344   : > { %v2100_v37 = vpack.c.bf16 %v1961_v30, %v1961_v30 }
 0x345   : > { %1661 = vmatmul.bf16.gmra.mxu3 %v4992_v49  ;;  %2225 = vst [vmem:[%s4304_s7 + $0x1ec] sm:$0xff] %v2097_v28  ;;  %v1453_v44 = vpop.f32.mrf.mxu2 }
 0x346   : > { %2228 = vst [vmem:[%s4304_s7 + $0x200] sm:$0xf] %v2100_v37  ;;  %v1454_v21 = vadd.f32 %v1453_v44, %v4300_v48 }
 0x347   : > { %v1793_v63 = vpop.f32.mrf.mxu0 }
 0x348   : > { %v1622_v60 = vpop.f32.mrf.mxu3  ;;  %v1794_v12 = vadd.f32 %v1793_v63, %v4288_v50  ;;  %v1962_v34 = vpop.f32.mrf.mxu1  ;;  %v5000_v63 = vld [vmem:[#allocation71_spill] sm:$0xff] }
 0x349   : > { %v1623_v19 = vadd.f32 %v1622_v60, %v1454_v21 }
 0x34a   : > { %v1963_v14 = vadd.f32 %v1962_v34, %v1794_v12 }
 0x34b   : > { %v2099_v41 = vpack.c.bf16 %v1623_v19, %v4993_v52 }
 0x34c   : > { %v2102_v2 = vpack.c.bf16 %v1963_v14, %v1963_v14 }
 0x34d   : > { %2227 = vst [vmem:[%s4304_s7 + $0x1f8] sm:$0xff] %v2099_v41  ;;  %v1455_v46 = vpop.f32.mrf.mxu2 }
 0x34e   : > { %2230 = vst [vmem:[%s4304_s7 + $0x20c] sm:$0xf] %v2102_v2  ;;  %v1456_v1 = vadd.f32 %v1455_v46, %v4300_v48 }
 0x34f   : > { %v1796_v43 = vpop.f32.mrf.mxu0 }
 0x350   : > { %v1624_v47 = vpop.f32.mrf.mxu3  ;;  %v1797_v40 = vadd.f32 %v1796_v43, %v4288_v50  ;;  %v1965_v23 = vpop.f32.mrf.mxu1  ;;  %v5001_v43 = vld [vmem:[#allocation72_spill] sm:$0xff] }
 0x351   : > { %v1625_v3 = vadd.f32 %v1624_v47, %v1456_v1 }
 0x352   : > { %v1966_v24 = vadd.f32 %v1965_v23, %v1797_v40  ;;  %1497 = vmatmul.bf16.gmra.mxu2 %v4995_v57  ;;  %1835 = vmatmul.bf16.gmra.mxu0 %v4995_v57 }
 0x353   : > { %v2101_v11 = vpack.c.bf16 %v1625_v3, %v4994_v22  ;;  %2004 = vmatmul.bf16.gmra.mxu1 %v4996_v61 }
 0x354   : > { %v2104_v0 = vpack.c.bf16 %v1966_v24, %v1966_v24 }
 0x355   : > { %1666 = vmatmul.bf16.gmra.mxu3 %v4996_v61  ;;  %2229 = vst [vmem:[%s4304_s7 + $0x204] sm:$0xff] %v2101_v11  ;;  %v1458_v27 = vpop.f32.mrf.mxu2 }
 0x356   : > { %2232 = vst [vmem:[%s4304_s7 + $0x218] sm:$0xf] %v2104_v0  ;;  %v1459_v9 = vadd.f32 %v1458_v27, %v4300_v48 }
 0x357   : > { %v1798_v8 = vpop.f32.mrf.mxu0 }
 0x358   : > { %v1627_v16 = vpop.f32.mrf.mxu3  ;;  %v1799_v10 = vadd.f32 %v1798_v8, %v4288_v50  ;;  %v1967_v25 = vpop.f32.mrf.mxu1 }
 0x359   : > { %v1628_v35 = vadd.f32 %v1627_v16, %v1459_v9  ;;  %v5002_v9 = vld [vmem:[#allocation73_spill] sm:$0xff] }
 0x35a   : > { %v1968_v7 = vadd.f32 %v1967_v25, %v1799_v10 }
 0x35b   : > { %v2103_v45 = vpack.c.bf16 %v1628_v35, %v4997_v29 }
 0x35c   : > { %v2106_v18 = vpack.c.bf16 %v1968_v7, %v1968_v7 }
 0x35d   : > { %2231 = vst [vmem:[%s4304_s7 + $0x210] sm:$0xff] %v2103_v45  ;;  %v1460_v36 = vpop.f32.mrf.mxu2 }
 0x35e   : > { %2234 = vst [vmem:[%s4304_s7 + $0x224] sm:$0xf] %v2106_v18  ;;  %v1461_v5 = vadd.f32 %v1460_v36, %v4300_v48 }
 0x35f   : > { %v1801_v56 = vpop.f32.mrf.mxu0 }
 0x360   : > { %v1629_v51 = vpop.f32.mrf.mxu3  ;;  %v1802_v31 = vadd.f32 %v1801_v56, %v4288_v50  ;;  %v1970_v32 = vpop.f32.mrf.mxu1 }
 0x361   : > { %v1630_v4 = vadd.f32 %v1629_v51, %v1461_v5  ;;  %v5003_v5 = vld [vmem:[#allocation74_spill] sm:$0xff] }
 0x362   : > { %v1971_v62 = vadd.f32 %v1970_v32, %v1802_v31  ;;  %1502 = vmatmul.bf16.gmra.mxu2 %v4138_v39  ;;  %1840 = vmatmul.bf16.gmra.mxu0 %v4138_v39 }
 0x363   : > { %v2105_v15 = vpack.c.bf16 %v1630_v4, %v4144_v53  ;;  %2009 = vmatmul.bf16.gmra.mxu1 %v4998_v26 }
 0x364   : > { %v2108_v38 = vpack.c.bf16 %v1971_v62, %v1971_v62 }
 0x365   : > { %1671 = vmatmul.bf16.gmra.mxu3 %v4998_v26  ;;  %2233 = vst [vmem:[%s4304_s7 + $0x21c] sm:$0xff] %v2105_v15  ;;  %v1463_v59 = vpop.f32.mrf.mxu2 }
 0x366   : > { %2236 = vst [vmem:[%s4304_s7 + $0x230] sm:$0xf] %v2108_v38  ;;  %v1464_v33 = vadd.f32 %v1463_v59, %v4300_v48 }
 0x367   : > { %v1803_v55 = vpop.f32.mrf.mxu0 }
 0x368   : > { %v1632_v13 = vpop.f32.mrf.mxu3  ;;  %v1804_v20 = vadd.f32 %v1803_v55, %v4288_v50  ;;  %v1972_v58 = vpop.f32.mrf.mxu1 }
 0x369   : > { %v1633_v53 = vadd.f32 %v1632_v13, %v1464_v33  ;;  %v5004_v33 = vld [vmem:[#allocation75_spill] sm:$0xff] }
 0x36a   : > { %v1973_v6 = vadd.f32 %v1972_v58, %v1804_v20 }
 0x36b   : > { %v2107_v39 = vpack.c.bf16 %v1633_v53, %v4999_v54 }
 0x36c   : > { %v2110_v28 = vpack.c.bf16 %v1973_v6, %v1973_v6 }
 0x36d   : > { %2235 = vst [vmem:[%s4304_s7 + $0x228] sm:$0xff] %v2107_v39  ;;  %v1465_v30 = vpop.f32.mrf.mxu2 }
 0x36e   : > { %2238 = vst [vmem:[%s4304_s7 + $0x23c] sm:$0xf] %v2110_v28  ;;  %v1466_v17 = vadd.f32 %v1465_v30, %v4300_v48 }
 0x36f   : > { %v1806_v37 = vpop.f32.mrf.mxu0 }
 0x370   : > { %v1634_v49 = vpop.f32.mrf.mxu3  ;;  %v1807_v21 = vadd.f32 %v1806_v37, %v4288_v50  ;;  %v1975_v60 = vpop.f32.mrf.mxu1 }
 0x371   : > { %v1635_v44 = vadd.f32 %v1634_v49, %v1466_v17  ;;  %v5005_v17 = vld [vmem:[#allocation76_spill] sm:$0xff] }
 0x372   : > { %v1976_v12 = vadd.f32 %v1975_v60, %v1807_v21 }
 0x373   : > { %v2109_v19 = vpack.c.bf16 %v1635_v44, %v5000_v63 }
 0x374   : > { %v2112_v34 = vpack.c.bf16 %v1976_v12, %v1976_v12 }
 0x375   : > { %2237 = vst [vmem:[%s4304_s7 + $0x234] sm:$0xff] %v2109_v19  ;;  %v1468_v52 = vpop.f32.mrf.mxu2 }
 0x376   : > { %2240 = vst [vmem:[%s4304_s7 + $0x248] sm:$0xf] %v2112_v34  ;;  %v1469_v41 = vadd.f32 %v1468_v52, %v4300_v48 }
 0x377   : > { %v1808_v2 = vpop.f32.mrf.mxu0 }
 0x378   : > { %v1637_v14 = vpop.f32.mrf.mxu3  ;;  %v1809_v1 = vadd.f32 %v1808_v2, %v4288_v50  ;;  %v1977_v47 = vpop.f32.mrf.mxu1 }
 0x379   : > { %v1638_v46 = vadd.f32 %v1637_v14, %v1469_v41  ;;  %v5006_v41 = vld [vmem:[#allocation77_spill] sm:$0xff] }
 0x37a   : > { %v1978_v40 = vadd.f32 %v1977_v47, %v1809_v1 }
 0x37b   : > { %v2111_v3 = vpack.c.bf16 %v1638_v46, %v5001_v43 }
 0x37c   : > { %v2114_v23 = vpack.c.bf16 %v1978_v40, %v1978_v40 }
 0x37d   : > { %2239 = vst [vmem:[%s4304_s7 + $0x240] sm:$0xff] %v2111_v3  ;;  %v1470_v22 = vpop.f32.mrf.mxu2 }
 0x37e   : > { %2242 = vst [vmem:[%s4304_s7 + $0x254] sm:$0xf] %v2114_v23  ;;  %v1471_v11 = vadd.f32 %v1470_v22, %v4300_v48 }
 0x37f   : > { %v1811_v57 = vpop.f32.mrf.mxu0 }
 0x380   : > { %v1639_v24 = vpop.f32.mrf.mxu3  ;;  %v1812_v0 = vadd.f32 %v1811_v57, %v4288_v50  ;;  %v1980_v27 = vpop.f32.mrf.mxu1 }
 0x381   : > { %v1640_v61 = vadd.f32 %v1639_v24, %v1471_v11  ;;  %v5007_v11 = vld [vmem:[#allocation78_spill] sm:$0xff] }
 0x382   : > { %v1981_v8 = vadd.f32 %v1980_v27, %v1812_v0 }
 0x383   : > { %v2113_v16 = vpack.c.bf16 %v1640_v61, %v5002_v9 }
 0x384   : > { %v2116_v35 = vpack.c.bf16 %v1981_v8, %v1981_v8 }
 0x385   : > { %2241 = vst [vmem:[%s4304_s7 + $0x24c] sm:$0xff] %v2113_v16  ;;  %v1473_v10 = vpop.f32.mrf.mxu2 }
 0x386   : > { %2244 = vst [vmem:[%s4304_s7 + $0x260] sm:$0xf] %v2116_v35  ;;  %v1474_v25 = vadd.f32 %v1473_v10, %v4300_v48 }
 0x387   : > { %v1813_v45 = vpop.f32.mrf.mxu0 }
 0x388   : > { %v1642_v29 = vpop.f32.mrf.mxu3  ;;  %v1814_v18 = vadd.f32 %v1813_v45, %v4288_v50  ;;  %v1982_v36 = vpop.f32.mrf.mxu1 }
 0x389   : > { %v1643_v7 = vadd.f32 %v1642_v29, %v1474_v25  ;;  %v5008_v25 = vld [vmem:[#allocation79_spill] sm:$0xff] }
 0x38a   : > { %v1983_v56 = vadd.f32 %v1982_v36, %v1814_v18 }
 0x38b   : > { %v2115_v51 = vpack.c.bf16 %v1643_v7, %v5003_v5 }
 0x38c   : > { %v2118_v4 = vpack.c.bf16 %v1983_v56, %v1983_v56 }
 0x38d   : > { %2243 = vst [vmem:[%s4304_s7 + $0x258] sm:$0xff] %v2115_v51  ;;  %v1475_v31 = vpop.f32.mrf.mxu2 }
 0x38e   : > { %2246 = vst [vmem:[%s4304_s7 + $0x26c] sm:$0xf] %v2118_v4  ;;  %v1476_v32 = vadd.f32 %v1475_v31, %v4300_v48 }
 0x38f   : > { %v1816_v62 = vpop.f32.mrf.mxu0 }
 0x390   : > { %v1644_v15 = vpop.f32.mrf.mxu3  ;;  %v1817_v38 = vadd.f32 %v1816_v62, %v4288_v50  ;;  %v1985_v59 = vpop.f32.mrf.mxu1 }
 0x391   : > { %v1645_v26 = vadd.f32 %v1644_v15, %v1476_v32  ;;  %v5009_v32 = vld [vmem:[#allocation80_spill] sm:$0xff] }
 0x392   : > { %v1986_v55 = vadd.f32 %v1985_v59, %v1817_v38 }
 0x393   : > { %v2117_v13 = vpack.c.bf16 %v1645_v26, %v5004_v33 }
 0x394   : > { %v2120_v53 = vpack.c.bf16 %v1986_v55, %v1986_v55 }
 0x395   : > { %2245 = vst [vmem:[%s4304_s7 + $0x264] sm:$0xff] %v2117_v13  ;;  %v1478_v20 = vpop.f32.mrf.mxu2 }
 0x396   : > { %2248 = vst [vmem:[%s4304_s7 + $0x278] sm:$0xf] %v2120_v53  ;;  %v1479_v58 = vadd.f32 %v1478_v20, %v4300_v48 }
 0x397   : > { %v1818_v39 = vpop.f32.mrf.mxu0 }
 0x398   : > { %v1647_v54 = vpop.f32.mrf.mxu3  ;;  %v1819_v28 = vadd.f32 %v1818_v39, %v4288_v50  ;;  %v1987_v30 = vpop.f32.mrf.mxu1 }
 0x399   : > { %v1648_v6 = vadd.f32 %v1647_v54, %v1479_v58  ;;  %v5010_v58 = vld [vmem:[#allocation81_spill] sm:$0xff] }
 0x39a   : > { %v1988_v37 = vadd.f32 %v1987_v30, %v1819_v28 }
 0x39b   : > { %v2119_v49 = vpack.c.bf16 %v1648_v6, %v5005_v17 }
 0x39c   : > { %v2122_v44 = vpack.c.bf16 %v1988_v37, %v1988_v37 }
 0x39d   : > { %2247 = vst [vmem:[%s4304_s7 + $0x270] sm:$0xff] %v2119_v49  ;;  %v1480_v21 = vpop.f32.mrf.mxu2 }
 0x39e   : > { %2250 = vst [vmem:[%s4304_s7 + $0x284] sm:$0xf] %v2122_v44  ;;  %v1481_v60 = vadd.f32 %v1480_v21, %v4300_v48 }
 0x39f   : > { %v1821_v19 = vpop.f32.mrf.mxu0 }
 0x3a0   : > { %v1649_v63 = vpop.f32.mrf.mxu3  ;;  %v1822_v34 = vadd.f32 %v1821_v19, %v4288_v50  ;;  %v1990_v52 = vpop.f32.mrf.mxu1 }
 0x3a1   : > { %v1650_v12 = vadd.f32 %v1649_v63, %v1481_v60  ;;  %v5011_v60 = vld [vmem:[#allocation82_spill] sm:$0xff] }
 0x3a2   : > { %v1991_v2 = vadd.f32 %v1990_v52, %v1822_v34 }
 0x3a3   : > { %v2121_v14 = vpack.c.bf16 %v1650_v12, %v5006_v41 }
 0x3a4   : > { %v2124_v46 = vpack.c.bf16 %v1991_v2, %v1991_v2 }
 0x3a5   : > { %2249 = vst [vmem:[%s4304_s7 + $0x27c] sm:$0xff] %v2121_v14  ;;  %v1483_v1 = vpop.f32.mrf.mxu2 }
 0x3a6   : > { %2252 = vst [vmem:[%s4304_s7 + $0x290] sm:$0xf] %v2124_v46  ;;  %v1484_v47 = vadd.f32 %v1483_v1, %v4300_v48 }
 0x3a7   : > { %v1823_v3 = vpop.f32.mrf.mxu0 }
 0x3a8   : > { %v1652_v43 = vpop.f32.mrf.mxu3  ;;  %v1824_v23 = vadd.f32 %v1823_v3, %v4288_v50  ;;  %v1992_v22 = vpop.f32.mrf.mxu1 }
 0x3a9   : > { %v1653_v40 = vadd.f32 %v1652_v43, %v1484_v47  ;;  %v5012_v47 = vld [vmem:[#allocation83_spill] sm:$0xff] }
 0x3aa   : > { %v1993_v57 = vadd.f32 %v1992_v22, %v1824_v23 }
 0x3ab   : > { %v2123_v24 = vpack.c.bf16 %v1653_v40, %v5007_v11 }
 0x3ac   : > { %v2126_v61 = vpack.c.bf16 %v1993_v57, %v1993_v57 }
 0x3ad   : > { %2251 = vst [vmem:[%s4304_s7 + $0x288] sm:$0xff] %v2123_v24  ;;  %v1485_v0 = vpop.f32.mrf.mxu2 }
 0x3ae   : > { %2254 = vst [vmem:[%s4304_s7 + $0x29c] sm:$0xf] %v2126_v61  ;;  %v1486_v27 = vadd.f32 %v1485_v0, %v4300_v48 }
 0x3af   : > { %v1826_v16 = vpop.f32.mrf.mxu0 }
 0x3b0   : > { %v1654_v9 = vpop.f32.mrf.mxu3  ;;  %v1827_v35 = vadd.f32 %v1826_v16, %v4288_v50  ;;  %v1995_v10 = vpop.f32.mrf.mxu1 }
 0x3b1   : > { %v1655_v8 = vadd.f32 %v1654_v9, %v1486_v27 }
 0x3b2   : > { %v1996_v45 = vadd.f32 %v1995_v10, %v1827_v35 }
 0x3b3   : > { %v2125_v29 = vpack.c.bf16 %v1655_v8, %v5008_v25 }
 0x3b4   : > { %v2128_v7 = vpack.c.bf16 %v1996_v45, %v1996_v45 }
 0x3b5   : > { %2253 = vst [vmem:[%s4304_s7 + $0x294] sm:$0xff] %v2125_v29  ;;  %v1488_v18 = vpop.f32.mrf.mxu2 }
 0x3b6   : > { %2256 = vst [vmem:[%s4304_s7 + $0x2a8] sm:$0xf] %v2128_v7  ;;  %v1489_v36 = vadd.f32 %v1488_v18, %v4300_v48  ;;  %v5014_v18 = vld [vmem:[#allocation84_spill] sm:$0xff] }
 0x3b7   : > { %v1828_v51 = vpop.f32.mrf.mxu0 }
 0x3b8   : > { %v1657_v5 = vpop.f32.mrf.mxu3  ;;  %v1829_v4 = vadd.f32 %v1828_v51, %v4288_v50  ;;  %v1997_v31 = vpop.f32.mrf.mxu1 }
 0x3b9   : > { %v1658_v56 = vadd.f32 %v1657_v5, %v1489_v36 }
 0x3ba   : > { %v1998_v62 = vadd.f32 %v1997_v31, %v1829_v4 }
 0x3bb   : > { %v2127_v15 = vpack.c.bf16 %v1658_v56, %v5009_v32 }
 0x3bc   : > { %v2130_v26 = vpack.c.bf16 %v1998_v62, %v1998_v62 }
 0x3bd   : > { %2255 = vst [vmem:[%s4304_s7 + $0x2a0] sm:$0xff] %v2127_v15  ;;  %v1490_v38 = vpop.f32.mrf.mxu2 }
 0x3be   : > { %2258 = vst [vmem:[%s4304_s7 + $0x2b4] sm:$0xf] %v2130_v26  ;;  %v1491_v59 = vadd.f32 %v1490_v38, %v4300_v48  ;;  %v5015_v26 = vld [vmem:[#allocation85_spill] sm:$0xff] }
 0x3bf   : > { %v1831_v13 = vpop.f32.mrf.mxu0 }
 0x3c0   : > { %v1659_v33 = vpop.f32.mrf.mxu3  ;;  %v1832_v53 = vadd.f32 %v1831_v13, %v4288_v50  ;;  %v2000_v20 = vpop.f32.mrf.mxu1 }
 0x3c1   : > { %v1660_v55 = vadd.f32 %v1659_v33, %v1491_v59 }
 0x3c2   : > { %v2001_v39 = vadd.f32 %v2000_v20, %v1832_v53  ;;  %v5018_v20 = vld [vmem:[#allocation86_spill] sm:$0xff] }
 0x3c3   : > { %v2129_v54 = vpack.c.bf16 %v1660_v55, %v5010_v58 }
 0x3c4   : > { %v2132_v6 = vpack.c.bf16 %v2001_v39, %v2001_v39 }
 0x3c5   : > { %2257 = vst [vmem:[%s4304_s7 + $0x2ac] sm:$0xff] %v2129_v54  ;;  %v1493_v28 = vpop.f32.mrf.mxu2 }
 0x3c6   : > { %2260 = vst [vmem:[%s4304_s7 + $0x2c0] sm:$0xf] %v2132_v6  ;;  %v1494_v30 = vadd.f32 %v1493_v28, %v4300_v48 }
 0x3c7   : > { %v1833_v49 = vpop.f32.mrf.mxu0 }
 0x3c8   : > { %v1662_v17 = vpop.f32.mrf.mxu3  ;;  %v1834_v44 = vadd.f32 %v1833_v49, %v4288_v50  ;;  %v2002_v21 = vpop.f32.mrf.mxu1 }
 0x3c9   : > { %v1663_v37 = vadd.f32 %v1662_v17, %v1494_v30 }
 0x3ca   : > { %v2003_v19 = vadd.f32 %v2002_v21, %v1834_v44 }
 0x3cb   : > { %v2131_v63 = vpack.c.bf16 %v1663_v37, %v5011_v60 }
 0x3cc   : > { %v2134_v12 = vpack.c.bf16 %v2003_v19, %v2003_v19 }
 0x3cd   : > { %2259 = vst [vmem:[%s4304_s7 + $0x2b8] sm:$0xff] %v2131_v63  ;;  %v1495_v34 = vpop.f32.mrf.mxu2 }
 0x3ce   : > { %2262 = vst [vmem:[%s4304_s7 + $0x2cc] sm:$0xf] %v2134_v12  ;;  %v1496_v52 = vadd.f32 %v1495_v34, %v4300_v48 }
 0x3cf   : > { %v1836_v14 = vpop.f32.mrf.mxu0 }
 0x3d0   : > { %v1664_v41 = vpop.f32.mrf.mxu3  ;;  %v1837_v46 = vadd.f32 %v1836_v14, %v4288_v50  ;;  %v2005_v1 = vpop.f32.mrf.mxu1 }
 0x3d1   : > { %v1665_v2 = vadd.f32 %v1664_v41, %v1496_v52 }
 0x3d2   : > { %v2006_v3 = vadd.f32 %v2005_v1, %v1837_v46 }
 0x3d3   : > { %v2133_v43 = vpack.c.bf16 %v1665_v2, %v5012_v47 }
 0x3d4   : > { %v2136_v40 = vpack.c.bf16 %v2006_v3, %v2006_v3 }
 0x3d5   : > { %2261 = vst [vmem:[%s4304_s7 + $0x2c4] sm:$0xff] %v2133_v43  ;;  %v1498_v23 = vpop.f32.mrf.mxu2 }
 0x3d6   : > { %2264 = vst [vmem:[%s4304_s7 + $0x2d8] sm:$0xf] %v2136_v40  ;;  %v1499_v22 = vadd.f32 %v1498_v23, %v4300_v48 }
 0x3d7   : > { %v1838_v24 = vpop.f32.mrf.mxu0 }
 0x3d8   : > { %v1667_v11 = vpop.f32.mrf.mxu3  ;;  %v1839_v61 = vadd.f32 %v1838_v24, %v4288_v50  ;;  %v2007_v0 = vpop.f32.mrf.mxu1 }
 0x3d9   : > { %v1668_v57 = vadd.f32 %v1667_v11, %v1499_v22 }
 0x3da   : > { %v2008_v9 = vadd.f32 %v2007_v0, %v1839_v61 }
 0x3db   : > { %v2135_v27 = vpack.c.bf16 %v1668_v57, %v4266_v42 }
 0x3dc   : > { %v2138_v16 = vpack.c.bf16 %v2008_v9, %v2008_v9 }
 0x3dd   : > { %2263 = vst [vmem:[%s4304_s7 + $0x2d0] sm:$0xff] %v2135_v27  ;;  %v1500_v8 = vpop.f32.mrf.mxu2 }
 0x3de   : > { %2266 = vst [vmem:[%s4304_s7 + $0x2e4] sm:$0xf] %v2138_v16  ;;  %v1501_v35 = vadd.f32 %v1500_v8, %v4300_v48 }
 0x3df   : > { %v1841_v25 = vpop.f32.mrf.mxu0 }
 0x3e0   : > { %v1669_v10 = vpop.f32.mrf.mxu3  ;;  %v1842_v45 = vadd.f32 %v1841_v25, %v4288_v50  ;;  %v2010_v7 = vpop.f32.mrf.mxu1 }
 0x3e1   : > { %v1670_v29 = vadd.f32 %v1669_v10, %v1501_v35 }
 0x3e2   : > { %v2011_v42 = vadd.f32 %v2010_v7, %v1842_v45 }
 0x3e3   : > { %v2137_v36 = vpack.c.bf16 %v1670_v29, %v5014_v18 }
 0x3e4   : > { %v2140_v5 = vpack.c.bf16 %v2011_v42, %v2011_v42 }
 0x3e5   : > { %2265 = vst [vmem:[%s4304_s7 + $0x2dc] sm:$0xff] %v2137_v36  ;;  %v1503_v51 = vpop.f32.mrf.mxu2 }
 0x3e6   : > { %2268 = vst [vmem:[%s4304_s7 + $0x2f0] sm:$0xf] %v2140_v5  ;;  %v1504_v56 = vadd.f32 %v1503_v51, %v4300_v48 }
 0x3e7   : > { %v1843_v31 = vpop.f32.mrf.mxu0 }
 0x3e8   : > { %v1672_v4 = vpop.f32.mrf.mxu3  ;;  %v1844_v15 = vadd.f32 %v1843_v31, %v4288_v50  ;;  %v2012_v62 = vpop.f32.mrf.mxu1 }
 0x3e9   : > { %v1673_v32 = vadd.f32 %v1672_v4, %v1504_v56 }
 0x3ea   : > { %v2013_v59 = vadd.f32 %v2012_v62, %v1844_v15 }
 0x3eb   : > { %v2139_v38 = vpack.c.bf16 %v1673_v32, %v5015_v26 }
 0x3ec   : > { %v2142_v33 = vpack.c.bf16 %v2013_v59, %v2013_v59 }
 0x3ed   : > { %2267 = vst [vmem:[%s4304_s7 + $0x2e8] sm:$0xff] %v2139_v38  ;;  %v1505_v13 = vpop.f32.mrf.mxu2 }
 0x3ee   : > { %2270 = vst [vmem:[%s4304_s7 + $0x2fc] sm:$0xf] %v2142_v33  ;;  %v1506_v55 = vadd.f32 %v1505_v13, %v4300_v48 }
 0x3f0   : > { %v1674_v50 = vpop.f32.mrf.mxu3 }
 0x3f1   : > { %v1675_v53 = vadd.f32 %v1674_v50, %v1506_v55 }
 0x3f3   : > { %v2141_v58 = vpack.c.bf16 %v1675_v53, %v5018_v20 }
 0x3f5   : > { %2269 = vst [vmem:[%s4304_s7 + $0x2f4] sm:$0xff] %v2141_v58 }
 0x3f6   : > { %3282 = shalt.err (!%p3279_p9)
}
 0x3f7   : > { %s3412_s9 = smov 192   ;;  %s3413_s10 = smov 384  }
 0x3f8   : > { %s3414_s6 = smov 12  }
 0x3f9   : > { %3027 = dma.vmem_to_hbm [thread:$0]  (%p3596_p2), %s2288_s3, 12288, %s2290_s12, %s2272_s14, %s3412_s9, %s3413_s10, %s3414_s6  }
 0x3fa PF: > { %s5019_s7 = sld [smem:[#allocation12_spill]]  ;;  %p3044_p10 = scmp.ge.s32.totalorder %s3405_s25, 2 }
 0x3fc   : > { %p3040_p11 = pnand %p3044_p10, %p3603_p6 }
 0x3fe   : > { %p3041_p12 = pneg %p3040_p11 }
 0x400   : > { %s2304_s11 = sand.u32 1, %s5019_s7  }
 0x401   : > { %s2305_s27 = scalar_lea.sflag [#allocation4], %s2304_s11 }
 0x402   : > { %3348 = dma.done.wait (%p3041_p12), %s2305_s27, 12288  }
 0x403   : > { %3350 = vsyncadd (%p3041_p12), %s2305_s27, 4294955008  ;;  %s22_s25 = sadd.s32 1, %s3405_s25   ;;  %s5022_s21 = sld [smem:[#allocation13_spill]] }
 0x404   : > { %p4740_p13 = scmp.ge.s32.totalorder %s22_s25, 6   ;;  %s5023_s14 = sld [smem:[#allocation21_spill]] }
 0x405   : > { %s5024_s1 = sld [smem:[#allocation19_spill]]  ;;  %s5030_s12 = smov %s3357_s13 }
 0x406   : > { %s5025_s4 = sld [smem:[#allocation14_spill]]  ;;  %s5032_s15 = smov %s3369_s16 }
 0x407   : > { %s5026_s20 = sld [smem:[#allocation20_spill]]  ;;  %s5033_s16 = smov %s3373_s17 }
 0x408   : > { %s5027_s22 = sld [smem:[#allocation16_spill]]  ;;  %s5035_s18 = smov %s3381_s19 }
 0x409   : > { %s5028_s3 = sld [smem:[#allocation17_spill]]  ;;  %s5031_s13 = smov %s5022_s21 }
 0x40a   : > { %s5029_s24 = sld [smem:[#allocation18_spill]]  ;;  %s5037_s21 = smov %s3397_s23 }
 0x40b   : > { %s5034_s17 = smov %s5024_s1  ;;  %21 = sbr.rel (!%p4740_p13) target bundleno = 16 (0x10), region = 101 }
 0x40c   : > { %s5036_s19 = smov %s5025_s4 }
 0x40f   : > { %s5038_s23 = smov %s5028_s3 }
 0x410   :  { %2311 = vsyncpa [#allocation3], 1 }
 0x411   :  { %2313 = vsyncpa [#allocation3 + $0x1], 1 }
 0x412   :  { %2314 = vsyncpa [#allocation6], 1 }
 0x413   :  { %2316 = vsyncpa [#allocation6 + $0x1], 1 }
 0x414   :  { %2317 = vsyncpa [#allocation4], 1 }
 0x415   :  { %2319 = vsyncpa [#allocation4 + $0x1], 1 }

</bundles_post_ra>
